<compile_context>
chip_gen: v7x
topology: tpu7x:2x2x1
jax: 0.10.0
libtpu: 0.0.40
codegen_flags: <defaults>
</compile_context>

<pallas_src>
import functools

import jax
import jax.numpy as jnp
from jax import lax
from jax.experimental import pallas as pl
from jax.experimental.pallas import tpu as pltpu

_EPS = 1e-5
_LANE = 128


def _round_up(v, m):
    return (v + m - 1) // m * m


@functools.lru_cache(maxsize=None)
def _vmem_limit_bytes():
    """Generation-aware VMEM budget (v5e/v6e: 128 MiB, v7x: 64 MiB physical)."""
    try:
        cap = int(pltpu.get_tpu_info().vmem_capacity_bytes)
    except Exception:
        cap = 0
    if cap <= 0:
        cap = 64 * 1024 * 1024                        # v7x worst case
    return max(32 * 1024 * 1024, min(cap - 16 * 1024 * 1024, 112 * 1024 * 1024))


def _compiler_params():
    # One image per grid step; "parallel" lets v7x's two TensorCores split the
    # batch.  TODO(synk): for batch == 1 additionally split over output rows so
    # the grid still has >= 2 points on v7x.
    return pltpu.CompilerParams(
        dimension_semantics=("parallel",),
        vmem_limit_bytes=_vmem_limit_bytes())


def _resident_spec(arr):
    """Constant-index VMEM-resident operand (weights / BN vectors): DMA'd once,
    single-buffered when the installed Pallas supports pipeline_mode."""
    zeros = (0,) * arr.ndim
    index_map = lambda *_: zeros
    try:
        return pl.BlockSpec(arr.shape, index_map, pipeline_mode=pl.Buffered(1))
    except Exception:                                  # older jax: default 2-buf
        return pl.BlockSpec(arr.shape, index_map)


def _taps(stride):
    """(plane, row0, col0) of the 9 conv taps on the space-to-depth layout.

    Input position s*o + d - 1 == s*(o + q) + p with d - 1 = s*q + p, so tap d
    reads parity plane p at output-aligned offset q; +1 shifts into the
    one-pixel zero border of the VMEM scratch."""
    taps = []
    for dh in range(3):
        qh, ph = divmod(dh - 1, stride)
        for dw in range(3):
            qw, pw = divmod(dw - 1, stride)
            taps.append((ph * stride + pw, 1 + qh, 1 + qw))
    return tuple(taps)


def _space_to_depth(x, s):
    """(N,H,W,C) -> (N, s*s, H/s, W/s, C); plane ph*s+pw holds x[s*i+ph, s*j+pw]."""
    n, h, w, c = x.shape
    hs, ws = h // s, w // s
    x = x.reshape(n, hs, s, ws, s, c)
    x = jnp.transpose(x, (0, 2, 4, 1, 3, 5))
    return x.reshape(n, s * s, hs, ws, c)


# ---------------------------------------------------------------------------
# Kernels (one image per grid step; im2col happens in VMEM)
# ---------------------------------------------------------------------------
def _conv1_kernel(x_ref, w_ref, s1_ref, b1_ref, s2_ref, b2_ref, o_ref, a_scr,
                  *, taps, hs, ws, cin, ho, wo, coutp):
    """relu(bn1(x)) prologue -> 3x3 conv (9 MXU matmuls over in-VMEM patches)
    -> relu(bn2(.)) epilogue."""
    cinp = a_scr.shape[-1]
    m = ho * wo
    # bn1+relu in f32, written into a zero-filled padded scratch so the conv's
    # zero padding is applied *after* the activation (exactly as in PyTorch)
    # and the padded K channels stay exact zeros.
    a_scr[...] = jnp.zeros(a_scr.shape, a_scr.dtype)
    a = jnp.maximum(
        x_ref[...].astype(jnp.float32) * s1_ref[...] + b1_ref[...], 0.0)
    a_scr[:, 1:1 + hs, 1:1 + ws, :cin] = a.astype(a_scr.dtype)

    acc = None
    for t, (p, r0, c0) in enumerate(taps):
        patch = a_scr[p, r0:r0 + ho, c0:c0 + wo, :].reshape(m, cinp)
        d = jnp.dot(patch, w_ref[t], preferred_element_type=jnp.float32)
        acc = d if acc is None else acc + d

    out = jnp.maximum(acc * s2_ref[...] + b2_ref[...], 0.0)   # bn2 + relu (f32)
    o_ref[...] = out.reshape(ho, wo, coutp).astype(o_ref.dtype)


def _conv2_add_kernel(y_ref, res_ref, w_ref, o_ref, a_scr,
                      *, taps, ho, wo, cout, coutp):
    """3x3 / stride-1 conv of relu(bn2(conv1)) + fused identity-residual add."""
    cmidp = a_scr.shape[-1]
    m = ho * wo
    a_scr[...] = jnp.zeros(a_scr.shape, a_scr.dtype)
    a_scr[0, 1:1 + ho, 1:1 + wo, :] = y_ref[...]

    acc = None
    for t, (p, r0, c0) in enumerate(taps):
        patch = a_scr[p, r0:r0 + ho, c0:c0 + wo, :].reshape(m, cmidp)
        d = jnp.dot(patch, w_ref[t], preferred_element_type=jnp.float32)
        acc = d if acc is None else acc + d

    out = acc.reshape(ho, wo, coutp)
    res = res_ref[...].astype(jnp.float32)
    if coutp == cout:
        o_ref[...] = (out + res).astype(o_ref.dtype)
    else:
        # Lane-dense full-width store first (padded lanes are exact zeros),
        # then the masked residual add on the first `cout` lanes.
        o_ref[...] = out.astype(o_ref.dtype)
        o_ref[:, :, :cout] = (out[:, :, :cout] + res).astype(o_ref.dtype)


def _conv2_shortcut_kernel(y_ref, xs_ref, w_ref, wsc_ref, s1_ref, b1_ref,
                           o_ref, a_scr,
                           *, taps, ho, wo, cin, coutp, compute_dtype):
    """3x3 / stride-1 conv of relu(bn2(conv1)) + fused 1x1-conv shortcut
    (relu(bn1(x_strided)) @ w_sc) residual epilogue."""
    cmidp = a_scr.shape[-1]
    m = ho * wo
    a_scr[...] = jnp.zeros(a_scr.shape, a_scr.dtype)
    a_scr[0, 1:1 + ho, 1:1 + wo, :] = y_ref[...]

    # Fused shortcut: bn1+relu in f32, matmul operands in compute dtype.
    a_sc = jnp.maximum(
        xs_ref[...].astype(jnp.float32) * s1_ref[...] + b1_ref[...], 0.0)
    a_sc = a_sc.reshape(m, cin).astype(compute_dtype)
    acc = jnp.dot(a_sc, wsc_ref[...], preferred_element_type=jnp.float32)

    for t, (p, r0, c0) in enumerate(taps):
        patch = a_scr[p, r0:r0 + ho, c0:c0 + wo, :].reshape(m, cmidp)
        acc = acc + jnp.dot(patch, w_ref[t], preferred_element_type=jnp.float32)

    o_ref[...] = acc.reshape(ho, wo, coutp).astype(o_ref.dtype)


# ---------------------------------------------------------------------------
# pallas_call wrappers
# ---------------------------------------------------------------------------
def _conv1(xsd, w1p, s1, b1, s2p, b2p, *, stride, ho, wo, compute_dtype):
    n, nplanes, hs, ws, cin = xsd.shape
    _, cinp, coutp = w1p.shape
    kernel = functools.partial(
        _conv1_kernel, taps=_taps(stride), hs=hs, ws=ws, cin=cin,
        ho=ho, wo=wo, coutp=coutp)
    out_bytes = ho * wo * coutp * jnp.dtype(compute_dtype).itemsize
    cost = pl.CostEstimate(
        flops=2 * n * ho * wo * 9 * cinp * coutp,
        transcendentals=0,
        bytes_accessed=(xsd.size * xsd.dtype.itemsize
                        + w1p.size * w1p.dtype.itemsize + n * out_bytes))
    return pl.pallas_call(
        kernel,
        out_shape=jax.ShapeDtypeStruct((n, ho, wo, coutp), compute_dtype),
        grid=(n,),
        in_specs=[
            pl.BlockSpec((None, nplanes, hs, ws, cin),
                         lambda i: (i, 0, 0, 0, 0)),
            _resident_spec(w1p), _resident_spec(s1), _resident_spec(b1),
            _resident_spec(s2p), _resident_spec(b2p),
        ],
        out_specs=pl.BlockSpec((None, ho, wo, coutp), lambda i: (i, 0, 0, 0)),
        scratch_shapes=[pltpu.VMEM((nplanes, hs + 2, ws + 2, cinp),
                                   compute_dtype)],
        compiler_params=_compiler_params(),
        cost_estimate=cost,
    )(xsd, w1p, s1, b1, s2p, b2p)


def _conv2_add(out1, res, w2p, *, cout):
    n, ho, wo, cmidp = out1.shape
    coutp = w2p.shape[-1]
    kernel = functools.partial(
        _conv2_add_kernel, taps=_taps(1), ho=ho, wo=wo, cout=cout, coutp=coutp)
    cost = pl.CostEstimate(
        flops=2 * n * ho * wo * 9 * cmidp * coutp,
        transcendentals=0,
        bytes_accessed=(out1.size * out1.dtype.itemsize
                        + res.size * res.dtype.itemsize
                        + w2p.size * w2p.dtype.itemsize
                        + n * ho * wo * coutp * 4))
    return pl.pallas_call(
        kernel,
        out_shape=jax.ShapeDtypeStruct((n, ho, wo, coutp), jnp.float32),
        grid=(n,),
        in_specs=[
            pl.BlockSpec((None, ho, wo, cmidp), lambda i: (i, 0, 0, 0)),
            pl.BlockSpec((None, ho, wo, cout), lambda i: (i, 0, 0, 0)),
            _resident_spec(w2p),
        ],
        out_specs=pl.BlockSpec((None, ho, wo, coutp), lambda i: (i, 0, 0, 0)),
        scratch_shapes=[pltpu.VMEM((1, ho + 2, wo + 2, cmidp), out1.dtype)],
        compiler_params=_compiler_params(),
        cost_estimate=cost,
    )(out1, res, w2p)


def _conv2_shortcut(out1, xs, w2p, wscp, s1, b1, *, compute_dtype):
    n, ho, wo, cmidp = out1.shape
    cin = xs.shape[-1]
    coutp = w2p.shape[-1]
    kernel = functools.partial(
        _conv2_shortcut_kernel, taps=_taps(1), ho=ho, wo=wo, cin=cin,
        coutp=coutp, compute_dtype=compute_dtype)
    cost = pl.CostEstimate(
        flops=2 * n * ho * wo * (9 * cmidp + cin) * coutp,
        transcendentals=0,
        bytes_accessed=(out1.size * out1.dtype.itemsize
                        + xs.size * xs.dtype.itemsize
                        + w2p.size * w2p.dtype.itemsize
                        + wscp.size * wscp.dtype.itemsize
                        + n * ho * wo * coutp * 4))
    return pl.pallas_call(
        kernel,
        out_shape=jax.ShapeDtypeStruct((n, ho, wo, coutp), jnp.float32),
        grid=(n,),
        in_specs=[
            pl.BlockSpec((None, ho, wo, cmidp), lambda i: (i, 0, 0, 0)),
            pl.BlockSpec((None, ho, wo, cin), lambda i: (i, 0, 0, 0)),
            _resident_spec(w2p), _resident_spec(wscp),
            _resident_spec(s1), _resident_spec(b1),
        ],
        out_specs=pl.BlockSpec((None, ho, wo, coutp), lambda i: (i, 0, 0, 0)),
        scratch_shapes=[pltpu.VMEM((1, ho + 2, wo + 2, cmidp), out1.dtype)],
        compiler_params=_compiler_params(),
        cost_estimate=cost,
    )(out1, xs, w2p, wscp, s1, b1)


# ---------------------------------------------------------------------------
# BasicBlock forward (Pallas) and pure-JAX reference
# ---------------------------------------------------------------------------
def _bn_affine(p, prefix):
    scale = p[prefix + "_gamma"] / jnp.sqrt(p[prefix + "_var"] + _EPS)
    bias = p[prefix + "_beta"] - p[prefix + "_mean"] * scale
    return scale, bias


def basic_block_forward_nhwc(x, params, stride, equal_in_out,
                             compute_dtype=jnp.bfloat16):
    """NHWC BasicBlock forward.  Chain this directly when stacking blocks; the
    NCHW transpose only happens in `basic_block_forward`."""
    n, h, w, cin = x.shape
    cout = params["conv1_w"].shape[-1]
    s = int(stride)
    if h % s or w % s:
        # TODO(synk): odd spatial extents with stride 2 need one extra pad row.
        raise NotImplementedError("H and W must be divisible by the stride")
    if equal_in_out and (cin != cout or s != 1):
        raise ValueError("equal_in_out requires in_planes == out_planes and "
                         "stride 1 (same constraint as the PyTorch module)")
    hs, ws = h // s, w // s
    ho, wo = hs, ws                       # 3x3 / pad 1 / stride s, H % s == 0
    cinp = _round_up(cin, _LANE)
    coutp = _round_up(cout, _LANE)

    s1, b1 = _bn_affine(params, "bn1")
    s2, b2 = _bn_affine(params, "bn2")
    s1r = s1.reshape(1, cin).astype(jnp.float32)
    b1r = b1.reshape(1, cin).astype(jnp.float32)
    s2p = jnp.pad(s2, (0, coutp - cout)).reshape(1, coutp).astype(jnp.float32)
    b2p = jnp.pad(b2, (0, coutp - cout)).reshape(1, coutp).astype(jnp.float32)

    # conv1 (3x3 / stride s) fused with bn1+relu prologue and bn2+relu epilogue.
    # Space-to-depth turns the strided conv into unit-stride taps in VMEM.
    xsd = _space_to_depth(x, s)                        # (n, s*s, hs, ws, cin)
    w1p = jnp.pad(params["conv1_w"].reshape(9, cin, cout),
                  ((0, 0), (0, cinp - cin), (0, coutp - cout))
                  ).astype(compute_dtype)
    out1 = _conv1(xsd, w1p, s1r, b1r, s2p, b2p, stride=s, ho=ho, wo=wo,
                  compute_dtype=compute_dtype)         # (n, ho, wo, coutp)

    # conv2 (3x3 / stride 1) with the residual fused into its epilogue.
    cmidp = coutp
    w2p = jnp.pad(params["conv2_w"].reshape(9, cout, cout),
                  ((0, 0), (0, cmidp - cout), (0, coutp - cout))
                  ).astype(compute_dtype)
    if equal_in_out:
        out = _conv2_add(out1, x, w2p, cout=cout)
    else:
        xs = x[:, ::s, ::s, :]            # strided x for the fused 1x1 shortcut
        wscp = jnp.pad(params["conv_sc_w"].reshape(cin, cout),
                       ((0, 0), (0, coutp - cout))).astype(compute_dtype)
        out = _conv2_shortcut(out1, xs, w2p, wscp, s1r, b1r,
                              compute_dtype=compute_dtype)
    # Drop the lane padding once, at the block boundary.
    return out[..., :cout]


def basic_block_forward(x_nchw, params, stride, equal_in_out,
                        compute_dtype=jnp.bfloat16):
    # NCHW<->NHWC conversion once per call; when stacking blocks, call
    # basic_block_forward_nhwc directly and transpose only at model entry/exit.
    x = jnp.transpose(x_nchw, (0, 2, 3, 1))
    y = basic_block_forward_nhwc(x, params, stride, equal_in_out, compute_dtype)
    return jnp.transpose(y, (0, 3, 1, 2))


def basic_block_reference(x_nchw, params, stride, equal_in_out,
                          compute_dtype=jnp.float32):
    x = jnp.transpose(x_nchw, (0, 2, 3, 1)).astype(jnp.float32)
    s1, b1 = _bn_affine(params, "bn1")
    s2, b2 = _bn_affine(params, "bn2")

    def conv(v, w, s, p):
        return lax.conv_general_dilated(
            v.astype(compute_dtype), w.astype(compute_dtype), (s, s),
            [(p, p), (p, p)], dimension_numbers=("NHWC", "HWIO", "NHWC"),
            preferred_element_type=jnp.float32)

    def bnrelu(v, sc, bi):
        return jnp.maximum(v * sc + bi, 0.0)

    if equal_in_out:
        out = bnrelu(x, s1, b1)
        shortcut = x
    else:
        x = bnrelu(x, s1, b1)
        out = x
        shortcut = conv(x, params["conv_sc_w"], stride, 0)

    out = conv(out, params["conv1_w"], stride, 1)
    out = bnrelu(out, s2, b2)
    out = conv(out, params["conv2_w"], 1, 1)
    return jnp.transpose(shortcut + out, (0, 3, 1, 2))


def make_params(key, in_planes, out_planes, equal_in_out):
    ks = jax.random.split(key, 12)
    p = {
        "bn1_gamma": 1.0 + 0.1 * jax.random.normal(ks[0], (in_planes,), jnp.float32),
        "bn1_beta": 0.1 * jax.random.normal(ks[1], (in_planes,), jnp.float32),
        "bn1_mean": 0.1 * jax.random.normal(ks[2], (in_planes,), jnp.float32),
        "bn1_var": jax.random.uniform(ks[3], (in_planes,), jnp.float32, 0.5, 1.5),
        "conv1_w": 0.1 * jax.random.normal(ks[4], (3, 3, in_planes, out_planes), jnp.float32),
        "bn2_gamma": 1.0 + 0.1 * jax.random.normal(ks[5], (out_planes,), jnp.float32),
        "bn2_beta": 0.1 * jax.random.normal(ks[6], (out_planes,), jnp.float32),
        "bn2_mean": 0.1 * jax.random.normal(ks[7], (out_planes,), jnp.float32),
        "bn2_var": jax.random.uniform(ks[8], (out_planes,), jnp.float32, 0.5, 1.5),
        "conv2_w": 0.1 * jax.random.normal(ks[9], (3, 3, out_planes, out_planes), jnp.float32),
    }
    if not equal_in_out:
        p["conv_sc_w"] = 0.1 * jax.random.normal(
            ks[10], (1, 1, in_planes, out_planes), jnp.float32)
    return p


if __name__ == "__main__":
    root = jax.random.PRNGKey(0)
    k_x1, k_p1, k_x2, k_p2, k_x3, k_p3 = jax.random.split(root, 6)

    fwd = jax.jit(basic_block_forward,
                  static_argnames=("stride", "equal_in_out", "compute_dtype"))

    # Case 1: in_planes != out_planes, stride 2 (fused 1x1-conv shortcut), f32.
    x1 = jax.random.normal(k_x1, (2, 4, 16, 16), jnp.float32)
    p1 = make_params(k_p1, 4, 8, equal_in_out=False)
    y1 = jax.block_until_ready(
        fwd(x1, p1, stride=2, equal_in_out=False, compute_dtype=jnp.float32))
    r1 = basic_block_reference(x1, p1, 2, False, compute_dtype=jnp.float32)
    assert y1.shape == (2, 8, 8, 8), y1.shape
    assert jnp.allclose(y1, r1, atol=1e-3, rtol=1e-3), \
        float(jnp.max(jnp.abs(y1 - r1)))

    # Case 2: in_planes == out_planes, stride 1 (identity residual fused), f32.
    x2 = jax.random.normal(k_x2, (2, 8, 16, 16), jnp.float32)
    p2 = make_params(k_p2, 8, 8, equal_in_out=True)
    y2 = jax.block_until_ready(
        fwd(x2, p2, stride=1, equal_in_out=True, compute_dtype=jnp.float32))
    r2 = basic_block_reference(x2, p2, 1, True, compute_dtype=jnp.float32)
    assert y2.shape == (2, 8, 16, 16), y2.shape
    assert jnp.allclose(y2, r2, atol=1e-3, rtol=1e-3), \
        float(jnp.max(jnp.abs(y2 - r2)))

    # Case 3: larger spatial extent, default bf16 matmul operands (f32 BN math,
    # f32 accumulate, f32 residual/output), stride 2 with fused shortcut.
    x3 = jax.random.normal(k_x3, (2, 16, 48, 48), jnp.float32)
    p3 = make_params(k_p3, 16, 32, equal_in_out=False)
    y3 = jax.block_until_ready(fwd(x3, p3, stride=2, equal_in_out=False))
    r3 = basic_block_reference(x3, p3, 2, False, compute_dtype=jnp.bfloat16)
    assert y3.shape == (2, 32, 24, 24), y3.shape
    assert jnp.allclose(y3, r3, atol=5e-2, rtol=5e-2), \
        float(jnp.max(jnp.abs(y3 - r3)))

    print("KERNEL_OK")
</pallas_src>

<mosaic_0001>
module attributes {stable_mosaic.version = 11 : i64} {
  func.func @_conv1_kernel(%arg0: i32, %arg1: memref<1x4x8x8x4xf32, #tpu.memory_space<vmem>>, %arg2: memref<9x128x128xf32, #tpu.memory_space<vmem>>, %arg3: memref<1x4xf32, #tpu.memory_space<vmem>>, %arg4: memref<1x4xf32, #tpu.memory_space<vmem>>, %arg5: memref<1x128xf32, #tpu.memory_space<vmem>>, %arg6: memref<1x128xf32, #tpu.memory_space<vmem>>, %arg7: memref<1x8x8x128xf32, #tpu.memory_space<vmem>>, %arg8: memref<4x10x10x128xf32, #tpu.memory_space<vmem>>) attributes {dimension_semantics = [#tpu.dimension_semantics<parallel>], iteration_bounds = array<i64: 2>, scalar_prefetch = 0 : i64, scratch_operands = 1 : i64, tpu.core_type = #tpu.core_type<tc>, window_params = [{transform_indices = @transform_0, window_bounds = array<i64: 1, 4, 8, 8, 4>}, {pipeline_mode = #tpu.pipeline_mode<synchronous>, transform_indices = @transform_1, window_bounds = array<i64: 9, 128, 128>}, {pipeline_mode = #tpu.pipeline_mode<synchronous>, transform_indices = @transform_2, window_bounds = array<i64: 1, 4>}, {pipeline_mode = #tpu.pipeline_mode<synchronous>, transform_indices = @transform_3, window_bounds = array<i64: 1, 4>}, {pipeline_mode = #tpu.pipeline_mode<synchronous>, transform_indices = @transform_4, window_bounds = array<i64: 1, 128>}, {pipeline_mode = #tpu.pipeline_mode<synchronous>, transform_indices = @transform_5, window_bounds = array<i64: 1, 128>}, {transform_indices = @transform_6, window_bounds = array<i64: 1, 8, 8, 128>}]} {
    %cst = arith.constant 0.000000e+00 : f32
    %0 = vector.broadcast %cst : f32 to vector<4x10x10x128xf32>
    %c0 = arith.constant 0 : index
    %c0_0 = arith.constant 0 : index
    %c0_1 = arith.constant 0 : index
    %c0_2 = arith.constant 0 : index
    %1 = vector.load %arg8[%c0, %c0_0, %c0_1, %c0_2] : memref<4x10x10x128xf32, #tpu.memory_space<vmem>>, vector<4x10x10x128xf32>
    tpu.vector_store %arg8[%c0, %c0_0, %c0_1, %c0_2], %0 {strides = array<i32>} : memref<4x10x10x128xf32, #tpu.memory_space<vmem>>, vector<4x10x10x128xf32>,
    %c0_3 = arith.constant 0 : index
    %c0_4 = arith.constant 0 : index
    %c0_5 = arith.constant 0 : index
    %c0_6 = arith.constant 0 : index
    %c0_7 = arith.constant 0 : index
    %2 = vector.load %arg1[%c0_3, %c0_4, %c0_5, %c0_6, %c0_7] : memref<1x4x8x8x4xf32, #tpu.memory_space<vmem>>, vector<1x4x8x8x4xf32>
    %3 = vector.shape_cast %2 : vector<1x4x8x8x4xf32> to vector<4x8x8x4xf32>
    %c0_8 = arith.constant 0 : index
    %c0_9 = arith.constant 0 : index
    %4 = vector.load %arg3[%c0_8, %c0_9] : memref<1x4xf32, #tpu.memory_space<vmem>>, vector<1x4xf32>
    %5 = vector.shape_cast %4 : vector<1x4xf32> to vector<1x1x1x4xf32>
    %6 = vector.broadcast %5 : vector<1x1x1x4xf32> to vector<4x8x8x4xf32>
    %7 = arith.mulf %3, %6 : vector<4x8x8x4xf32>
    %c0_10 = arith.constant 0 : index
    %c0_11 = arith.constant 0 : index
    %8 = vector.load %arg4[%c0_10, %c0_11] : memref<1x4xf32, #tpu.memory_space<vmem>>, vector<1x4xf32>
    %9 = vector.shape_cast %8 : vector<1x4xf32> to vector<1x1x1x4xf32>
    %10 = vector.broadcast %9 : vector<1x1x1x4xf32> to vector<4x8x8x4xf32>
    %11 = arith.addf %7, %10 : vector<4x8x8x4xf32>
    %cst_12 = arith.constant 0.000000e+00 : f32
    %12 = vector.broadcast %cst_12 : f32 to vector<4x8x8x4xf32>
    %13 = arith.maximumf %11, %12 : vector<4x8x8x4xf32>
    %c0_13 = arith.constant 0 : index
    %c1 = arith.constant 1 : index
    %c1_14 = arith.constant 1 : index
    %c0_15 = arith.constant 0 : index
    %14 = vector.load %arg8[%c0_13, %c1, %c1_14, %c0_15] : memref<4x10x10x128xf32, #tpu.memory_space<vmem>>, vector<4x8x8x4xf32>
    tpu.vector_store %arg8[%c0_13, %c1, %c1_14, %c0_15], %13 {strides = array<i32>} : memref<4x10x10x128xf32, #tpu.memory_space<vmem>>, vector<4x8x8x4xf32>,
    %c3 = arith.constant 3 : index
    %c0_16 = arith.constant 0 : index
    %c0_17 = arith.constant 0 : index
    %c0_18 = arith.constant 0 : index
    %15 = vector.load %arg8[%c3, %c0_16, %c0_17, %c0_18] : memref<4x10x10x128xf32, #tpu.memory_space<vmem>>, vector<1x8x8x128xf32>
    %16 = vector.shape_cast %15 : vector<1x8x8x128xf32> to vector<8x8x128xf32>
    %17 = vector.shape_cast %16 : vector<8x8x128xf32> to vector<64x128xf32>
    %c0_19 = arith.constant 0 : index
    %c0_20 = arith.constant 0 : index
    %c0_21 = arith.constant 0 : index
    %18 = vector.load %arg2[%c0_19, %c0_20, %c0_21] : memref<9x128x128xf32, #tpu.memory_space<vmem>>, vector<1x128x128xf32>
    %19 = vector.shape_cast %18 : vector<1x128x128xf32> to vector<128x128xf32>
    %cst_22 = arith.constant dense<0.000000e+00> : vector<64x128xf32>
    %20 = tpu.matmul %17, %19, %cst_22 {dimension_numbers = #tpu.dot_dimension_numbers<[1], [0], [0], [1], [0, 0, 1, 1], [], []>} : vector<64x128xf32>, vector<128x128xf32>, vector<64x128xf32> -> vector<64x128xf32>
    %c2 = arith.constant 2 : index
    %c0_23 = arith.constant 0 : index
    %c1_24 = arith.constant 1 : index
    %c0_25 = arith.constant 0 : index
    %21 = vector.load %arg8[%c2, %c0_23, %c1_24, %c0_25] : memref<4x10x10x128xf32, #tpu.memory_space<vmem>>, vector<1x8x8x128xf32>
    %22 = vector.shape_cast %21 : vector<1x8x8x128xf32> to vector<8x8x128xf32>
    %23 = vector.shape_cast %22 : vector<8x8x128xf32> to vector<64x128xf32>
    %c1_26 = arith.constant 1 : index
    %c0_27 = arith.constant 0 : index
    %c0_28 = arith.constant 0 : index
    %24 = vector.load %arg2[%c1_26, %c0_27, %c0_28] : memref<9x128x128xf32, #tpu.memory_space<vmem>>, vector<1x128x128xf32>
    %25 = vector.shape_cast %24 : vector<1x128x128xf32> to vector<128x128xf32>
    %cst_29 = arith.constant dense<0.000000e+00> : vector<64x128xf32>
    %26 = tpu.matmul %23, %25, %cst_29 {dimension_numbers = #tpu.dot_dimension_numbers<[1], [0], [0], [1], [0, 0, 1, 1], [], []>} : vector<64x128xf32>, vector<128x128xf32>, vector<64x128xf32> -> vector<64x128xf32>
    %27 = arith.addf %20, %26 : vector<64x128xf32>
    %c3_30 = arith.constant 3 : index
    %c0_31 = arith.constant 0 : index
    %c1_32 = arith.constant 1 : index
    %c0_33 = arith.constant 0 : index
    %28 = vector.load %arg8[%c3_30, %c0_31, %c1_32, %c0_33] : memref<4x10x10x128xf32, #tpu.memory_space<vmem>>, vector<1x8x8x128xf32>
    %29 = vector.shape_cast %28 : vector<1x8x8x128xf32> to vector<8x8x128xf32>
    %30 = vector.shape_cast %29 : vector<8x8x128xf32> to vector<64x128xf32>
    %c2_34 = arith.constant 2 : index
    %c0_35 = arith.constant 0 : index
    %c0_36 = arith.constant 0 : index
    %31 = vector.load %arg2[%c2_34, %c0_35, %c0_36] : memref<9x128x128xf32, #tpu.memory_space<vmem>>, vector<1x128x128xf32>
    %32 = vector.shape_cast %31 : vector<1x128x128xf32> to vector<128x128xf32>
    %cst_37 = arith.constant dense<0.000000e+00> : vector<64x128xf32>
    %33 = tpu.matmul %30, %32, %cst_37 {dimension_numbers = #tpu.dot_dimension_numbers<[1], [0], [0], [1], [0, 0, 1, 1], [], []>} : vector<64x128xf32>, vector<128x128xf32>, vector<64x128xf32> -> vector<64x128xf32>
    %34 = arith.addf %27, %33 : vector<64x128xf32>
    %c1_38 = arith.constant 1 : index
    %c1_39 = arith.constant 1 : index
    %c0_40 = arith.constant 0 : index
    %c0_41 = arith.constant 0 : index
    %35 = vector.load %arg8[%c1_38, %c1_39, %c0_40, %c0_41] : memref<4x10x10x128xf32, #tpu.memory_space<vmem>>, vector<1x8x8x128xf32>
    %36 = vector.shape_cast %35 : vector<1x8x8x128xf32> to vector<8x8x128xf32>
    %37 = vector.shape_cast %36 : vector<8x8x128xf32> to vector<64x128xf32>
    %c3_42 = arith.constant 3 : index
    %c0_43 = arith.constant 0 : index
    %c0_44 = arith.constant 0 : index
    %38 = vector.load %arg2[%c3_42, %c0_43, %c0_44] : memref<9x128x128xf32, #tpu.memory_space<vmem>>, vector<1x128x128xf32>
    %39 = vector.shape_cast %38 : vector<1x128x128xf32> to vector<128x128xf32>
    %cst_45 = arith.constant dense<0.000000e+00> : vector<64x128xf32>
    %40 = tpu.matmul %37, %39, %cst_45 {dimension_numbers = #tpu.dot_dimension_numbers<[1], [0], [0], [1], [0, 0, 1, 1], [], []>} : vector<64x128xf32>, vector<128x128xf32>, vector<64x128xf32> -> vector<64x128xf32>
    %41 = arith.addf %34, %40 : vector<64x128xf32>
    %c0_46 = arith.constant 0 : index
    %c1_47 = arith.constant 1 : index
    %c1_48 = arith.constant 1 : index
    %c0_49 = arith.constant 0 : index
    %42 = vector.load %arg8[%c0_46, %c1_47, %c1_48, %c0_49] : memref<4x10x10x128xf32, #tpu.memory_space<vmem>>, vector<1x8x8x128xf32>
    %43 = vector.shape_cast %42 : vector<1x8x8x128xf32> to vector<8x8x128xf32>
    %44 = vector.shape_cast %43 : vector<8x8x128xf32> to vector<64x128xf32>
    %c4 = arith.constant 4 : index
    %c0_50 = arith.constant 0 : index
    %c0_51 = arith.constant 0 : index
    %45 = vector.load %arg2[%c4, %c0_50, %c0_51] : memref<9x128x128xf32, #tpu.memory_space<vmem>>, vector<1x128x128xf32>
    %46 = vector.shape_cast %45 : vector<1x128x128xf32> to vector<128x128xf32>
    %cst_52 = arith.constant dense<0.000000e+00> : vector<64x128xf32>
    %47 = tpu.matmul %44, %46, %cst_52 {dimension_numbers = #tpu.dot_dimension_numbers<[1], [0], [0], [1], [0, 0, 1, 1], [], []>} : vector<64x128xf32>, vector<128x128xf32>, vector<64x128xf32> -> vector<64x128xf32>
    %48 = arith.addf %41, %47 : vector<64x128xf32>
    %c1_53 = arith.constant 1 : index
    %c1_54 = arith.constant 1 : index
    %c1_55 = arith.constant 1 : index
    %c0_56 = arith.constant 0 : index
    %49 = vector.load %arg8[%c1_53, %c1_54, %c1_55, %c0_56] : memref<4x10x10x128xf32, #tpu.memory_space<vmem>>, vector<1x8x8x128xf32>
    %50 = vector.shape_cast %49 : vector<1x8x8x128xf32> to vector<8x8x128xf32>
    %51 = vector.shape_cast %50 : vector<8x8x128xf32> to vector<64x128xf32>
    %c5 = arith.constant 5 : index
    %c0_57 = arith.constant 0 : index
    %c0_58 = arith.constant 0 : index
    %52 = vector.load %arg2[%c5, %c0_57, %c0_58] : memref<9x128x128xf32, #tpu.memory_space<vmem>>, vector<1x128x128xf32>
    %53 = vector.shape_cast %52 : vector<1x128x128xf32> to vector<128x128xf32>
    %cst_59 = arith.constant dense<0.000000e+00> : vector<64x128xf32>
    %54 = tpu.matmul %51, %53, %cst_59 {dimension_numbers = #tpu.dot_dimension_numbers<[1], [0], [0], [1], [0, 0, 1, 1], [], []>} : vector<64x128xf32>, vector<128x128xf32>, vector<64x128xf32> -> vector<64x128xf32>
    %55 = arith.addf %48, %54 : vector<64x128xf32>
    %c3_60 = arith.constant 3 : index
    %c1_61 = arith.constant 1 : index
    %c0_62 = arith.constant 0 : index
    %c0_63 = arith.constant 0 : index
    %56 = vector.load %arg8[%c3_60, %c1_61, %c0_62, %c0_63] : memref<4x10x10x128xf32, #tpu.memory_space<vmem>>, vector<1x8x8x128xf32>
    %57 = vector.shape_cast %56 : vector<1x8x8x128xf32> to vector<8x8x128xf32>
    %58 = vector.shape_cast %57 : vector<8x8x128xf32> to vector<64x128xf32>
    %c6 = arith.constant 6 : index
    %c0_64 = arith.constant 0 : index
    %c0_65 = arith.constant 0 : index
    %59 = vector.load %arg2[%c6, %c0_64, %c0_65] : memref<9x128x128xf32, #tpu.memory_space<vmem>>, vector<1x128x128xf32>
    %60 = vector.shape_cast %59 : vector<1x128x128xf32> to vector<128x128xf32>
    %cst_66 = arith.constant dense<0.000000e+00> : vector<64x128xf32>
    %61 = tpu.matmul %58, %60, %cst_66 {dimension_numbers = #tpu.dot_dimension_numbers<[1], [0], [0], [1], [0, 0, 1, 1], [], []>} : vector<64x128xf32>, vector<128x128xf32>, vector<64x128xf32> -> vector<64x128xf32>
    %62 = arith.addf %55, %61 : vector<64x128xf32>
    %c2_67 = arith.constant 2 : index
    %c1_68 = arith.constant 1 : index
    %c1_69 = arith.constant 1 : index
    %c0_70 = arith.constant 0 : index
    %63 = vector.load %arg8[%c2_67, %c1_68, %c1_69, %c0_70] : memref<4x10x10x128xf32, #tpu.memory_space<vmem>>, vector<1x8x8x128xf32>
    %64 = vector.shape_cast %63 : vector<1x8x8x128xf32> to vector<8x8x128xf32>
    %65 = vector.shape_cast %64 : vector<8x8x128xf32> to vector<64x128xf32>
    %c7 = arith.constant 7 : index
    %c0_71 = arith.constant 0 : index
    %c0_72 = arith.constant 0 : index
    %66 = vector.load %arg2[%c7, %c0_71, %c0_72] : memref<9x128x128xf32, #tpu.memory_space<vmem>>, vector<1x128x128xf32>
    %67 = vector.shape_cast %66 : vector<1x128x128xf32> to vector<128x128xf32>
    %cst_73 = arith.constant dense<0.000000e+00> : vector<64x128xf32>
    %68 = tpu.matmul %65, %67, %cst_73 {dimension_numbers = #tpu.dot_dimension_numbers<[1], [0], [0], [1], [0, 0, 1, 1], [], []>} : vector<64x128xf32>, vector<128x128xf32>, vector<64x128xf32> -> vector<64x128xf32>
    %69 = arith.addf %62, %68 : vector<64x128xf32>
    %c3_74 = arith.constant 3 : index
    %c1_75 = arith.constant 1 : index
    %c1_76 = arith.constant 1 : index
    %c0_77 = arith.constant 0 : index
    %70 = vector.load %arg8[%c3_74, %c1_75, %c1_76, %c0_77] : memref<4x10x10x128xf32, #tpu.memory_space<vmem>>, vector<1x8x8x128xf32>
    %71 = vector.shape_cast %70 : vector<1x8x8x128xf32> to vector<8x8x128xf32>
    %72 = vector.shape_cast %71 : vector<8x8x128xf32> to vector<64x128xf32>
    %c8 = arith.constant 8 : index
    %c0_78 = arith.constant 0 : index
    %c0_79 = arith.constant 0 : index
    %73 = vector.load %arg2[%c8, %c0_78, %c0_79] : memref<9x128x128xf32, #tpu.memory_space<vmem>>, vector<1x128x128xf32>
    %74 = vector.shape_cast %73 : vector<1x128x128xf32> to vector<128x128xf32>
    %cst_80 = arith.constant dense<0.000000e+00> : vector<64x128xf32>
    %75 = tpu.matmul %72, %74, %cst_80 {dimension_numbers = #tpu.dot_dimension_numbers<[1], [0], [0], [1], [0, 0, 1, 1], [], []>} : vector<64x128xf32>, vector<128x128xf32>, vector<64x128xf32> -> vector<64x128xf32>
    %76 = arith.addf %69, %75 : vector<64x128xf32>
    %c0_81 = arith.constant 0 : index
    %c0_82 = arith.constant 0 : index
    %77 = vector.load %arg5[%c0_81, %c0_82] : memref<1x128xf32, #tpu.memory_space<vmem>>, vector<1x128xf32>
    %78 = vector.broadcast %77 : vector<1x128xf32> to vector<64x128xf32>
    %79 = arith.mulf %76, %78 : vector<64x128xf32>
    %c0_83 = arith.constant 0 : index
    %c0_84 = arith.constant 0 : index
    %80 = vector.load %arg6[%c0_83, %c0_84] : memref<1x128xf32, #tpu.memory_space<vmem>>, vector<1x128xf32>
    %81 = vector.broadcast %80 : vector<1x128xf32> to vector<64x128xf32>
    %82 = arith.addf %79, %81 : vector<64x128xf32>
    %cst_85 = arith.constant 0.000000e+00 : f32
    %83 = vector.broadcast %cst_85 : f32 to vector<64x128xf32>
    %84 = arith.maximumf %82, %83 : vector<64x128xf32>
    %85 = vector.shape_cast %84 : vector<64x128xf32> to vector<8x8x128xf32>
    %c0_86 = arith.constant 0 : index
    %c0_87 = arith.constant 0 : index
    %c0_88 = arith.constant 0 : index
    %c0_89 = arith.constant 0 : index
    %86 = vector.load %arg7[%c0_86, %c0_87, %c0_88, %c0_89] : memref<1x8x8x128xf32, #tpu.memory_space<vmem>>, vector<1x8x8x128xf32>
    %87 = vector.shape_cast %86 : vector<1x8x8x128xf32> to vector<8x8x128xf32>
    %88 = vector.shape_cast %85 : vector<8x8x128xf32> to vector<1x8x8x128xf32>
    tpu.vector_store %arg7[%c0_86, %c0_87, %c0_88, %c0_89], %88 {strides = array<i32>} : memref<1x8x8x128xf32, #tpu.memory_space<vmem>>, vector<1x8x8x128xf32>,
    return
  }
  func.func @transform_0(%arg0: i32) -> (i32, i32, i32, i32, i32) {
    %c0_i32 = arith.constant 0 : i32
    %c0_i32_0 = arith.constant 0 : i32
    %c0_i32_1 = arith.constant 0 : i32
    %c0_i32_2 = arith.constant 0 : i32
    %c0_i32_3 = arith.constant 0 : i32
    return %arg0, %c0_i32, %c0_i32_0, %c0_i32_1, %c0_i32_2 : i32, i32, i32, i32, i32
  }
  func.func @transform_1(%arg0: i32) -> (i32, i32, i32) {
    %c0_i32 = arith.constant 0 : i32
    %c0_i32_0 = arith.constant 0 : i32
    %c0_i32_1 = arith.constant 0 : i32
    %c0_i32_2 = arith.constant 0 : i32
    return %c0_i32, %c0_i32_0, %c0_i32_1 : i32, i32, i32
  }
  func.func @transform_2(%arg0: i32) -> (i32, i32) {
    %c0_i32 = arith.constant 0 : i32
    %c0_i32_0 = arith.constant 0 : i32
    %c0_i32_1 = arith.constant 0 : i32
    return %c0_i32, %c0_i32_0 : i32, i32
  }
  func.func @transform_3(%arg0: i32) -> (i32, i32) {
    %c0_i32 = arith.constant 0 : i32
    %c0_i32_0 = arith.constant 0 : i32
    %c0_i32_1 = arith.constant 0 : i32
    return %c0_i32, %c0_i32_0 : i32, i32
  }
  func.func @transform_4(%arg0: i32) -> (i32, i32) {
    %c0_i32 = arith.constant 0 : i32
    %c0_i32_0 = arith.constant 0 : i32
    %c0_i32_1 = arith.constant 0 : i32
    return %c0_i32, %c0_i32_0 : i32, i32
  }
  func.func @transform_5(%arg0: i32) -> (i32, i32) {
    %c0_i32 = arith.constant 0 : i32
    %c0_i32_0 = arith.constant 0 : i32
    %c0_i32_1 = arith.constant 0 : i32
    return %c0_i32, %c0_i32_0 : i32, i32
  }
  func.func @transform_6(%arg0: i32) -> (i32, i32, i32, i32) {
    %c0_i32 = arith.constant 0 : i32
    %c0_i32_0 = arith.constant 0 : i32
    %c0_i32_1 = arith.constant 0 : i32
    %c0_i32_2 = arith.constant 0 : i32
    return %arg0, %c0_i32, %c0_i32_0, %c0_i32_1 : i32, i32, i32, i32
  }
}

module attributes {stable_mosaic.version = 11 : i64} {
  func.func @_conv2_shortcut_kernel(%arg0: i32, %arg1: memref<1x8x8x128xf32, #tpu.memory_space<vmem>>, %arg2: memref<1x8x8x4xf32, #tpu.memory_space<vmem>>, %arg3: memref<9x128x128xf32, #tpu.memory_space<vmem>>, %arg4: memref<4x128xf32, #tpu.memory_space<vmem>>, %arg5: memref<1x4xf32, #tpu.memory_space<vmem>>, %arg6: memref<1x4xf32, #tpu.memory_space<vmem>>, %arg7: memref<1x8x8x128xf32, #tpu.memory_space<vmem>>, %arg8: memref<1x10x10x128xf32, #tpu.memory_space<vmem>>) attributes {dimension_semantics = [#tpu.dimension_semantics<parallel>], iteration_bounds = array<i64: 2>, scalar_prefetch = 0 : i64, scratch_operands = 1 : i64, tpu.core_type = #tpu.core_type<tc>, window_params = [{transform_indices = @transform_0, window_bounds = array<i64: 1, 8, 8, 128>}, {transform_indices = @transform_1, window_bounds = array<i64: 1, 8, 8, 4>}, {pipeline_mode = #tpu.pipeline_mode<synchronous>, transform_indices = @transform_2, window_bounds = array<i64: 9, 128, 128>}, {pipeline_mode = #tpu.pipeline_mode<synchronous>, transform_indices = @transform_3, window_bounds = array<i64: 4, 128>}, {pipeline_mode = #tpu.pipeline_mode<synchronous>, transform_indices = @transform_4, window_bounds = array<i64: 1, 4>}, {pipeline_mode = #tpu.pipeline_mode<synchronous>, transform_indices = @transform_5, window_bounds = array<i64: 1, 4>}, {transform_indices = @transform_6, window_bounds = array<i64: 1, 8, 8, 128>}]} {
    %cst = arith.constant 0.000000e+00 : f32
    %0 = vector.broadcast %cst : f32 to vector<1x10x10x128xf32>
    %c0 = arith.constant 0 : index
    %c0_0 = arith.constant 0 : index
    %c0_1 = arith.constant 0 : index
    %c0_2 = arith.constant 0 : index
    %1 = vector.load %arg8[%c0, %c0_0, %c0_1, %c0_2] : memref<1x10x10x128xf32, #tpu.memory_space<vmem>>, vector<1x10x10x128xf32>
    tpu.vector_store %arg8[%c0, %c0_0, %c0_1, %c0_2], %0 {strides = array<i32>} : memref<1x10x10x128xf32, #tpu.memory_space<vmem>>, vector<1x10x10x128xf32>,
    %c0_3 = arith.constant 0 : index
    %c0_4 = arith.constant 0 : index
    %c0_5 = arith.constant 0 : index
    %c0_6 = arith.constant 0 : index
    %2 = vector.load %arg1[%c0_3, %c0_4, %c0_5, %c0_6] : memref<1x8x8x128xf32, #tpu.memory_space<vmem>>, vector<1x8x8x128xf32>
    %3 = vector.shape_cast %2 : vector<1x8x8x128xf32> to vector<8x8x128xf32>
    %c0_7 = arith.constant 0 : index
    %c1 = arith.constant 1 : index
    %c1_8 = arith.constant 1 : index
    %c0_9 = arith.constant 0 : index
    %4 = vector.load %arg8[%c0_7, %c1, %c1_8, %c0_9] : memref<1x10x10x128xf32, #tpu.memory_space<vmem>>, vector<1x8x8x128xf32>
    %5 = vector.shape_cast %4 : vector<1x8x8x128xf32> to vector<8x8x128xf32>
    %6 = vector.shape_cast %3 : vector<8x8x128xf32> to vector<1x8x8x128xf32>
    tpu.vector_store %arg8[%c0_7, %c1, %c1_8, %c0_9], %6 {strides = array<i32>} : memref<1x10x10x128xf32, #tpu.memory_space<vmem>>, vector<1x8x8x128xf32>,
    %c0_10 = arith.constant 0 : index
    %c0_11 = arith.constant 0 : index
    %c0_12 = arith.constant 0 : index
    %c0_13 = arith.constant 0 : index
    %7 = vector.load %arg2[%c0_10, %c0_11, %c0_12, %c0_13] : memref<1x8x8x4xf32, #tpu.memory_space<vmem>>, vector<1x8x8x4xf32>
    %8 = vector.shape_cast %7 : vector<1x8x8x4xf32> to vector<8x8x4xf32>
    %c0_14 = arith.constant 0 : index
    %c0_15 = arith.constant 0 : index
    %9 = vector.load %arg5[%c0_14, %c0_15] : memref<1x4xf32, #tpu.memory_space<vmem>>, vector<1x4xf32>
    %10 = vector.shape_cast %9 : vector<1x4xf32> to vector<1x1x4xf32>
    %11 = vector.broadcast %10 : vector<1x1x4xf32> to vector<8x8x4xf32>
    %12 = arith.mulf %8, %11 : vector<8x8x4xf32>
    %c0_16 = arith.constant 0 : index
    %c0_17 = arith.constant 0 : index
    %13 = vector.load %arg6[%c0_16, %c0_17] : memref<1x4xf32, #tpu.memory_space<vmem>>, vector<1x4xf32>
    %14 = vector.shape_cast %13 : vector<1x4xf32> to vector<1x1x4xf32>
    %15 = vector.broadcast %14 : vector<1x1x4xf32> to vector<8x8x4xf32>
    %16 = arith.addf %12, %15 : vector<8x8x4xf32>
    %cst_18 = arith.constant 0.000000e+00 : f32
    %17 = vector.broadcast %cst_18 : f32 to vector<8x8x4xf32>
    %18 = arith.maximumf %16, %17 : vector<8x8x4xf32>
    %19 = vector.shape_cast %18 : vector<8x8x4xf32> to vector<64x4xf32>
    %c0_19 = arith.constant 0 : index
    %c0_20 = arith.constant 0 : index
    %20 = vector.load %arg4[%c0_19, %c0_20] : memref<4x128xf32, #tpu.memory_space<vmem>>, vector<4x128xf32>
    %cst_21 = arith.constant dense<0.000000e+00> : vector<64x128xf32>
    %21 = tpu.matmul %19, %20, %cst_21 {dimension_numbers = #tpu.dot_dimension_numbers<[1], [0], [0], [1], [0, 0, 1, 1], [], []>} : vector<64x4xf32>, vector<4x128xf32>, vector<64x128xf32> -> vector<64x128xf32>
    %c0_22 = arith.constant 0 : index
    %c0_23 = arith.constant 0 : index
    %c0_24 = arith.constant 0 : index
    %c0_25 = arith.constant 0 : index
    %22 = vector.load %arg8[%c0_22, %c0_23, %c0_24, %c0_25] : memref<1x10x10x128xf32, #tpu.memory_space<vmem>>, vector<1x8x8x128xf32>
    %23 = vector.shape_cast %22 : vector<1x8x8x128xf32> to vector<8x8x128xf32>
    %24 = vector.shape_cast %23 : vector<8x8x128xf32> to vector<64x128xf32>
    %c0_26 = arith.constant 0 : index
    %c0_27 = arith.constant 0 : index
    %c0_28 = arith.constant 0 : index
    %25 = vector.load %arg3[%c0_26, %c0_27, %c0_28] : memref<9x128x128xf32, #tpu.memory_space<vmem>>, vector<1x128x128xf32>
    %26 = vector.shape_cast %25 : vector<1x128x128xf32> to vector<128x128xf32>
    %cst_29 = arith.constant dense<0.000000e+00> : vector<64x128xf32>
    %27 = tpu.matmul %24, %26, %cst_29 {dimension_numbers = #tpu.dot_dimension_numbers<[1], [0], [0], [1], [0, 0, 1, 1], [], []>} : vector<64x128xf32>, vector<128x128xf32>, vector<64x128xf32> -> vector<64x128xf32>
    %28 = arith.addf %21, %27 : vector<64x128xf32>
    %c0_30 = arith.constant 0 : index
    %c0_31 = arith.constant 0 : index
    %c1_32 = arith.constant 1 : index
    %c0_33 = arith.constant 0 : index
    %29 = vector.load %arg8[%c0_30, %c0_31, %c1_32, %c0_33] : memref<1x10x10x128xf32, #tpu.memory_space<vmem>>, vector<1x8x8x128xf32>
    %30 = vector.shape_cast %29 : vector<1x8x8x128xf32> to vector<8x8x128xf32>
    %31 = vector.shape_cast %30 : vector<8x8x128xf32> to vector<64x128xf32>
    %c1_34 = arith.constant 1 : index
    %c0_35 = arith.constant 0 : index
    %c0_36 = arith.constant 0 : index
    %32 = vector.load %arg3[%c1_34, %c0_35, %c0_36] : memref<9x128x128xf32, #tpu.memory_space<vmem>>, vector<1x128x128xf32>
    %33 = vector.shape_cast %32 : vector<1x128x128xf32> to vector<128x128xf32>
    %cst_37 = arith.constant dense<0.000000e+00> : vector<64x128xf32>
    %34 = tpu.matmul %31, %33, %cst_37 {dimension_numbers = #tpu.dot_dimension_numbers<[1], [0], [0], [1], [0, 0, 1, 1], [], []>} : vector<64x128xf32>, vector<128x128xf32>, vector<64x128xf32> -> vector<64x128xf32>
    %35 = arith.addf %28, %34 : vector<64x128xf32>
    %c0_38 = arith.constant 0 : index
    %c0_39 = arith.constant 0 : index
    %c2 = arith.constant 2 : index
    %c0_40 = arith.constant 0 : index
    %36 = vector.load %arg8[%c0_38, %c0_39, %c2, %c0_40] : memref<1x10x10x128xf32, #tpu.memory_space<vmem>>, vector<1x8x8x128xf32>
    %37 = vector.shape_cast %36 : vector<1x8x8x128xf32> to vector<8x8x128xf32>
    %38 = vector.shape_cast %37 : vector<8x8x128xf32> to vector<64x128xf32>
    %c2_41 = arith.constant 2 : index
    %c0_42 = arith.constant 0 : index
    %c0_43 = arith.constant 0 : index
    %39 = vector.load %arg3[%c2_41, %c0_42, %c0_43] : memref<9x128x128xf32, #tpu.memory_space<vmem>>, vector<1x128x128xf32>
    %40 = vector.shape_cast %39 : vector<1x128x128xf32> to vector<128x128xf32>
    %cst_44 = arith.constant dense<0.000000e+00> : vector<64x128xf32>
    %41 = tpu.matmul %38, %40, %cst_44 {dimension_numbers = #tpu.dot_dimension_numbers<[1], [0], [0], [1], [0, 0, 1, 1], [], []>} : vector<64x128xf32>, vector<128x128xf32>, vector<64x128xf32> -> vector<64x128xf32>
    %42 = arith.addf %35, %41 : vector<64x128xf32>
    %c0_45 = arith.constant 0 : index
    %c1_46 = arith.constant 1 : index
    %c0_47 = arith.constant 0 : index
    %c0_48 = arith.constant 0 : index
    %43 = vector.load %arg8[%c0_45, %c1_46, %c0_47, %c0_48] : memref<1x10x10x128xf32, #tpu.memory_space<vmem>>, vector<1x8x8x128xf32>
    %44 = vector.shape_cast %43 : vector<1x8x8x128xf32> to vector<8x8x128xf32>
    %45 = vector.shape_cast %44 : vector<8x8x128xf32> to vector<64x128xf32>
    %c3 = arith.constant 3 : index
    %c0_49 = arith.constant 0 : index
    %c0_50 = arith.constant 0 : index
    %46 = vector.load %arg3[%c3, %c0_49, %c0_50] : memref<9x128x128xf32, #tpu.memory_space<vmem>>, vector<1x128x128xf32>
    %47 = vector.shape_cast %46 : vector<1x128x128xf32> to vector<128x128xf32>
    %cst_51 = arith.constant dense<0.000000e+00> : vector<64x128xf32>
    %48 = tpu.matmul %45, %47, %cst_51 {dimension_numbers = #tpu.dot_dimension_numbers<[1], [0], [0], [1], [0, 0, 1, 1], [], []>} : vector<64x128xf32>, vector<128x128xf32>, vector<64x128xf32> -> vector<64x128xf32>
    %49 = arith.addf %42, %48 : vector<64x128xf32>
    %c0_52 = arith.constant 0 : index
    %c1_53 = arith.constant 1 : index
    %c1_54 = arith.constant 1 : index
    %c0_55 = arith.constant 0 : index
    %50 = vector.load %arg8[%c0_52, %c1_53, %c1_54, %c0_55] : memref<1x10x10x128xf32, #tpu.memory_space<vmem>>, vector<1x8x8x128xf32>
    %51 = vector.shape_cast %50 : vector<1x8x8x128xf32> to vector<8x8x128xf32>
    %52 = vector.shape_cast %51 : vector<8x8x128xf32> to vector<64x128xf32>
    %c4 = arith.constant 4 : index
    %c0_56 = arith.constant 0 : index
    %c0_57 = arith.constant 0 : index
    %53 = vector.load %arg3[%c4, %c0_56, %c0_57] : memref<9x128x128xf32, #tpu.memory_space<vmem>>, vector<1x128x128xf32>
    %54 = vector.shape_cast %53 : vector<1x128x128xf32> to vector<128x128xf32>
    %cst_58 = arith.constant dense<0.000000e+00> : vector<64x128xf32>
    %55 = tpu.matmul %52, %54, %cst_58 {dimension_numbers = #tpu.dot_dimension_numbers<[1], [0], [0], [1], [0, 0, 1, 1], [], []>} : vector<64x128xf32>, vector<128x128xf32>, vector<64x128xf32> -> vector<64x128xf32>
    %56 = arith.addf %49, %55 : vector<64x128xf32>
    %c0_59 = arith.constant 0 : index
    %c1_60 = arith.constant 1 : index
    %c2_61 = arith.constant 2 : index
    %c0_62 = arith.constant 0 : index
    %57 = vector.load %arg8[%c0_59, %c1_60, %c2_61, %c0_62] : memref<1x10x10x128xf32, #tpu.memory_space<vmem>>, vector<1x8x8x128xf32>
    %58 = vector.shape_cast %57 : vector<1x8x8x128xf32> to vector<8x8x128xf32>
    %59 = vector.shape_cast %58 : vector<8x8x128xf32> to vector<64x128xf32>
    %c5 = arith.constant 5 : index
    %c0_63 = arith.constant 0 : index
    %c0_64 = arith.constant 0 : index
    %60 = vector.load %arg3[%c5, %c0_63, %c0_64] : memref<9x128x128xf32, #tpu.memory_space<vmem>>, vector<1x128x128xf32>
    %61 = vector.shape_cast %60 : vector<1x128x128xf32> to vector<128x128xf32>
    %cst_65 = arith.constant dense<0.000000e+00> : vector<64x128xf32>
    %62 = tpu.matmul %59, %61, %cst_65 {dimension_numbers = #tpu.dot_dimension_numbers<[1], [0], [0], [1], [0, 0, 1, 1], [], []>} : vector<64x128xf32>, vector<128x128xf32>, vector<64x128xf32> -> vector<64x128xf32>
    %63 = arith.addf %56, %62 : vector<64x128xf32>
    %c0_66 = arith.constant 0 : index
    %c2_67 = arith.constant 2 : index
    %c0_68 = arith.constant 0 : index
    %c0_69 = arith.constant 0 : index
    %64 = vector.load %arg8[%c0_66, %c2_67, %c0_68, %c0_69] : memref<1x10x10x128xf32, #tpu.memory_space<vmem>>, vector<1x8x8x128xf32>
    %65 = vector.shape_cast %64 : vector<1x8x8x128xf32> to vector<8x8x128xf32>
    %66 = vector.shape_cast %65 : vector<8x8x128xf32> to vector<64x128xf32>
    %c6 = arith.constant 6 : index
    %c0_70 = arith.constant 0 : index
    %c0_71 = arith.constant 0 : index
    %67 = vector.load %arg3[%c6, %c0_70, %c0_71] : memref<9x128x128xf32, #tpu.memory_space<vmem>>, vector<1x128x128xf32>
    %68 = vector.shape_cast %67 : vector<1x128x128xf32> to vector<128x128xf32>
    %cst_72 = arith.constant dense<0.000000e+00> : vector<64x128xf32>
    %69 = tpu.matmul %66, %68, %cst_72 {dimension_numbers = #tpu.dot_dimension_numbers<[1], [0], [0], [1], [0, 0, 1, 1], [], []>} : vector<64x128xf32>, vector<128x128xf32>, vector<64x128xf32> -> vector<64x128xf32>
    %70 = arith.addf %63, %69 : vector<64x128xf32>
    %c0_73 = arith.constant 0 : index
    %c2_74 = arith.constant 2 : index
    %c1_75 = arith.constant 1 : index
    %c0_76 = arith.constant 0 : index
    %71 = vector.load %arg8[%c0_73, %c2_74, %c1_75, %c0_76] : memref<1x10x10x128xf32, #tpu.memory_space<vmem>>, vector<1x8x8x128xf32>
    %72 = vector.shape_cast %71 : vector<1x8x8x128xf32> to vector<8x8x128xf32>
    %73 = vector.shape_cast %72 : vector<8x8x128xf32> to vector<64x128xf32>
    %c7 = arith.constant 7 : index
    %c0_77 = arith.constant 0 : index
    %c0_78 = arith.constant 0 : index
    %74 = vector.load %arg3[%c7, %c0_77, %c0_78] : memref<9x128x128xf32, #tpu.memory_space<vmem>>, vector<1x128x128xf32>
    %75 = vector.shape_cast %74 : vector<1x128x128xf32> to vector<128x128xf32>
    %cst_79 = arith.constant dense<0.000000e+00> : vector<64x128xf32>
    %76 = tpu.matmul %73, %75, %cst_79 {dimension_numbers = #tpu.dot_dimension_numbers<[1], [0], [0], [1], [0, 0, 1, 1], [], []>} : vector<64x128xf32>, vector<128x128xf32>, vector<64x128xf32> -> vector<64x128xf32>
    %77 = arith.addf %70, %76 : vector<64x128xf32>
    %c0_80 = arith.constant 0 : index
    %c2_81 = arith.constant 2 : index
    %c2_82 = arith.constant 2 : index
    %c0_83 = arith.constant 0 : index
    %78 = vector.load %arg8[%c0_80, %c2_81, %c2_82, %c0_83] : memref<1x10x10x128xf32, #tpu.memory_space<vmem>>, vector<1x8x8x128xf32>
    %79 = vector.shape_cast %78 : vector<1x8x8x128xf32> to vector<8x8x128xf32>
    %80 = vector.shape_cast %79 : vector<8x8x128xf32> to vector<64x128xf32>
    %c8 = arith.constant 8 : index
    %c0_84 = arith.constant 0 : index
    %c0_85 = arith.constant 0 : index
    %81 = vector.load %arg3[%c8, %c0_84, %c0_85] : memref<9x128x128xf32, #tpu.memory_space<vmem>>, vector<1x128x128xf32>
    %82 = vector.shape_cast %81 : vector<1x128x128xf32> to vector<128x128xf32>
    %cst_86 = arith.constant dense<0.000000e+00> : vector<64x128xf32>
    %83 = tpu.matmul %80, %82, %cst_86 {dimension_numbers = #tpu.dot_dimension_numbers<[1], [0], [0], [1], [0, 0, 1, 1], [], []>} : vector<64x128xf32>, vector<128x128xf32>, vector<64x128xf32> -> vector<64x128xf32>
    %84 = arith.addf %77, %83 : vector<64x128xf32>
    %85 = vector.shape_cast %84 : vector<64x128xf32> to vector<8x8x128xf32>
    %c0_87 = arith.constant 0 : index
    %c0_88 = arith.constant 0 : index
    %c0_89 = arith.constant 0 : index
    %c0_90 = arith.constant 0 : index
    %86 = vector.load %arg7[%c0_87, %c0_88, %c0_89, %c0_90] : memref<1x8x8x128xf32, #tpu.memory_space<vmem>>, vector<1x8x8x128xf32>
    %87 = vector.shape_cast %86 : vector<1x8x8x128xf32> to vector<8x8x128xf32>
    %88 = vector.shape_cast %85 : vector<8x8x128xf32> to vector<1x8x8x128xf32>
    tpu.vector_store %arg7[%c0_87, %c0_88, %c0_89, %c0_90], %88 {strides = array<i32>} : memref<1x8x8x128xf32, #tpu.memory_space<vmem>>, vector<1x8x8x128xf32>,
    return
  }
  func.func @transform_0(%arg0: i32) -> (i32, i32, i32, i32) {
    %c0_i32 = arith.constant 0 : i32
    %c0_i32_0 = arith.constant 0 : i32
    %c0_i32_1 = arith.constant 0 : i32
    %c0_i32_2 = arith.constant 0 : i32
    return %arg0, %c0_i32, %c0_i32_0, %c0_i32_1 : i32, i32, i32, i32
  }
  func.func @transform_1(%arg0: i32) -> (i32, i32, i32, i32) {
    %c0_i32 = arith.constant 0 : i32
    %c0_i32_0 = arith.constant 0 : i32
    %c0_i32_1 = arith.constant 0 : i32
    %c0_i32_2 = arith.constant 0 : i32
    return %arg0, %c0_i32, %c0_i32_0, %c0_i32_1 : i32, i32, i32, i32
  }
  func.func @transform_2(%arg0: i32) -> (i32, i32, i32) {
    %c0_i32 = arith.constant 0 : i32
    %c0_i32_0 = arith.constant 0 : i32
    %c0_i32_1 = arith.constant 0 : i32
    %c0_i32_2 = arith.constant 0 : i32
    return %c0_i32, %c0_i32_0, %c0_i32_1 : i32, i32, i32
  }
  func.func @transform_3(%arg0: i32) -> (i32, i32) {
    %c0_i32 = arith.constant 0 : i32
    %c0_i32_0 = arith.constant 0 : i32
    %c0_i32_1 = arith.constant 0 : i32
    return %c0_i32, %c0_i32_0 : i32, i32
  }
  func.func @transform_4(%arg0: i32) -> (i32, i32) {
    %c0_i32 = arith.constant 0 : i32
    %c0_i32_0 = arith.constant 0 : i32
    %c0_i32_1 = arith.constant 0 : i32
    return %c0_i32, %c0_i32_0 : i32, i32
  }
  func.func @transform_5(%arg0: i32) -> (i32, i32) {
    %c0_i32 = arith.constant 0 : i32
    %c0_i32_0 = arith.constant 0 : i32
    %c0_i32_1 = arith.constant 0 : i32
    return %c0_i32, %c0_i32_0 : i32, i32
  }
  func.func @transform_6(%arg0: i32) -> (i32, i32, i32, i32) {
    %c0_i32 = arith.constant 0 : i32
    %c0_i32_0 = arith.constant 0 : i32
    %c0_i32_1 = arith.constant 0 : i32
    %c0_i32_2 = arith.constant 0 : i32
    return %arg0, %c0_i32, %c0_i32_0, %c0_i32_1 : i32, i32, i32, i32
  }
}

</mosaic_0001>

<bundles_post_ra>
// kernel: basic_block_forward.3
= control target key start
LH: loop header
LB: loop body
LE: loop exit
PB: predicated region body
PF: predicated region fallthrough
CT: control target
= control target key end

     0   :  { %s3018_s21 = smov 0   ;;  %s3678_s0 = inlined_call_operand.vmem [shape: f32[2,8,8,128], index: 0, kind: input, shape index: {}]   ;;  %s3679_s1 = inlined_call_operand.vmem [shape: f32[2,8,8,4], index: 1, kind: input, shape index: {}]   ;;  %s3680_s2 = inlined_call_operand.vmem [shape: f32[9,128,128], index: 2, kind: input, shape index: {}]   ;;  %s3681_s3 = inlined_call_operand.vmem [shape: f32[4,128], index: 3, kind: input, shape index: {}]   ;;  %s3682_s4 = inlined_call_operand.vmem [shape: f32[1,4], index: 4, kind: input, shape index: {}]   ;;  %s3683_s5 = inlined_call_operand.vmem [shape: f32[1,4], index: 5, kind: input, shape index: {}]   ;;  %s3684_s6 = inlined_call_operand.vmem [shape: f32[2,8,8,128], index: 6, kind: output, shape index: {}]  }
   0x1 LB: > { %s1799_s22 = sadd.s32 4294967295, %s2980_s21   ;;  %p1803_p0 = scmp.ge.s32.totalorder %s2980_s21, 1  ;;  %s2980_s21 = sphi %s3018_s21, %s16_s21  }
   0x2   : > { %p222_p1 = scmp.lt.s32.totalorder %s2980_s21, 3 }
   0x4   : > { %p223_p2 = pnand %p1803_p0, %p222_p1 }
   0x5   : > { %v364_v0 = vld [vmem:[%s3680_s2] sm:$0xff] (!%p223_p2)  ;;  %v365_v1 = vld [vmem:[%s3680_s2 + $0x8] sm:$0xff] (!%p223_p2)  ;;  %v366_v2 = vld [vmem:[%s3680_s2 + $0x10] sm:$0xff] (!%p223_p2)  ;;  %vm510_vm0 = vcmask (!%p223_p2), 1043456   ;;  %p257_p3 = scmp.lt.s32.totalorder (!%p223_p2), %s1799_s22, 1  ;;  %v2982_v10 = vmov (!%p223_p2), 0.0  }
   0x6   : > { %226 = sbr.rel (%p223_p2) target bundleno = 404 (0x194), region = 44  ;;  %v2589_v3 = vpack.c.bf16 (!%p223_p2), %v365_v1, %v364_v0  ;;  %v367_v4 = vld [vmem:[%s3680_s2 + $0x18] sm:$0xff] (!%p223_p2)  ;;  %v368_v5 = vld [vmem:[%s3680_s2 + $0x20] sm:$0xff] (!%p223_p2)  ;;  %v369_v7 = vld [vmem:[%s3680_s2 + $0x28] sm:$0xff] (!%p223_p2)  ;;  %272 = vst [vmem:[#allocation2] sm:$0xff] (!%p223_p2), %v2982_v10  ;;  %2211 = vmatprep.mubr.f32.mxu1 (!%p223_p2), %v2982_v10  ;;  %vm485_vm1 = vcmask (!%p223_p2), 31744  }
   0x7   : > { %v2593_v6 = vpack.c.bf16 (!%p223_p2), %v367_v4, %v366_v2  ;;  %v355_v8 = vld [vmem:[%s3681_s3] sm:$0xf] (!%p223_p2)  ;;  %273 = vst [vmem:[#allocation2 + $0x8] sm:$0x3] (!%p223_p2), %v2982_v10  ;;  %274 = vst [vmem:[#allocation2 + $0x10] sm:$0xff] (!%p223_p2), %v2982_v10  ;;  %v1870_v11 = vld [vmem:[%s3680_s2 + $0x208] sm:$0xff] (!%p223_p2)  ;;  %v2597_v14 = vpack.c.bf16 (!%p223_p2), %v369_v7, %v368_v5 }
   0x8   : > { %v1869_v9 = vld [vmem:[%s3680_s2 + $0x200] sm:$0xff] (!%p223_p2)  ;;  %275 = vst [vmem:[#allocation2 + $0x18] sm:$0x3] (!%p223_p2), %v2982_v10  ;;  %276 = vst [vmem:[#allocation2 + $0x20] sm:$0xff] (!%p223_p2), %v2982_v10  ;;  %2590 = vmatprep.subr.bf16.mxu1 (!%p223_p2), %v2589_v3  ;;  %2223 = vmatprep.subr.msk.mxu0 (!%p223_p2), %vm510_vm0, %v355_v8  ;;  %v370_v16 = vld [vmem:[%s3680_s2 + $0x30] sm:$0xff] (!%p223_p2) }
   0x9   : > { %277 = vst [vmem:[#allocation2 + $0x28] sm:$0x3] (!%p223_p2), %v2982_v10  ;;  %278 = vst [vmem:[#allocation2 + $0x30] sm:$0xff] (!%p223_p2), %v2982_v10  ;;  %2592 = vmatpush3.bf16.msra.mxu1 (!%p223_p2), %v2589_v3  ;;  %2224 = vmatpush3.msk.msra.mxu0 (!%p223_p2), %vm510_vm0, %v355_v8  ;;  %v3081_v12 = vld [vmem:[%s3682_s4] ss:$0 sm:$0xff] (!%p223_p2)  ;;  %v2717_v13 = vpack.c.bf16 (!%p223_p2), %v1870_v11, %v1869_v9  ;;  %v371_v19 = vld [vmem:[%s3680_s2 + $0x38] sm:$0xff] (!%p223_p2) }
   0xa   : > { %279 = vst [vmem:[#allocation2 + $0x38] sm:$0x3] (!%p223_p2), %v2982_v10  ;;  %280 = vst [vmem:[#allocation2 + $0x40] sm:$0xff] (!%p223_p2), %v2982_v10  ;;  %2594 = vmatprep.subr.bf16.mxu1 (!%p223_p2), %v2593_v6  ;;  %v3092_v15 = vld [vmem:[%s3683_s5] ss:$0 sm:$0xff] (!%p223_p2)  ;;  %v2601_v24 = vpack.c.bf16 (!%p223_p2), %v371_v19, %v370_v16  ;;  %v1871_v25 = vld [vmem:[%s3680_s2 + $0x210] sm:$0xff] (!%p223_p2) }
   0xb   : > { %281 = vst [vmem:[#allocation2 + $0x48] sm:$0x3] (!%p223_p2), %v2982_v10  ;;  %282 = vst [vmem:[#allocation2 + $0x50] sm:$0xff] (!%p223_p2), %v2982_v10  ;;  %2718 = vmatprep.subr.bf16.mxu0 (!%p223_p2), %v2717_v13  ;;  %v1872_v26 = vld [vmem:[%s3680_s2 + $0x218] sm:$0xff] (!%p223_p2)  ;;  %v372_v27 = vld [vmem:[%s3680_s2 + $0x40] sm:$0xff] (!%p223_p2) }
   0xc   : > { %283 = vst [vmem:[#allocation2 + $0x58] sm:$0x3] (!%p223_p2), %v2982_v10  ;;  %284 = vst [vmem:[#allocation2 + $0x60] sm:$0xff] (!%p223_p2), %v2982_v10  ;;  %v373_v28 = vld [vmem:[%s3680_s2 + $0x48] sm:$0xff] (!%p223_p2)  ;;  %v2721_v35 = vpack.c.bf16 (!%p223_p2), %v1872_v26, %v1871_v25  ;;  %v1873_v36 = vld [vmem:[%s3680_s2 + $0x220] sm:$0xff] (!%p223_p2) }
   0xd   : > { %s3686_s22 = smov (!%p257_p3, %s1799_s22), 1  ;;  %285 = vst [vmem:[#allocation2 + $0x68] sm:$0x3] %v2982_v10  ;;  %286 = vst [vmem:[#allocation2 + $0x70] sm:$0xff] %v2982_v10  ;;  %2596 = vmatpush3.bf16.msra.mxu1 %v2593_v6  ;;  %v2605_v39 = vpack.c.bf16 %v373_v28, %v372_v27  ;;  %v1874_v40 = vld [vmem:[%s3680_s2 + $0x228] sm:$0xff]  ;;  %v374_v41 = vld [vmem:[%s3680_s2 + $0x50] sm:$0xff] }
   0xe   : > { %287 = vst [vmem:[#allocation2 + $0x78] sm:$0x3] %v2982_v10  ;;  %288 = vst [vmem:[#allocation2 + $0x80] sm:$0xff] %v2982_v10  ;;  %s3076_s17 = sshll.u32 %s3686_s22, 6  ;;  %2598 = vmatprep.subr.bf16.mxu1 %v2597_v14  ;;  %v375_v45 = vld [vmem:[%s3680_s2 + $0x58] sm:$0xff]  ;;  %v2725_v54 = vpack.c.bf16 %v1874_v40, %v1873_v36  ;;  %v1875_v60 = vld [vmem:[%s3680_s2 + $0x230] sm:$0xff] }
   0xf   : > { %289 = vst [vmem:[#allocation2 + $0x88] sm:$0x3] %v2982_v10  ;;  %290 = vst [vmem:[#allocation2 + $0x90] sm:$0xff] %v2982_v10  ;;  %s3087_s24 = scalar_lea.vmem %s3679_s1, %s3076_s17  ;;  %s3108_s8 = scalar_lea.vmem %s3678_s0, %s3076_s17  ;;  %v2609_v59 = vpack.c.bf16 %v375_v45, %v374_v41  ;;  %v1876_v61 = vld [vmem:[%s3680_s2 + $0x238] sm:$0xff]  ;;  %v376_v1 = vld [vmem:[%s3680_s2 + $0x60] sm:$0xff] }
  0x10   : > { %291 = vst [vmem:[#allocation2 + $0x98] sm:$0x3] %v2982_v10  ;;  %v309_v17 = vld [vmem:[%s3087_s24] sm:$0xff]  ;;  %v310_v18 = vld [vmem:[%s3087_s24 + $0x8] sm:$0xff]  ;;  %v311_v29 = vld [vmem:[%s3087_s24 + $0x10] sm:$0xff]  ;;  %v2729_v8 = vpack.c.bf16 %v1876_v61, %v1875_v60  ;;  %s271_s18 = scalar_lea.vmem %s3684_s6, %s3076_s17 }
  0x11   : > { %v324_v20 = vmul.f32 %v3081_v12, %v309_v17  ;;  %v325_v21 = vmul.f32 %v3081_v12, %v310_v18  ;;  %v312_v30 = vld [vmem:[%s3087_s24 + $0x18] sm:$0xff]  ;;  %v326_v33 = vmul.f32 %v3081_v12, %v311_v29  ;;  %v3128_v34 = vld [vmem:[%s3108_s8] sm:$0xff]  ;;  %2600 = vmatpush3.bf16.msra.mxu1 %v2597_v14  ;;  %v314_v44 = vld [vmem:[%s3087_s24 + $0x28] sm:$0xff] }
  0x12   : > { %v327_v37 = vmul.f32 %v3081_v12, %v312_v30  ;;  %301 = vst [vmem:[#allocation2 + $0x11] sm:$0xff] %v3128_v34  ;;  %v313_v38 = vld [vmem:[%s3087_s24 + $0x20] sm:$0xff]  ;;  %2602 = vmatprep.subr.bf16.mxu1 %v2601_v24  ;;  %v329_v47 = vmul.f32 %v3081_v12, %v314_v44  ;;  %v3153_v48 = vld [vmem:[%s3108_s8 + $0x8] sm:$0xff]  ;;  %v3156_v49 = vld [vmem:[%s3108_s8 + $0x10] sm:$0xff] }
  0x13   : > { %v339_v22 = vadd.f32 %v3092_v15, %v324_v20  ;;  %v340_v23 = vadd.f32 %v3092_v15, %v325_v21  ;;  %v341_v42 = vadd.f32 %v3092_v15, %v326_v33  ;;  %v328_v43 = vmul.f32 %v3081_v12, %v313_v38  ;;  %302 = vst [vmem:[#allocation2 + $0x21] sm:$0xff] %v3153_v48  ;;  %v315_v52 = vld [vmem:[%s3087_s24 + $0x30] sm:$0xff]  ;;  %v316_v53 = vld [vmem:[%s3087_s24 + $0x38] sm:$0xff]  ;;  %v3178_v0 = vld [vmem:[%s3108_s8 + $0x20] sm:$0xff] }
  0x14   : > { %v342_v46 = vadd.f32 %v3092_v15, %v327_v37  ;;  %303 = vst [vmem:[#allocation2 + $0x31] sm:$0xff] %v3156_v49  ;;  %v344_v56 = vadd.f32 %v3092_v15, %v329_v47  ;;  %v330_v57 = vmul.f32 %v3081_v12, %v315_v52  ;;  %v3166_v58 = vld [vmem:[%s3108_s8 + $0x18] sm:$0xff]  ;;  %v331_v63 = vmul.f32 %v3081_v12, %v316_v53  ;;  %v377_v2 = vld [vmem:[%s3680_s2 + $0x68] sm:$0xff]  ;;  %v3196_v7 = vld [vmem:[%s3108_s8 + $0x30] sm:$0xff] }
  0x15   : > { %v347_v31 = vmax.f32 %v339_v22, 0.0  ;;  %v348_v32 = vmax.f32 %v340_v23, 0.0  ;;  %v349_v50 = vmax.f32 %v341_v42, 0.0  ;;  %v343_v51 = vadd.f32 %v3092_v15, %v328_v43  ;;  %2604 = vmatpush3.bf16.msra.mxu1 %v2601_v24  ;;  %304 = vst [vmem:[#allocation2 + $0x41] sm:$0xff] %v3166_v58  ;;  %305 = vst [vmem:[#allocation2 + $0x51] sm:$0xff] %v3178_v0  ;;  %v3190_v5 = vld [vmem:[%s3108_s8 + $0x28] sm:$0xff] }
  0x16   : > { %v350_v55 = vmax.f32 %v342_v46, 0.0  ;;  %2606 = vmatprep.subr.bf16.mxu1 %v2605_v39  ;;  %v352_v3 = vmax.f32 %v344_v56, 0.0  ;;  %v345_v4 = vadd.f32 %v3092_v15, %v330_v57  ;;  %v346_v6 = vadd.f32 %v3092_v15, %v331_v63  ;;  %306 = vst [vmem:[#allocation2 + $0x61] sm:$0xff] %v3190_v5  ;;  %307 = vst [vmem:[#allocation2 + $0x71] sm:$0xff] %v3196_v7  ;;  %v1877_v12 = vld [vmem:[%s3680_s2 + $0x240] sm:$0xff]  ;;  %v378_v14 = vld [vmem:[%s3680_s2 + $0x70] sm:$0xff] }
  0x17   : > { %2225 = vmatprep.mubr.msk.f32.mxu0 %vm485_vm1, %v347_v31  ;;  %v351_v62 = vmax.f32 %v343_v51, 0.0  ;;  %v2613_v11 = vpack.c.bf16 %v377_v2, %v376_v1  ;;  %v379_v15 = vld [vmem:[%s3680_s2 + $0x78] sm:$0xff]  ;;  %v1879_v19 = vld [vmem:[%s3680_s2 + $0x250] sm:$0xff]  ;;  %v1821_v21 = vld [vmem:[%s3680_s2 + $0x80] sm:$0xff] }
  0x18   : > { %2226 = vmatmul.mubr.msk.f32.vlgmr.msra.gmra.mrb[0].mxu0 %vm485_vm1, %v348_v32  ;;  %v353_v9 = vmax.f32 %v345_v4, 0.0  ;;  %v354_v16 = vmax.f32 %v346_v6, 0.0  ;;  %v2617_v18 = vpack.c.bf16 %v379_v15, %v378_v14  ;;  %v1880_v20 = vld [vmem:[%s3680_s2 + $0x258] sm:$0xff]  ;;  %v1822_v22 = vld [vmem:[%s3680_s2 + $0x88] sm:$0xff]  ;;  %v1881_v25 = vld [vmem:[%s3680_s2 + $0x260] sm:$0xff] }
  0x19   : > { %2720 = vmatpush3.bf16.msra.mxu0 %v2717_v13  ;;  %2228 = vmatprep.mubr.msk.f32.mxu0 %vm485_vm1, %v349_v50  ;;  %v1878_v13 = vld [vmem:[%s3680_s2 + $0x248] sm:$0xff]  ;;  %v2737_v23 = vpack.c.bf16 %v1880_v20, %v1879_v19  ;;  %v2621_v24 = vpack.c.bf16 %v1822_v22, %v1821_v21  ;;  %v1823_v27 = vld [vmem:[%s3680_s2 + $0x90] sm:$0xff]  ;;  %v1824_v28 = vld [vmem:[%s3680_s2 + $0x98] sm:$0xff] }
  0x1a   : > { %2722 = vmatprep.subr.bf16.mxu0 %v2721_v35  ;;  %2608 = vmatpush3.bf16.msra.mxu1 %v2605_v39  ;;  %v2733_v17 = vpack.c.bf16 %v1878_v13, %v1877_v12  ;;  %v1882_v26 = vld [vmem:[%s3680_s2 + $0x268] sm:$0xff]  ;;  %v3240_v29 = vld [vmem:[%s3108_s8 + $0x38] sm:$0xff]  ;;  %v3242_v30 = vld [vmem:[#allocation2 + $0x10] sm:$0xff]  ;;  %v2625_v32 = vpack.c.bf16 %v1824_v28, %v1823_v27 }
  0x1b   : > { %2610 = vmatprep.subr.bf16.mxu1 %v2609_v59  ;;  %v2741_v31 = vpack.c.bf16 %v1882_v26, %v1881_v25  ;;  %308 = vst [vmem:[#allocation2 + $0x81] sm:$0xff] %v3240_v29  ;;  %v1883_v33 = vld [vmem:[%s3680_s2 + $0x270] sm:$0xff]  ;;  %v3251_v36 = vld [vmem:[#allocation2 + $0x20] sm:$0xff]  ;;  %v1826_v38 = vld [vmem:[%s3680_s2 + $0xa8] sm:$0xff] }
  0x1c   : > { %2229 = vmatmul.mubr.msk.f32.gmra.mrb[2].mxu0 %vm485_vm1, %v350_v55  ;;  %v1825_v37 = vld [vmem:[%s3680_s2 + $0xa0] sm:$0xff]  ;;  %v3260_v39 = vld [vmem:[#allocation2 + $0x30] sm:$0xff]  ;;  %v1886_v43 = vld [vmem:[%s3680_s2 + $0x288] sm:$0xff] }
  0x1d   : > { %2724 = vmatpush3.bf16.msra.mxu0 %v2721_v35  ;;  %2231 = vmatprep.mubr.msk.f32.mxu0 %vm485_vm1, %v351_v62  ;;  %v1884_v35 = vld [vmem:[%s3680_s2 + $0x278] sm:$0xff]  ;;  %v2629_v41 = vpack.c.bf16 %v1826_v38, %v1825_v37  ;;  %v1885_v42 = vld [vmem:[%s3680_s2 + $0x280] sm:$0xff]  ;;  %v1827_v45 = vld [vmem:[%s3680_s2 + $0xb0] sm:$0xff] }
  0x1e   : > { %2726 = vmatprep.subr.bf16.mxu0 %v2725_v54  ;;  %2612 = vmatpush3.bf16.msra.mxu1 %v2609_v59  ;;  %v2745_v40 = vpack.c.bf16 %v1884_v35, %v1883_v33  ;;  %v3269_v44 = vld [vmem:[#allocation2 + $0x40] sm:$0xff]  ;;  %v1828_v46 = vld [vmem:[%s3680_s2 + $0xb8] sm:$0xff]  ;;  %v3278_v47 = vld [vmem:[#allocation2 + $0x50] sm:$0xff]  ;;  %v2749_v50 = vpack.c.bf16 %v1886_v43, %v1885_v42 }
  0x1f   : > { %2614 = vmatprep.subr.bf16.mxu1 %v2613_v11  ;;  %v2633_v51 = vpack.c.bf16 %v1828_v46, %v1827_v45  ;;  %v1887_v52 = vld [vmem:[%s3680_s2 + $0x290] sm:$0xff]  ;;  %v1888_v53 = vld [vmem:[%s3680_s2 + $0x298] sm:$0xff]  ;;  %v1829_v55 = vld [vmem:[%s3680_s2 + $0xc0] sm:$0xff] }
  0x20   : > { %2232 = vmatmul.mubr.msk.f32.gmra.mrb[4].mxu0 %vm485_vm1, %v352_v3  ;;  %v1830_v56 = vld [vmem:[%s3680_s2 + $0xc8] sm:$0xff]  ;;  %v3296_v57 = vld [vmem:[#allocation2 + $0x70] sm:$0xff]  ;;  %v2753_v59 = vpack.c.bf16 %v1888_v53, %v1887_v52  ;;  %v1889_v61 = vld [vmem:[%s3680_s2 + $0x2a0] sm:$0xff] }
  0x21   : > { %2728 = vmatpush3.bf16.msra.mxu0 %v2725_v54  ;;  %2234 = vmatprep.mubr.msk.f32.mxu0 %vm485_vm1, %v353_v9  ;;  %v3287_v54 = vld [vmem:[#allocation2 + $0x60] sm:$0xff]  ;;  %v2637_v60 = vpack.c.bf16 %v1830_v56, %v1829_v55  ;;  %v1890_v62 = vld [vmem:[%s3680_s2 + $0x2a8] sm:$0xff]  ;;  %v1831_v63 = vld [vmem:[%s3680_s2 + $0xd0] sm:$0xff] }
  0x22   : > { %2730 = vmatprep.subr.bf16.mxu0 %v2729_v8  ;;  %2616 = vmatpush3.bf16.msra.mxu1 %v2613_v11  ;;  %v1832_v1 = vld [vmem:[%s3680_s2 + $0xd8] sm:$0xff]  ;;  %v619_v2 = vld [vmem:[#allocation2 + $0x1] sm:$0xff]  ;;  %v2757_v3 = vpack.c.bf16 %v1890_v62, %v1889_v61  ;;  %v1891_v6 = vld [vmem:[%s3680_s2 + $0x2b0] sm:$0xff] }
  0x23   : > { %2618 = vmatprep.subr.bf16.mxu1 %v2617_v18  ;;  %v2641_v4 = vpack.c.bf16 %v1832_v1, %v1831_v63  ;;  %v1833_v9 = vld [vmem:[%s3680_s2 + $0xe0] sm:$0xff]  ;;  %v1834_v11 = vld [vmem:[%s3680_s2 + $0xe8] sm:$0xff]  ;;  %v3342_v19 = vld [vmem:[#allocation2 + $0x12] sm:$0xff] }
  0x24   : > { %2235 = vmatmul.mubr.msk.f32.gmra.mrb[6].mxu0 %vm485_vm1, %v354_v16  ;;  %v2645_v13 = vpack.c.bf16 %v1834_v11, %v1833_v9  ;;  %v1893_v14 = vld [vmem:[%s3680_s2 + $0x2c0] sm:$0xff]  ;;  %v1894_v15 = vld [vmem:[%s3680_s2 + $0x2c8] sm:$0xff]  ;;  %v1835_v16 = vld [vmem:[%s3680_s2 + $0xf0] sm:$0xff] }
  0x25   : > { %2732 = vmatpush3.bf16.msra.mxu0 %v2729_v8  ;;  %2401 = vmatprep.mubr.f32.mxu0 %v3128_v34  ;;  %v1892_v8 = vld [vmem:[%s3680_s2 + $0x2b8] sm:$0xff]  ;;  %v1895_v21 = vld [vmem:[%s3680_s2 + $0x2d0] sm:$0xff]  ;;  %v1897_v27 = vld [vmem:[%s3680_s2 + $0x2e0] sm:$0xff] }
  0x26   : > { %2734 = vmatprep.subr.bf16.mxu0 %v2733_v17  ;;  %2620 = vmatpush3.bf16.msra.mxu1 %v2617_v18  ;;  %v2761_v12 = vpack.c.bf16 %v1892_v8, %v1891_v6  ;;  %v2765_v18 = vpack.c.bf16 %v1894_v15, %v1893_v14  ;;  %v1896_v22 = vld [vmem:[%s3680_s2 + $0x2d8] sm:$0xff]  ;;  %v1898_v28 = vld [vmem:[%s3680_s2 + $0x2e8] sm:$0xff]  ;;  %v1899_v37 = vld [vmem:[%s3680_s2 + $0x2f0] sm:$0xff] }
  0x27   : > { %2622 = vmatprep.subr.bf16.mxu1 %v2621_v24  ;;  %v2769_v25 = vpack.c.bf16 %v1896_v22, %v1895_v21  ;;  %v2773_v33 = vpack.c.bf16 %v1898_v28, %v1897_v27  ;;  %v1900_v38 = vld [vmem:[%s3680_s2 + $0x2f8] sm:$0xff]  ;;  %v1901_v45 = vld [vmem:[%s3680_s2 + $0x300] sm:$0xff]  ;;  %v1902_v46 = vld [vmem:[%s3680_s2 + $0x308] sm:$0xff] }
  0x28   : > { %v2777_v42 = vpack.c.bf16 %v1900_v38, %v1899_v37  ;;  %v1903_v53 = vld [vmem:[%s3680_s2 + $0x310] sm:$0xff]  ;;  %v1904_v55 = vld [vmem:[%s3680_s2 + $0x318] sm:$0xff]  ;;  %v1845_v56 = vld [vmem:[%s3680_s2 + $0x140] sm:$0xff] }
  0x29   : > { %2736 = vmatpush3.bf16.msra.mxu0 %v2733_v17  ;;  %2212 = vmatmul.mubr.f32.vlgmr.msra.gmra.mrb[0].mxu1 %v3242_v30  ;;  %v1836_v17 = vld [vmem:[%s3680_s2 + $0xf8] sm:$0xff]  ;;  %v2785_v61 = vpack.c.bf16 %v1904_v55, %v1903_v53  ;;  %v1905_v63 = vld [vmem:[%s3680_s2 + $0x320] sm:$0xff]  ;;  %v1906_v1 = vld [vmem:[%s3680_s2 + $0x328] sm:$0xff] }
  0x2a   : > { %2738 = vmatprep.subr.bf16.mxu0 %v2737_v23  ;;  %2624 = vmatpush3.bf16.msra.mxu1 %v2621_v24  ;;  %v2649_v20 = vpack.c.bf16 %v1836_v17, %v1835_v16  ;;  %v1838_v24 = vld [vmem:[%s3680_s2 + $0x108] sm:$0xff]  ;;  %v2789_v9 = vpack.c.bf16 %v1906_v1, %v1905_v63  ;;  %v3432_v11 = vld [vmem:[#allocation2 + $0x52] sm:$0xff]  ;;  %v1849_v15 = vld [vmem:[%s3680_s2 + $0x160] sm:$0xff] }
  0x2b   : > { %2214 = vmatprep.mubr.f32.mxu1 %v3251_v36  ;;  %2626 = vmatprep.subr.bf16.mxu1 %v2625_v32  ;;  %v3430_v6 = vld [vmem:[#allocation2 + $0x42] sm:$0xff]  ;;  %v1908_v14 = vld [vmem:[%s3680_s2 + $0x338] sm:$0xff]  ;;  %v1919_v1 = vld [vmem:[%s3680_s2 + $0x390] sm:$0xff] }
  0x2c   : > { %v757_v8 = vld [vmem:[#allocation2 + $0x2] sm:$0xff] }
  0x2d   : > { %2740 = vmatpush3.bf16.msra.mxu0 %v2737_v23  ;;  %2215 = vmatmul.mubr.f32.gmra.mrb[2].mxu1 %v3260_v39  ;;  %v1837_v23 = vld [vmem:[%s3680_s2 + $0x100] sm:$0xff]  ;;  %v1850_v16 = vld [vmem:[%s3680_s2 + $0x168] sm:$0xff] }
  0x2e   : > { %2742 = vmatprep.subr.bf16.mxu0 %v2741_v31  ;;  %2628 = vmatpush3.bf16.msra.mxu1 %v2625_v32  ;;  %v2653_v26 = vpack.c.bf16 %v1838_v24, %v1837_v23  ;;  %v1840_v32 = vld [vmem:[%s3680_s2 + $0x118] sm:$0xff]  ;;  %v3449_v17 = vld [vmem:[#allocation2 + $0x62] sm:$0xff]  ;;  %v2677_v21 = vpack.c.bf16 %v1850_v16, %v1849_v15  ;;  %v1851_v24 = vld [vmem:[%s3680_s2 + $0x170] sm:$0xff] }
  0x2f   : > { %2217 = vmatprep.mubr.f32.mxu1 %v3269_v44  ;;  %2630 = vmatprep.subr.bf16.mxu1 %v2629_v41  ;;  %v1909_v22 = vld [vmem:[%s3680_s2 + $0x340] sm:$0xff]  ;;  %v1910_v23 = vld [vmem:[%s3680_s2 + $0x348] sm:$0xff]  ;;  %v1863_v15 = vld [vmem:[%s3680_s2 + $0x1d0] sm:$0xff] }
  0x30   : > { %v2797_v27 = vpack.c.bf16 %v1910_v23, %v1909_v22  ;;  %v1864_v16 = vld [vmem:[%s3680_s2 + $0x1d8] sm:$0xff]  ;;  %v1923_v22 = vld [vmem:[%s3680_s2 + $0x3b0] sm:$0xff] }
  0x31   : > { %2744 = vmatpush3.bf16.msra.mxu0 %v2741_v31  ;;  %2218 = vmatmul.mubr.f32.gmra.mrb[4].mxu1 %v3278_v47  ;;  %v1839_v31 = vld [vmem:[%s3680_s2 + $0x110] sm:$0xff]  ;;  %v1924_v23 = vld [vmem:[%s3680_s2 + $0x3b8] sm:$0xff] }
  0x32   : > { %2746 = vmatprep.subr.bf16.mxu0 %v2745_v40  ;;  %2632 = vmatpush3.bf16.msra.mxu1 %v2629_v41  ;;  %v2657_v35 = vpack.c.bf16 %v1840_v32, %v1839_v31  ;;  %v1842_v41 = vld [vmem:[%s3680_s2 + $0x128] sm:$0xff]  ;;  %v1911_v31 = vld [vmem:[%s3680_s2 + $0x350] sm:$0xff]  ;;  %v1912_v32 = vld [vmem:[%s3680_s2 + $0x358] sm:$0xff] }
  0x33   : > { %2220 = vmatprep.mubr.f32.mxu1 %v3287_v54  ;;  %2634 = vmatprep.subr.bf16.mxu1 %v2633_v51  ;;  %v2801_v37 = vpack.c.bf16 %v1912_v32, %v1911_v31  ;;  %v1925_v32 = vld [vmem:[%s3680_s2 + $0x3c0] sm:$0xff] }
  0x35   : > { %2748 = vmatpush3.bf16.msra.mxu0 %v2745_v40  ;;  %2221 = vmatmul.mubr.f32.gmra.mrb[6].mxu1 %v3296_v57  ;;  %v1841_v40 = vld [vmem:[%s3680_s2 + $0x120] sm:$0xff] }
  0x36   : > { %2750 = vmatprep.subr.bf16.mxu0 %v2749_v50  ;;  %2636 = vmatpush3.bf16.msra.mxu1 %v2633_v51  ;;  %v2661_v43 = vpack.c.bf16 %v1842_v41, %v1841_v40  ;;  %v2781_v51 = vpack.c.bf16 %v1902_v46, %v1901_v45  ;;  %v1913_v40 = vld [vmem:[%s3680_s2 + $0x360] sm:$0xff]  ;;  %v1914_v41 = vld [vmem:[%s3680_s2 + $0x368] sm:$0xff] }
  0x37   : > { %2638 = vmatprep.subr.bf16.mxu1 %v2637_v60  ;;  %2269 = vmatprep.mubr.f32.mxu1 %v619_v2  ;;  %v1847_v2 = vld [vmem:[%s3680_s2 + $0x150] sm:$0xff]  ;;  %v2805_v45 = vpack.c.bf16 %v1914_v41, %v1913_v40  ;;  %v1928_v41 = vld [vmem:[%s3680_s2 + $0x3d8] sm:$0xff] }
  0x38   : > { %2402 = vmatmul.mubr.f32.vlgmr.msra.gmra.mrb[8].mxu0 %v3153_v48  ;;  %v1927_v40 = vld [vmem:[%s3680_s2 + $0x3d0] sm:$0xff] }
  0x39   : > { %2752 = vmatpush3.bf16.msra.mxu0 %v2749_v50  ;;  %2404 = vmatprep.mubr.f32.mxu0 %v3156_v49  ;;  %v1843_v50 = vld [vmem:[%s3680_s2 + $0x130] sm:$0xff] }
  0x3a   : > { %2754 = vmatprep.subr.bf16.mxu0 %v2753_v59  ;;  %2640 = vmatpush3.bf16.msra.mxu1 %v2637_v60  ;;  %v3410_v60 = vld [vmem:[#allocation2 + $0x22] sm:$0xff] }
  0x3b   : > { %2642 = vmatprep.subr.bf16.mxu1 %v2641_v4 }
  0x3c   : > { %2405 = vmatmul.mubr.f32.gmra.mrb[10].mxu0 %v3166_v58 }
  0x3d   : > { %2756 = vmatpush3.bf16.msra.mxu0 %v2753_v59  ;;  %2407 = vmatprep.mubr.f32.mxu0 %v3178_v0  ;;  %v1846_v59 = vld [vmem:[%s3680_s2 + $0x148] sm:$0xff] }
  0x3e   : > { %2758 = vmatprep.subr.bf16.mxu0 %v2757_v3  ;;  %2644 = vmatpush3.bf16.msra.mxu1 %v2641_v4  ;;  %v2669_v62 = vpack.c.bf16 %v1846_v59, %v1845_v56  ;;  %v3427_v4 = vld [vmem:[#allocation2 + $0x32] sm:$0xff]  ;;  %v1917_v56 = vld [vmem:[%s3680_s2 + $0x380] sm:$0xff]  ;;  %v1918_v59 = vld [vmem:[%s3680_s2 + $0x388] sm:$0xff] }
  0x3f   : > { %2646 = vmatprep.subr.bf16.mxu1 %v2645_v13 }
  0x40   : > { %2408 = vmatmul.mubr.f32.gmra.mrb[12].mxu0 %v3190_v5 }
  0x41   : > { %2760 = vmatpush3.bf16.msra.mxu0 %v2757_v3  ;;  %2410 = vmatprep.mubr.f32.mxu0 %v3196_v7  ;;  %v1848_v3 = vld [vmem:[%s3680_s2 + $0x158] sm:$0xff] }
  0x42   : > { %2762 = vmatprep.subr.bf16.mxu0 %v2761_v12  ;;  %2648 = vmatpush3.bf16.msra.mxu1 %v2645_v13  ;;  %v1907_v13 = vld [vmem:[%s3680_s2 + $0x330] sm:$0xff] }
  0x43   : > { %2650 = vmatprep.subr.bf16.mxu1 %v2649_v20 }
  0x44   : > { %2411 = vmatmul.mubr.f32.gmra.mrb[14].mxu0 %v3240_v29 }
  0x45   : > { %2764 = vmatpush3.bf16.msra.mxu0 %v2761_v12  ;;  %2445 = vmatprep.mubr.f32.mxu0 %v3342_v19  ;;  %v2673_v12 = vpack.c.bf16 %v1848_v3, %v1847_v2  ;;  %v1920_v2 = vld [vmem:[%s3680_s2 + $0x398] sm:$0xff]  ;;  %v1861_v3 = vld [vmem:[%s3680_s2 + $0x1c0] sm:$0xff] }
  0x46   : > { %2766 = vmatprep.subr.bf16.mxu0 %v2765_v18  ;;  %2652 = vmatpush3.bf16.msra.mxu1 %v2649_v20  ;;  %v3451_v20 = vld [vmem:[#allocation2 + $0x72] sm:$0xff] }
  0x47   : > { %2654 = vmatprep.subr.bf16.mxu1 %v2653_v26 }
  0x49   : > { %2768 = vmatpush3.bf16.msra.mxu0 %v2765_v18  ;;  %2270 = vmatmul.mubr.f32.vlgmr.msra.gmra.mrb[8].mxu1 %v3128_v34  ;;  %v1844_v34 = vld [vmem:[%s3680_s2 + $0x138] sm:$0xff]  ;;  %v2793_v18 = vpack.c.bf16 %v1908_v14, %v1907_v13  ;;  %v1921_v13 = vld [vmem:[%s3680_s2 + $0x3a0] sm:$0xff]  ;;  %v1922_v14 = vld [vmem:[%s3680_s2 + $0x3a8] sm:$0xff] }
  0x4a   : > { %2770 = vmatprep.subr.bf16.mxu0 %v2769_v25  ;;  %2656 = vmatpush3.bf16.msra.mxu1 %v2653_v26  ;;  %v2665_v52 = vpack.c.bf16 %v1844_v34, %v1843_v50  ;;  %v3467_v26 = vld [vmem:[#allocation2 + $0x82] sm:$0xff]  ;;  %v1915_v50 = vld [vmem:[%s3680_s2 + $0x370] sm:$0xff]  ;;  %v1916_v34 = vld [vmem:[%s3680_s2 + $0x378] sm:$0xff] }
  0x4b   : > { %2658 = vmatprep.subr.bf16.mxu1 %v2657_v35  ;;  %2272 = vmatprep.mubr.f32.mxu1 %v3153_v48  ;;  %v2809_v53 = vpack.c.bf16 %v1916_v34, %v1915_v50  ;;  %v1929_v50 = vld [vmem:[%s3680_s2 + $0x3e0] sm:$0xff]  ;;  %v1930_v34 = vld [vmem:[%s3680_s2 + $0x3e8] sm:$0xff] }
  0x4d   : > { %2772 = vmatpush3.bf16.msra.mxu0 %v2769_v25  ;;  %2273 = vmatmul.mubr.f32.gmra.mrb[10].mxu1 %v3156_v49  ;;  %v1852_v25 = vld [vmem:[%s3680_s2 + $0x178] sm:$0xff] }
  0x4e   : > { %2774 = vmatprep.subr.bf16.mxu0 %v2773_v33  ;;  %2660 = vmatpush3.bf16.msra.mxu1 %v2657_v35  ;;  %v2681_v28 = vpack.c.bf16 %v1852_v25, %v1851_v24  ;;  %v1854_v35 = vld [vmem:[%s3680_s2 + $0x188] sm:$0xff]  ;;  %v1865_v24 = vld [vmem:[%s3680_s2 + $0x1e0] sm:$0xff] }
  0x4f   : > { %2662 = vmatprep.subr.bf16.mxu1 %v2661_v43  ;;  %2275 = vmatprep.mubr.f32.mxu1 %v3166_v58  ;;  %v1866_v25 = vld [vmem:[%s3680_s2 + $0x1e8] sm:$0xff] }
  0x50   : > { %v2709_v31 = vpack.c.bf16 %v1866_v25, %v1865_v24 }
  0x51   : > { %2776 = vmatpush3.bf16.msra.mxu0 %v2773_v33  ;;  %2276 = vmatmul.mubr.f32.gmra.mrb[12].mxu1 %v3178_v0  ;;  %v1853_v33 = vld [vmem:[%s3680_s2 + $0x180] sm:$0xff] }
  0x52   : > { %2778 = vmatprep.subr.bf16.mxu0 %v2777_v42  ;;  %2664 = vmatpush3.bf16.msra.mxu1 %v2661_v43  ;;  %v2685_v38 = vpack.c.bf16 %v1854_v35, %v1853_v33  ;;  %v1856_v43 = vld [vmem:[%s3680_s2 + $0x198] sm:$0xff]  ;;  %v1926_v33 = vld [vmem:[%s3680_s2 + $0x3c8] sm:$0xff] }
  0x53   : > { %2666 = vmatprep.subr.bf16.mxu1 %v2665_v52  ;;  %2278 = vmatprep.mubr.f32.mxu1 %v3190_v5  ;;  %v1868_v35 = vld [vmem:[%s3680_s2 + $0x1f8] sm:$0xff] }
  0x55   : > { %2780 = vmatpush3.bf16.msra.mxu0 %v2777_v42  ;;  %2279 = vmatmul.mubr.f32.gmra.mrb[14].mxu1 %v3196_v7  ;;  %v1855_v42 = vld [vmem:[%s3680_s2 + $0x190] sm:$0xff] }
  0x56   : > { %2782 = vmatprep.subr.bf16.mxu0 %v2781_v51  ;;  %2668 = vmatpush3.bf16.msra.mxu1 %v2665_v52  ;;  %v2689_v46 = vpack.c.bf16 %v1856_v43, %v1855_v42  ;;  %v1858_v52 = vld [vmem:[%s3680_s2 + $0x1a8] sm:$0xff]  ;;  %v1933_v42 = vld [vmem:[%s3680_s2 + $0x400] sm:$0xff] }
  0x57   : > { %2670 = vmatprep.subr.bf16.mxu1 %v2669_v62  ;;  %2313 = vmatprep.mubr.f32.mxu1 %v757_v8  ;;  %v1862_v8 = vld [vmem:[%s3680_s2 + $0x1c8] sm:$0xff] }
  0x58   : > { %2446 = vmatmul.mubr.f32.vlgmr.msra.gmra.mrb[8].mxu0 %v3410_v60  ;;  %v1934_v43 = vld [vmem:[%s3680_s2 + $0x408] sm:$0xff] }
  0x59   : > { %2784 = vmatpush3.bf16.msra.mxu0 %v2781_v51  ;;  %2448 = vmatprep.mubr.f32.mxu0 %v3427_v4  ;;  %v1857_v51 = vld [vmem:[%s3680_s2 + $0x1a0] sm:$0xff] }
  0x5a   : > { %2786 = vmatprep.subr.bf16.mxu0 %v2785_v61  ;;  %2672 = vmatpush3.bf16.msra.mxu1 %v2669_v62  ;;  %v2693_v55 = vpack.c.bf16 %v1858_v52, %v1857_v51  ;;  %v2813_v62 = vpack.c.bf16 %v1918_v59, %v1917_v56  ;;  %v2837_v51 = vpack.c.bf16 %v1930_v34, %v1929_v50  ;;  %v1937_v56 = vld [vmem:[%s3680_s2 + $0x420] sm:$0xff]  ;;  %v1938_v59 = vld [vmem:[%s3680_s2 + $0x428] sm:$0xff] }
  0x5b   : > { %2674 = vmatprep.subr.bf16.mxu1 %v2673_v12 }
  0x5c   : > { %2449 = vmatmul.mubr.f32.gmra.mrb[10].mxu0 %v3430_v6 }
  0x5d   : > { %2788 = vmatpush3.bf16.msra.mxu0 %v2785_v61  ;;  %2451 = vmatprep.mubr.f32.mxu0 %v3432_v11  ;;  %v1859_v61 = vld [vmem:[%s3680_s2 + $0x1b0] sm:$0xff] }
  0x5e   : > { %2790 = vmatprep.subr.bf16.mxu0 %v2789_v9  ;;  %2676 = vmatpush3.bf16.msra.mxu1 %v2673_v12  ;;  %v2701_v12 = vpack.c.bf16 %v1862_v8, %v1861_v3  ;;  %v1948_v3 = vld [vmem:[%s3680_s2 + $0x478] sm:$0xff] }
  0x5f   : > { %2678 = vmatprep.subr.bf16.mxu1 %v2677_v21 }
  0x60   : > { %2452 = vmatmul.mubr.f32.gmra.mrb[12].mxu0 %v3449_v17 }
  0x61   : > { %2792 = vmatpush3.bf16.msra.mxu0 %v2789_v9  ;;  %2454 = vmatprep.mubr.f32.mxu0 %v3451_v20  ;;  %v2817_v9 = vpack.c.bf16 %v1920_v2, %v1919_v1  ;;  %v1942_v1 = vld [vmem:[%s3680_s2 + $0x448] sm:$0xff]  ;;  %v1944_v2 = vld [vmem:[%s3680_s2 + $0x458] sm:$0xff] }
  0x62   : > { %2794 = vmatprep.subr.bf16.mxu0 %v2793_v18  ;;  %2680 = vmatpush3.bf16.msra.mxu1 %v2677_v21  ;;  %v2705_v21 = vpack.c.bf16 %v1864_v16, %v1863_v15 }
  0x63   : > { %2682 = vmatprep.subr.bf16.mxu1 %v2681_v28 }
  0x64   : > { %2455 = vmatmul.mubr.f32.gmra.mrb[14].mxu0 %v3467_v26 }
  0x65   : > { %2796 = vmatpush3.bf16.msra.mxu0 %v2793_v18  ;;  %2489 = vmatprep.mubr.f32.mxu0 %v3251_v36  ;;  %v2821_v18 = vpack.c.bf16 %v1922_v14, %v1921_v13 }
  0x66   : > { %2798 = vmatprep.subr.bf16.mxu0 %v2797_v27  ;;  %2684 = vmatpush3.bf16.msra.mxu1 %v2681_v28  ;;  %v3567_v28 = vld [vmem:[#allocation2 + $0x80] sm:$0xff] }
  0x67   : > { %2686 = vmatprep.subr.bf16.mxu1 %v2685_v38 }
  0x69   : > { %2800 = vmatpush3.bf16.msra.mxu0 %v2797_v27  ;;  %2314 = vmatmul.mubr.f32.vlgmr.msra.gmra.mrb[8].mxu1 %v3342_v19  ;;  %v1860_v19 = vld [vmem:[%s3680_s2 + $0x1b8] sm:$0xff]  ;;  %v2825_v27 = vpack.c.bf16 %v1924_v23, %v1923_v22 }
  0x6a   : > { %2802 = vmatprep.subr.bf16.mxu0 %v2801_v37  ;;  %2688 = vmatpush3.bf16.msra.mxu1 %v2685_v38  ;;  %v2697_v63 = vpack.c.bf16 %v1860_v19, %v1859_v61  ;;  %v2853_v19 = vpack.c.bf16 %v1938_v59, %v1937_v56 }
  0x6b   : > { %2690 = vmatprep.subr.bf16.mxu1 %v2689_v46  ;;  %2316 = vmatprep.mubr.f32.mxu1 %v3410_v60 }
  0x6d   : > { %2804 = vmatpush3.bf16.msra.mxu0 %v2801_v37  ;;  %2317 = vmatmul.mubr.f32.gmra.mrb[10].mxu1 %v3427_v4  ;;  %v2829_v37 = vpack.c.bf16 %v1926_v33, %v1925_v32 }
  0x6e   : > { %2806 = vmatprep.subr.bf16.mxu0 %v2805_v45  ;;  %2692 = vmatpush3.bf16.msra.mxu1 %v2689_v46  ;;  %v2845_v46 = vpack.c.bf16 %v1934_v43, %v1933_v42 }
  0x6f   : > { %2694 = vmatprep.subr.bf16.mxu1 %v2693_v55  ;;  %2319 = vmatprep.mubr.f32.mxu1 %v3430_v6 }
  0x71   : > { %2808 = vmatpush3.bf16.msra.mxu0 %v2805_v45  ;;  %2320 = vmatmul.mubr.f32.gmra.mrb[12].mxu1 %v3432_v11  ;;  %v2833_v45 = vpack.c.bf16 %v1928_v41, %v1927_v40 }
  0x72   : > { %2810 = vmatprep.subr.bf16.mxu0 %v2809_v53  ;;  %2696 = vmatpush3.bf16.msra.mxu1 %v2693_v55  ;;  %v1932_v55 = vld [vmem:[%s3680_s2 + $0x3f8] sm:$0xff] }
  0x73   : > { %2698 = vmatprep.subr.bf16.mxu1 %v2697_v63  ;;  %2322 = vmatprep.mubr.f32.mxu1 %v3449_v17 }
  0x75   : > { %2812 = vmatpush3.bf16.msra.mxu0 %v2809_v53  ;;  %2323 = vmatmul.mubr.f32.gmra.mrb[14].mxu1 %v3451_v20  ;;  %v1931_v53 = vld [vmem:[%s3680_s2 + $0x3f0] sm:$0xff] }
  0x76   : > { %2814 = vmatprep.subr.bf16.mxu0 %v2813_v62  ;;  %2700 = vmatpush3.bf16.msra.mxu1 %v2697_v63  ;;  %v2841_v61 = vpack.c.bf16 %v1932_v55, %v1931_v53  ;;  %v1940_v63 = vld [vmem:[%s3680_s2 + $0x438] sm:$0xff] }
  0x77   : > { %2702 = vmatprep.subr.bf16.mxu1 %v2701_v12  ;;  %2357 = vmatprep.mubr.f32.mxu1 %v3242_v30  ;;  %v1867_v30 = vld [vmem:[%s3680_s2 + $0x1f0] sm:$0xff] }
  0x78   : > { %2490 = vmatmul.mubr.f32.vlgmr.msra.gmra.mrb[8].mxu0 %v3260_v39  ;;  %v2713_v38 = vpack.c.bf16 %v1868_v35, %v1867_v30 }
  0x79   : > { %2816 = vmatpush3.bf16.msra.mxu0 %v2813_v62  ;;  %2492 = vmatprep.mubr.f32.mxu0 %v3269_v44  ;;  %v1939_v62 = vld [vmem:[%s3680_s2 + $0x430] sm:$0xff] }
  0x7a   : > { %2818 = vmatprep.subr.bf16.mxu0 %v2817_v9  ;;  %2704 = vmatpush3.bf16.msra.mxu1 %v2701_v12 }
  0x7b   : > { %2706 = vmatprep.subr.bf16.mxu1 %v2705_v21 }
  0x7c   : > { %2493 = vmatmul.mubr.f32.gmra.mrb[10].mxu0 %v3278_v47 }
  0x7d   : > { %2820 = vmatpush3.bf16.msra.mxu0 %v2817_v9  ;;  %2495 = vmatprep.mubr.f32.mxu0 %v3287_v54 }
  0x7e   : > { %2822 = vmatprep.subr.bf16.mxu0 %v2821_v18  ;;  %2708 = vmatpush3.bf16.msra.mxu1 %v2705_v21 }
  0x7f   : > { %2710 = vmatprep.subr.bf16.mxu1 %v2709_v31 }
  0x80   : > { %2496 = vmatmul.mubr.f32.gmra.mrb[12].mxu0 %v3296_v57 }
  0x81   : > { %2824 = vmatpush3.bf16.msra.mxu0 %v2821_v18  ;;  %2498 = vmatprep.mubr.f32.mxu0 %v3567_v28 }
  0x82   : > { %2826 = vmatprep.subr.bf16.mxu0 %v2825_v27  ;;  %2712 = vmatpush3.bf16.msra.mxu1 %v2709_v31 }
  0x83   : > { %2714 = vmatprep.subr.bf16.mxu1 %v2713_v38 }
  0x84   : > { %2499 = vmatmul.mubr.f32.gmra.mrb[14].mxu0 %v2982_v10  ;;  %v1935_v10 = vld [vmem:[%s3680_s2 + $0x410] sm:$0xff] }
  0x85   : > { %2828 = vmatpush3.bf16.msra.mxu0 %v2825_v27  ;;  %2533 = vmatprep.mubr.f32.mxu0 %v3153_v48  ;;  %v1936_v48 = vld [vmem:[%s3680_s2 + $0x418] sm:$0xff] }
  0x86   : > { %2830 = vmatprep.subr.bf16.mxu0 %v2829_v37  ;;  %2716 = vmatpush3.bf16.msra.mxu1 %v2713_v38  ;;  %v2849_v52 = vpack.c.bf16 %v1936_v48, %v1935_v10 }
  0x87   : > { %2877 = vmatprep.subr.bf16.mxu1 %v2845_v46 }
  0x89   : > { %2832 = vmatpush3.bf16.msra.mxu0 %v2829_v37  ;;  %2358 = vmatmul.mubr.f32.vlgmr.msra.gmra.mrb[8].mxu1 %v3251_v36  ;;  %v2857_v36 = vpack.c.bf16 %v1940_v63, %v1939_v62 }
  0x8a   : > { %2834 = vmatprep.subr.bf16.mxu0 %v2833_v45  ;;  %2885 = vmatpush3.bf16.msra.mxu1 %v2845_v46 }
  0x8b   : > { %2360 = vmatprep.mubr.f32.mxu1 %v3260_v39  ;;  %2878 = vmatprep.subr.bf16.mxu1 %v2849_v52  ;;  %v1941_v39 = vld [vmem:[%s3680_s2 + $0x440] sm:$0xff] }
  0x8d   : > { %2836 = vmatpush3.bf16.msra.mxu0 %v2833_v45  ;;  %2361 = vmatmul.mubr.f32.gmra.mrb[10].mxu1 %v3269_v44  ;;  %v2861_v44 = vpack.c.bf16 %v1942_v1, %v1941_v39 }
  0x8e   : > { %2838 = vmatprep.subr.bf16.mxu0 %v2837_v51  ;;  %2886 = vmatpush3.bf16.msra.mxu1 %v2849_v52 }
  0x8f   : > { %2363 = vmatprep.mubr.f32.mxu1 %v3278_v47  ;;  %2879 = vmatprep.subr.bf16.mxu1 %v2853_v19  ;;  %v1943_v47 = vld [vmem:[%s3680_s2 + $0x450] sm:$0xff] }
  0x91   : > { %2840 = vmatpush3.bf16.msra.mxu0 %v2837_v51  ;;  %2364 = vmatmul.mubr.f32.gmra.mrb[12].mxu1 %v3287_v54  ;;  %v2865_v54 = vpack.c.bf16 %v1944_v2, %v1943_v47 }
  0x92   : > { %2842 = vmatprep.subr.bf16.mxu0 %v2841_v61  ;;  %2887 = vmatpush3.bf16.msra.mxu1 %v2853_v19 }
  0x93   : > { %2366 = vmatprep.mubr.f32.mxu1 %v3296_v57  ;;  %2880 = vmatprep.subr.bf16.mxu1 %v2857_v36  ;;  %v1946_v57 = vld [vmem:[%s3680_s2 + $0x468] sm:$0xff] }
  0x95   : > { %2844 = vmatpush3.bf16.msra.mxu0 %v2841_v61  ;;  %2367 = vmatmul.mubr.f32.gmra.mrb[14].mxu1 %v3567_v28 }
  0x96   : > { %2846 = vmatprep.subr.bf16.mxu0 %v2845_v46  ;;  %2888 = vmatpush3.bf16.msra.mxu1 %v2857_v36 }
  0x97   : > { %2881 = vmatprep.subr.bf16.mxu1 %v2861_v44  ;;  %2583 = vmatprep.mubr.f32.mxu1 %v3449_v17  ;;  %v1455_v17 = vld [vmem:[#allocation2 + $0x91] sm:$0xff] }
  0x98   : > { %2534 = vmatmul.mubr.f32.vlgmr.msra.gmra.mrb[8].mxu0 %v3156_v49  ;;  %v1945_v49 = vld [vmem:[%s3680_s2 + $0x460] sm:$0xff] }
  0x99   : > { %2848 = vmatpush3.bf16.msra.mxu0 %v2845_v46  ;;  %2536 = vmatprep.mubr.f32.mxu0 %v3166_v58  ;;  %v2869_v58 = vpack.c.bf16 %v1946_v57, %v1945_v49 }
  0x9a   : > { %2850 = vmatprep.subr.bf16.mxu0 %v2849_v52  ;;  %2889 = vmatpush3.bf16.msra.mxu1 %v2861_v44 }
  0x9b   : > { %2882 = vmatprep.subr.bf16.mxu1 %v2865_v54 }
  0x9c   : > { %2537 = vmatmul.mubr.f32.gmra.mrb[10].mxu0 %v3178_v0  ;;  %v1947_v0 = vld [vmem:[%s3680_s2 + $0x470] sm:$0xff] }
  0x9d   : > { %2852 = vmatpush3.bf16.msra.mxu0 %v2849_v52  ;;  %2539 = vmatprep.mubr.f32.mxu0 %v3190_v5  ;;  %v2873_v5 = vpack.c.bf16 %v1948_v3, %v1947_v0 }
  0x9e   : > { %2854 = vmatprep.subr.bf16.mxu0 %v2853_v19  ;;  %2890 = vmatpush3.bf16.msra.mxu1 %v2865_v54 }
  0x9f   : > { %2883 = vmatprep.subr.bf16.mxu1 %v2869_v58 }
  0xa0   : > { %2540 = vmatmul.mubr.f32.gmra.mrb[12].mxu0 %v3196_v7  ;;  %v1593_v7 = vld [vmem:[#allocation2 + $0x92] sm:$0xff] }
  0xa1   : > { %2856 = vmatpush3.bf16.msra.mxu0 %v2853_v19  ;;  %2542 = vmatprep.mubr.f32.mxu0 %v3240_v29 }
  0xa2   : > { %2858 = vmatprep.subr.bf16.mxu0 %v2857_v36  ;;  %2891 = vmatpush3.bf16.msra.mxu1 %v2869_v58 }
  0xa3   : > { %2884 = vmatprep.subr.bf16.mxu1 %v2873_v5 }
  0xa4   : > { %2543 = vmatmul.mubr.f32.gmra.mrb[14].mxu0 %v1455_v17 }
  0xa5   : > { %2860 = vmatpush3.bf16.msra.mxu0 %v2857_v36  ;;  %2577 = vmatprep.mubr.f32.mxu0 %v3410_v60 }
  0xa6   : > { %2862 = vmatprep.subr.bf16.mxu0 %v2861_v44  ;;  %2892 = vmatpush3.bf16.msra.mxu1 %v2873_v5 }
  0xa9   : > { %2864 = vmatpush3.bf16.msra.mxu0 %v2861_v44  ;;  %2584 = vmatmul.mubr.f32.vlgmr.msra.gmra.mrb[16].mxu1 %v3451_v20 }
  0xaa   : > { %2866 = vmatprep.subr.bf16.mxu0 %v2865_v54  ;;  %2586 = vmatprep.mubr.f32.mxu1 %v3467_v26 }
  0xad   : > { %2868 = vmatpush3.bf16.msra.mxu0 %v2865_v54  ;;  %2587 = vmatmul.mubr.f32.gmra.mrb[18].mxu1 %v1593_v7 }
  0xae   : > { %2870 = vmatprep.subr.bf16.mxu0 %v2869_v58 }
  0xb1   : > { %2872 = vmatpush3.bf16.msra.mxu0 %v2869_v58 }
  0xb2   : > { %2874 = vmatprep.subr.bf16.mxu0 %v2873_v5 }
  0xb5   : > { %2876 = vmatpush3.bf16.msra.mxu0 %v2873_v5 }
  0xb8   : > { %2578 = vmatmul.mubr.f32.vlgmr.msra.gmra.mrb[8].mxu0 %v3427_v4 }
  0xb9   : > { %2580 = vmatprep.mubr.f32.mxu0 %v3430_v6 }
  0xbc   : > { %2581 = vmatmul.mubr.f32.gmra.mrb[10].mxu0 %v3432_v11 }
  0xeb   : > { %v2227_v29 = vpop.f32.mrb[0].mxu0 }
  0xec   : > { %v580_v60 = vpop.f32.mrb[1].mxu0 }
  0xef   : > { %v2230_v8 = vpop.f32.mrb[2].mxu0 }
  0xf0   : > { %v590_v9 = vpop.f32.mrb[3].mxu0 }
  0xf3   : > { %v2233_v12 = vpop.f32.mrb[4].mxu0 }
  0xf4   : > { %v600_v20 = vpop.f32.mrb[5].mxu0 }
  0xf7   : > { %v2236_v13 = vpop.f32.mrb[6].mxu0 }
  0xf8   : > { %v610_v14 = vpop.f32.mrb[7].mxu0 }
  0xfc   : > { %v2213_v26 = vpop.f32.mrb[0].mxu1 }
  0xfd   : > { %v586_v15 = vadd.f32 %v2227_v29, %v2213_v26  ;;  %v446_v16 = vpop.f32.mrb[1].mxu1 }
  0xfe   : > { %v581_v18 = vadd.f32 %v580_v60, %v446_v16 }
 0x100   : > { %v2216_v21 = vpop.f32.mrb[2].mxu1 }
 0x101   : > { %v596_v22 = vadd.f32 %v2230_v8, %v2216_v21  ;;  %v456_v23 = vpop.f32.mrb[3].mxu1 }
 0x102   : > { %v591_v4 = vadd.f32 %v590_v9, %v456_v23 }
 0x104   : > { %v2219_v24 = vpop.f32.mrb[4].mxu1 }
 0x105   : > { %v606_v6 = vadd.f32 %v2233_v12, %v2219_v24  ;;  %v466_v25 = vpop.f32.mrb[5].mxu1 }
 0x106   : > { %v601_v11 = vadd.f32 %v600_v20, %v466_v25 }
 0x108   : > { %v2222_v27 = vpop.f32.mrb[6].mxu1 }
 0x109   : > { %v616_v28 = vadd.f32 %v2236_v13, %v2222_v27  ;;  %v476_v31 = vpop.f32.mrb[7].mxu1 }
 0x10a   : > { %v611_v32 = vadd.f32 %v610_v14, %v476_v31 }
 0x15c   : > { %v2359_v33 = vpop.f32.mrb[8].mxu1 }
 0x15d   : > { %v2894_v30 = vadd.f32 %v2359_v33, %v586_v15  ;;  %v986_v35 = vpop.f32.mrb[9].mxu1 }
 0x15e   : > { %v2897_v37 = vadd.f32 %v986_v35, %v581_v18 }
 0x160   : > { %v2362_v38 = vpop.f32.mrb[10].mxu1 }
 0x161   : > { %v2900_v40 = vadd.f32 %v2362_v38, %v596_v22  ;;  %v996_v41 = vpop.f32.mrb[11].mxu1 }
 0x162   : > { %v2903_v42 = vadd.f32 %v996_v41, %v591_v4 }
 0x164   : > { %v2365_v43 = vpop.f32.mrb[12].mxu1 }
 0x165   : > { %v2906_v45 = vadd.f32 %v2365_v43, %v606_v6  ;;  %v1006_v46 = vpop.f32.mrb[13].mxu1 }
 0x166   : > { %v2910_v50 = vadd.f32 %v1006_v46, %v601_v11 }
 0x168   : > { %v2368_v34 = vpop.f32.mrb[14].mxu1 }
 0x169   : > { %v2914_v10 = vadd.f32 %v2368_v34, %v616_v28  ;;  %v1016_v48 = vpop.f32.mrb[15].mxu1 }
 0x16a   : > { %v2918_v51 = vadd.f32 %v1016_v48, %v611_v32 }
 0x173   : > { %v2541_v52 = vpop.f32.mrb[12].mxu0 }
 0x174   : > { %v2907_v53 = vadd.f32 %v2906_v45, %v2541_v52  ;;  %v1559_v55 = vpop.f32.mrb[13].mxu0 }
 0x175   : > { %v2911_v56 = vadd.f32 %v2910_v50, %v1559_v55 }
 0x177   : > { %v2544_v59 = vpop.f32.mrb[14].mxu0 }
 0x178   : > { %v2915_v61 = vadd.f32 %v2914_v10, %v2544_v59  ;;  %v1569_v19 = vpop.f32.mrb[15].mxu0 }
 0x179   : > { %v2919_v62 = vadd.f32 %v2918_v51, %v1569_v19 }
 0x17c   : > { %v2585_v63 = vpop.f32.mrb[16].mxu1 }
 0x17d   : > { %v2908_v36 = vadd.f32 %v2907_v53, %v2585_v63  ;;  %v1697_v39 = vpop.f32.mrb[17].mxu1 }
 0x17e   : > { %v2912_v1 = vadd.f32 %v2911_v56, %v1697_v39 }
 0x17f   : > { %1729 = vst [vmem:[%s271_s18 + $0x28] sm:$0xff] %v2908_v36 }
 0x180   : > { %1728 = vst [vmem:[%s271_s18 + $0x20] sm:$0xff] %v2912_v1  ;;  %v2588_v44 = vpop.f32.mrb[18].mxu1 }
 0x181   : > { %v2916_v47 = vadd.f32 %v2915_v61, %v2588_v44  ;;  %v1707_v2 = vpop.f32.mrb[19].mxu1 }
 0x182   : > { %v2920_v54 = vadd.f32 %v2919_v62, %v1707_v2 }
 0x183   : > { %1731 = vst [vmem:[%s271_s18 + $0x38] sm:$0xff] %v2916_v47 }
 0x184   : > { %1730 = vst [vmem:[%s271_s18 + $0x30] sm:$0xff] %v2920_v54 }
 0x18b   : > { %v2579_v49 = vpop.f32.mrb[8].mxu0 }
 0x18c   : > { %v2895_v57 = vadd.f32 %v2894_v30, %v2579_v49  ;;  %v1677_v58 = vpop.f32.mrb[9].mxu0 }
 0x18d   : > { %v2898_v0 = vadd.f32 %v2897_v37, %v1677_v58 }
 0x18e   : > { %1725 = vst [vmem:[%s271_s18 + $0x8] sm:$0xff] %v2895_v57 }
 0x18f   : > { %1724 = vst [vmem:[%s271_s18] sm:$0xff] %v2898_v0  ;;  %v2582_v3 = vpop.f32.mrb[10].mxu0 }
 0x190   : > { %v2901_v17 = vadd.f32 %v2900_v40, %v2582_v3  ;;  %v1687_v5 = vpop.f32.mrb[11].mxu0 }
 0x191   : > { %v2904_v7 = vadd.f32 %v2903_v42, %v1687_v5 }
 0x192   : > { %1727 = vst [vmem:[%s271_s18 + $0x18] sm:$0xff] %v2901_v17 }
 0x193   : > { %1726 = vst [vmem:[%s271_s18 + $0x10] sm:$0xff] %v2904_v7 }
 0x194 PF: > { %s16_s21 = sadd.s32 1, %s2980_s21  }
 0x195   : > { %p13_p4 = scmp.ge.s32.totalorder %s16_s21, 4  }
 0x197   :  { %15 = sbr.rel (!%p13_p4) target bundleno = 1 (0x1), region = 87 }

// kernel: basic_block_forward.2
= control target key start
LH: loop header
LB: loop body
LE: loop exit
PB: predicated region body
PF: predicated region fallthrough
CT: control target
= control target key end

     0   :  { %s3017_s21 = smov 0   ;;  %s3813_s0 = inlined_call_operand.vmem [shape: f32[2,4,8,8,4], index: 0, kind: input, shape index: {}]   ;;  %s3814_s1 = inlined_call_operand.vmem [shape: f32[9,128,128], index: 1, kind: input, shape index: {}]   ;;  %s3815_s2 = inlined_call_operand.vmem [shape: f32[1,4], index: 2, kind: input, shape index: {}]   ;;  %s3816_s3 = inlined_call_operand.vmem [shape: f32[1,4], index: 3, kind: input, shape index: {}]   ;;  %s3817_s4 = inlined_call_operand.vmem [shape: f32[1,128], index: 4, kind: input, shape index: {}]   ;;  %s3818_s5 = inlined_call_operand.vmem [shape: f32[1,128], index: 5, kind: input, shape index: {}]   ;;  %s3819_s6 = inlined_call_operand.vmem [shape: f32[2,8,8,128], index: 6, kind: output, shape index: {}]  }
   0x1 LB: > { %s1839_s22 = sadd.s32 4294967295, %s2979_s21   ;;  %p1843_p0 = scmp.ge.s32.totalorder %s2979_s21, 1  ;;  %s2979_s21 = sphi %s3017_s21, %s16_s21  }
   0x2   : > { %p212_p1 = scmp.lt.s32.totalorder %s2979_s21, 3 }
   0x4   : > { %p213_p2 = pnand %p1843_p0, %p212_p1 }
   0x5   : > { %v1850_v0 = vld [vmem:[%s3814_s1 + $0x80] sm:$0xff] (!%p213_p2)  ;;  %v1851_v1 = vld [vmem:[%s3814_s1 + $0x88] sm:$0xff] (!%p213_p2)  ;;  %p3038_p3 = scmp.lt.s32.totalorder (!%p213_p2), %s1839_s22, 1  ;;  %v3052_v5 = vld [vmem:[%s3814_s1 + $0x90] sm:$0xff] (!%p213_p2)  ;;  %v2981_v7 = vmov (!%p213_p2), 0.0   ;;  %vm475_vm0 = vcmask (!%p213_p2), 31744  }
   0x6   : > { %216 = sbr.rel (%p213_p2) target bundleno = 403 (0x193), region = 44  ;;  %v3034_v2 = vld [vmem:[%s3814_s1 + $0x200] sm:$0xff] (!%p213_p2)  ;;  %v3042_v3 = vpack.c.bf16 (!%p213_p2), %v1851_v1, %v1850_v0  ;;  %v3047_v4 = vld [vmem:[%s3814_s1 + $0x208] sm:$0xff] (!%p213_p2)  ;;  %v3057_v6 = vld [vmem:[%s3814_s1 + $0x98] sm:$0xff] (!%p213_p2)  ;;  %292 = vst [vmem:[#allocation2 + $0x140] sm:$0xff] (!%p213_p2), %v2981_v7 }
   0x7   : > { %293 = vst [vmem:[#allocation2 + $0x148] sm:$0x3] (!%p213_p2), %v2981_v7  ;;  %254 = vst [vmem:[#allocation2 + $0x10] sm:$0xff] (!%p213_p2), %v2981_v7  ;;  %v2724_v8 = vpack.c.bf16 (!%p213_p2), %v3047_v4, %v3034_v2  ;;  %v2600_v9 = vpack.c.bf16 (!%p213_p2), %v3057_v6, %v3052_v5  ;;  %v1900_v10 = vld [vmem:[%s3814_s1 + $0x210] sm:$0xff] (!%p213_p2)  ;;  %v1901_v11 = vld [vmem:[%s3814_s1 + $0x218] sm:$0xff] (!%p213_p2) }
   0x8   : > { %255 = vst [vmem:[#allocation2 + $0x18] sm:$0x3] (!%p213_p2), %v2981_v7  ;;  %256 = vst [vmem:[#allocation2 + $0x20] sm:$0xff] (!%p213_p2), %v2981_v7  ;;  %v1854_v12 = vld [vmem:[%s3814_s1 + $0xa0] sm:$0xff] (!%p213_p2)  ;;  %2597 = vmatprep.subr.bf16.mxu1 (!%p213_p2), %v3042_v3  ;;  %v2728_v13 = vpack.c.bf16 (!%p213_p2), %v1901_v11, %v1900_v10  ;;  %v1855_v14 = vld [vmem:[%s3814_s1 + $0xa8] sm:$0xff] (!%p213_p2) }
   0x9   : > { %257 = vst [vmem:[#allocation2 + $0x28] sm:$0x3] (!%p213_p2), %v2981_v7  ;;  %258 = vst [vmem:[#allocation2 + $0x30] sm:$0xff] (!%p213_p2), %v2981_v7  ;;  %v1902_v15 = vld [vmem:[%s3814_s1 + $0x220] sm:$0xff] (!%p213_p2)  ;;  %v1903_v16 = vld [vmem:[%s3814_s1 + $0x228] sm:$0xff] (!%p213_p2)  ;;  %2725 = vmatprep.subr.bf16.mxu0 (!%p213_p2), %v2724_v8  ;;  %2599 = vmatpush3.bf16.msra.mxu1 (!%p213_p2), %v3042_v3  ;;  %v2604_v17 = vpack.c.bf16 (!%p213_p2), %v1855_v14, %v1854_v12 }
   0xa   : > { %259 = vst [vmem:[#allocation2 + $0x38] sm:$0x3] (!%p213_p2), %v2981_v7  ;;  %260 = vst [vmem:[#allocation2 + $0x40] sm:$0xff] (!%p213_p2), %v2981_v7  ;;  %2727 = vmatpush3.bf16.msra.mxu0 (!%p213_p2), %v2724_v8  ;;  %2601 = vmatprep.subr.bf16.mxu1 (!%p213_p2), %v2600_v9  ;;  %v2732_v18 = vpack.c.bf16 (!%p213_p2), %v1903_v16, %v1902_v15  ;;  %v1856_v19 = vld [vmem:[%s3814_s1 + $0xb0] sm:$0xff] (!%p213_p2)  ;;  %v1857_v20 = vld [vmem:[%s3814_s1 + $0xb8] sm:$0xff] (!%p213_p2) }
   0xb   : > { %261 = vst [vmem:[#allocation2 + $0x48] sm:$0x3] (!%p213_p2), %v2981_v7  ;;  %262 = vst [vmem:[#allocation2 + $0x50] sm:$0xff] (!%p213_p2), %v2981_v7  ;;  %2729 = vmatprep.subr.bf16.mxu0 (!%p213_p2), %v2728_v13  ;;  %v1904_v21 = vld [vmem:[%s3814_s1 + $0x230] sm:$0xff] (!%p213_p2)  ;;  %v1905_v22 = vld [vmem:[%s3814_s1 + $0x238] sm:$0xff] (!%p213_p2)  ;;  %v2608_v23 = vpack.c.bf16 (!%p213_p2), %v1857_v20, %v1856_v19 }
   0xc   : > { %263 = vst [vmem:[#allocation2 + $0x58] sm:$0x3] (!%p213_p2), %v2981_v7  ;;  %264 = vst [vmem:[#allocation2 + $0x60] sm:$0xff] (!%p213_p2), %v2981_v7  ;;  %v2736_v24 = vpack.c.bf16 (!%p213_p2), %v1905_v22, %v1904_v21  ;;  %v1858_v25 = vld [vmem:[%s3814_s1 + $0xc0] sm:$0xff] (!%p213_p2)  ;;  %v1859_v26 = vld [vmem:[%s3814_s1 + $0xc8] sm:$0xff] (!%p213_p2) }
   0xd   : > { %265 = vst [vmem:[#allocation2 + $0x68] sm:$0x3] %v2981_v7  ;;  %266 = vst [vmem:[#allocation2 + $0x70] sm:$0xff] %v2981_v7  ;;  %s3822_s22 = smov (!%p3038_p3, %s1839_s22), 1  ;;  %2603 = vmatpush3.bf16.msra.mxu1 %v2600_v9  ;;  %v1906_v28 = vld [vmem:[%s3814_s1 + $0x240] sm:$0xff]  ;;  %v1907_v29 = vld [vmem:[%s3814_s1 + $0x248] sm:$0xff]  ;;  %v2612_v33 = vpack.c.bf16 %v1859_v26, %v1858_v25 }
   0xe   : > { %267 = vst [vmem:[#allocation2 + $0x78] sm:$0x3] %v2981_v7  ;;  %268 = vst [vmem:[#allocation2 + $0x80] sm:$0xff] %v2981_v7  ;;  %s1982_s26 = sshll.u32 %s3822_s22, 8  ;;  %2731 = vmatpush3.bf16.msra.mxu0 %v2728_v13  ;;  %2605 = vmatprep.subr.bf16.mxu1 %v2604_v17  ;;  %v534_v27 = vld [vmem:[#allocation2 + $0x141] sm:$0xff]  ;;  %v2740_v37 = vpack.c.bf16 %v1907_v29, %v1906_v28  ;;  %v1860_v38 = vld [vmem:[%s3814_s1 + $0xd0] sm:$0xff] }
   0xf   : > { %269 = vst [vmem:[#allocation2 + $0x88] sm:$0x3] %v2981_v7  ;;  %274 = vst [vmem:[#allocation2 + $0xb0] sm:$0xff] %v2981_v7  ;;  %s3173_s13 = scalar_lea.vmem %s3813_s0, %s1982_s26  ;;  %2733 = vmatprep.subr.bf16.mxu0 %v2732_v18  ;;  %2232 = vmatprep.mubr.f32.mxu1 %v534_v27  ;;  %v3191_v31 = vld [vmem:[%s3815_s2] ss:$0 sm:$0xff]  ;;  %v1861_v39 = vld [vmem:[%s3814_s1 + $0xd8] sm:$0xff] }
  0x10   : > { %275 = vst [vmem:[#allocation2 + $0xb8] sm:$0x3] %v2981_v7  ;;  %276 = vst [vmem:[#allocation2 + $0xc0] sm:$0xff] %v2981_v7  ;;  %v332_v30 = vld [vmem:[%s3173_s13] sm:$0xff]  ;;  %v333_v36 = vld [vmem:[%s3173_s13 + $0x8] sm:$0xff]  ;;  %v2616_v47 = vpack.c.bf16 %v1861_v39, %v1860_v38  ;;  %s1983_s20 = sshll.u32 %s3822_s22, 6 }
  0x11   : > { %277 = vst [vmem:[#allocation2 + $0xc8] sm:$0x3] %v2981_v7  ;;  %278 = vst [vmem:[#allocation2 + $0xd0] sm:$0xff] %v2981_v7  ;;  %2607 = vmatpush3.bf16.msra.mxu1 %v2604_v17  ;;  %v3196_v32 = vld [vmem:[%s3816_s3] ss:$0 sm:$0xff]  ;;  %v371_v34 = vmul.f32 %v3191_v31, %v332_v30  ;;  %v372_v41 = vmul.f32 %v3191_v31, %v333_v36  ;;  %v1908_v42 = vld [vmem:[%s3814_s1 + $0x250] sm:$0xff]  ;;  %s3800_s24 = scalar_lea.vmem %s3819_s6, %s1983_s20 }
  0x12   : > { %279 = vst [vmem:[#allocation2 + $0xd8] sm:$0x3] %v2981_v7  ;;  %280 = vst [vmem:[#allocation2 + $0xe0] sm:$0xff] %v2981_v7  ;;  %2735 = vmatpush3.bf16.msra.mxu0 %v2732_v18  ;;  %2609 = vmatprep.subr.bf16.mxu1 %v2608_v23  ;;  %v348_v35 = vld [vmem:[%s3173_s13 + $0x80] sm:$0xff]  ;;  %v1909_v43 = vld [vmem:[%s3814_s1 + $0x258] sm:$0xff] }
  0x13   : > { %281 = vst [vmem:[#allocation2 + $0xe8] sm:$0x3] %v2981_v7  ;;  %282 = vst [vmem:[#allocation2 + $0xf0] sm:$0xff] %v2981_v7  ;;  %2737 = vmatprep.subr.bf16.mxu0 %v2736_v24  ;;  %v387_v40 = vmul.f32 %v3191_v31, %v348_v35  ;;  %v410_v44 = vadd.f32 %v3196_v32, %v371_v34  ;;  %v411_v46 = vadd.f32 %v3196_v32, %v372_v41  ;;  %v1862_v50 = vld [vmem:[%s3814_s1 + $0xe0] sm:$0xff]  ;;  %v1863_v51 = vld [vmem:[%s3814_s1 + $0xe8] sm:$0xff] }
  0x14   : > { %283 = vst [vmem:[#allocation2 + $0xf8] sm:$0x3] %v2981_v7  ;;  %284 = vst [vmem:[#allocation2 + $0x100] sm:$0xff] %v2981_v7  ;;  %v2744_v49 = vpack.c.bf16 %v1909_v43, %v1908_v42  ;;  %v1910_v54 = vld [vmem:[%s3814_s1 + $0x260] sm:$0xff]  ;;  %v1911_v55 = vld [vmem:[%s3814_s1 + $0x268] sm:$0xff]  ;;  %v2620_v61 = vpack.c.bf16 %v1863_v51, %v1862_v50 }
  0x15   : > { %285 = vst [vmem:[#allocation2 + $0x108] sm:$0x3] %v2981_v7  ;;  %286 = vst [vmem:[#allocation2 + $0x110] sm:$0xff] %v2981_v7  ;;  %2611 = vmatpush3.bf16.msra.mxu1 %v2608_v23  ;;  %v426_v45 = vadd.f32 %v3196_v32, %v387_v40  ;;  %v442_v48 = vmax.f32 %v410_v44, 0.0  ;;  %v443_v53 = vmax.f32 %v411_v46, 0.0  ;;  %v349_v56 = vld [vmem:[%s3173_s13 + $0x88] sm:$0xff]  ;;  %v2748_v1 = vpack.c.bf16 %v1911_v55, %v1910_v54 }
  0x16   : > { %287 = vst [vmem:[#allocation2 + $0x118] sm:$0x3] %v2981_v7  ;;  %288 = vst [vmem:[#allocation2 + $0x120] sm:$0xff] %v2981_v7  ;;  %2739 = vmatpush3.bf16.msra.mxu0 %v2736_v24  ;;  %2613 = vmatprep.subr.bf16.mxu1 %v2612_v33  ;;  %v1864_v57 = vld [vmem:[%s3814_s1 + $0xf0] sm:$0xff]  ;;  %v1865_v58 = vld [vmem:[%s3814_s1 + $0xf8] sm:$0xff]  ;;  %v388_v59 = vmul.f32 %v3191_v31, %v349_v56 }
  0x17   : > { %289 = vst [vmem:[#allocation2 + $0x128] sm:$0x3] %v2981_v7  ;;  %294 = vst [vmem:[#allocation2 + $0x150] sm:$0xff] %v2981_v7  ;;  %2741 = vmatprep.subr.bf16.mxu0 %v2740_v37  ;;  %v458_v52 = vmax.f32 %v426_v45, 0.0  ;;  %v334_v60 = vld [vmem:[%s3173_s13 + $0x10] sm:$0xff]  ;;  %v335_v0 = vld [vmem:[%s3173_s13 + $0x18] sm:$0xff]  ;;  %v3255_v9 = vpack.c.bf16 %v1865_v58, %v1864_v57 }
  0x18   : > { %295 = vst [vmem:[#allocation2 + $0x158] sm:$0x3] %v2981_v7  ;;  %296 = vst [vmem:[#allocation2 + $0x160] sm:$0xff] %v2981_v7  ;;  %v373_v62 = vmul.f32 %v3191_v31, %v334_v60  ;;  %v350_v63 = vld [vmem:[%s3173_s13 + $0x90] sm:$0xff]  ;;  %v1913_v3 = vld [vmem:[%s3814_s1 + $0x278] sm:$0xff]  ;;  %v427_v4 = vadd.f32 %v3196_v32, %v388_v59  ;;  %v374_v6 = vmul.f32 %v3191_v31, %v335_v0 }
  0x19   : > { %297 = vst [vmem:[#allocation2 + $0x168] sm:$0x3] %v2981_v7  ;;  %298 = vst [vmem:[#allocation2 + $0x170] sm:$0xff] %v2981_v7  ;;  %2615 = vmatpush3.bf16.msra.mxu1 %v2612_v33  ;;  %v1912_v2 = vld [vmem:[%s3814_s1 + $0x270] sm:$0xff]  ;;  %v389_v5 = vmul.f32 %v3191_v31, %v350_v63  ;;  %v351_v8 = vld [vmem:[%s3173_s13 + $0x98] sm:$0xff] }
  0x1a   : > { %299 = vst [vmem:[#allocation2 + $0x178] sm:$0x3] %v2981_v7  ;;  %300 = vst [vmem:[#allocation2 + $0x180] sm:$0xff] %v2981_v7  ;;  %2743 = vmatpush3.bf16.msra.mxu0 %v2740_v37  ;;  %2617 = vmatprep.subr.bf16.mxu1 %v2616_v47  ;;  %v412_v10 = vadd.f32 %v3196_v32, %v373_v62  ;;  %v390_v11 = vmul.f32 %v3191_v31, %v351_v8  ;;  %v336_v12 = vld [vmem:[%s3173_s13 + $0x20] sm:$0xff]  ;;  %v459_v13 = vmax.f32 %v427_v4, 0.0  ;;  %v337_v18 = vld [vmem:[%s3173_s13 + $0x28] sm:$0xff] }
  0x1b   : > { %301 = vst [vmem:[#allocation2 + $0x188] sm:$0x3] %v2981_v7  ;;  %302 = vst [vmem:[#allocation2 + $0x190] sm:$0xff] %v2981_v7  ;;  %2745 = vmatprep.subr.bf16.mxu0 %v2744_v49  ;;  %v428_v14 = vadd.f32 %v3196_v32, %v389_v5  ;;  %v413_v15 = vadd.f32 %v3196_v32, %v374_v6  ;;  %v375_v16 = vmul.f32 %v3191_v31, %v336_v12  ;;  %v352_v17 = vld [vmem:[%s3173_s13 + $0xa0] sm:$0xff]  ;;  %v353_v19 = vld [vmem:[%s3173_s13 + $0xa8] sm:$0xff] }
  0x1c   : > { %303 = vst [vmem:[#allocation2 + $0x198] sm:$0x3] %v2981_v7  ;;  %304 = vst [vmem:[#allocation2 + $0x1a0] sm:$0xff] %v2981_v7  ;;  %v2752_v20 = vpack.c.bf16 %v1913_v3, %v1912_v2  ;;  %v517_v21 = vld [vmem:[%s3814_s1] sm:$0xff]  ;;  %v518_v22 = vld [vmem:[%s3814_s1 + $0x8] sm:$0xff]  ;;  %v444_v23 = vmax.f32 %v412_v10, 0.0  ;;  %v429_v24 = vadd.f32 %v3196_v32, %v390_v11  ;;  %v391_v25 = vmul.f32 %v3191_v31, %v352_v17 }
  0x1d   : > { %305 = vst [vmem:[#allocation2 + $0x1a8] sm:$0x3] %v2981_v7  ;;  %306 = vst [vmem:[#allocation2 + $0x1b0] sm:$0xff] %v2981_v7  ;;  %2619 = vmatpush3.bf16.msra.mxu1 %v2616_v47  ;;  %v338_v26 = vld [vmem:[%s3173_s13 + $0x30] sm:$0xff]  ;;  %v460_v28 = vmax.f32 %v428_v14, 0.0  ;;  %v445_v29 = vmax.f32 %v413_v15, 0.0  ;;  %v414_v30 = vadd.f32 %v3196_v32, %v375_v16  ;;  %v376_v33 = vmul.f32 %v3191_v31, %v337_v18 }
  0x1e   : > { %307 = vst [vmem:[#allocation2 + $0x1b8] sm:$0x3] %v2981_v7  ;;  %308 = vst [vmem:[#allocation2 + $0x1c0] sm:$0xff] %v2981_v7  ;;  %2747 = vmatpush3.bf16.msra.mxu0 %v2744_v49  ;;  %2621 = vmatprep.subr.bf16.mxu1 %v2620_v61  ;;  %v1914_v34 = vld [vmem:[%s3814_s1 + $0x280] sm:$0xff]  ;;  %v1915_v35 = vld [vmem:[%s3814_s1 + $0x288] sm:$0xff]  ;;  %v461_v36 = vmax.f32 %v429_v24, 0.0  ;;  %v430_v37 = vadd.f32 %v3196_v32, %v391_v25  ;;  %v392_v38 = vmul.f32 %v3191_v31, %v353_v19 }
  0x1f   : > { %309 = vst [vmem:[#allocation2 + $0x1c8] sm:$0x3] %v2981_v7  ;;  %312 = vst [vmem:[#allocation2 + $0x1e0] sm:$0xff] %v2981_v7  ;;  %2749 = vmatprep.subr.bf16.mxu0 %v2748_v1  ;;  %v354_v39 = vld [vmem:[%s3173_s13 + $0xb0] sm:$0xff]  ;;  %v2628_v40 = vpack.c.bf16 %v518_v22, %v517_v21  ;;  %v446_v41 = vmax.f32 %v414_v30, 0.0  ;;  %v415_v42 = vadd.f32 %v3196_v32, %v376_v33  ;;  %v339_v44 = vld [vmem:[%s3173_s13 + $0x38] sm:$0xff] }
  0x20   : > { %313 = vst [vmem:[#allocation2 + $0x1e8] sm:$0x3] %v2981_v7  ;;  %314 = vst [vmem:[#allocation2 + $0x1f0] sm:$0xff] %v2981_v7  ;;  %v377_v43 = vmul.f32 %v3191_v31, %v338_v26  ;;  %v519_v45 = vld [vmem:[%s3814_s1 + $0x10] sm:$0xff]  ;;  %v462_v46 = vmax.f32 %v430_v37, 0.0  ;;  %v431_v47 = vadd.f32 %v3196_v32, %v392_v38  ;;  %v378_v49 = vmul.f32 %v3191_v31, %v339_v44  ;;  %v340_v50 = vld [vmem:[%s3173_s13 + $0x40] sm:$0xff] }
  0x21   : > { %315 = vst [vmem:[#allocation2 + $0x1f8] sm:$0x3] %v2981_v7  ;;  %316 = vst [vmem:[#allocation2 + $0x200] sm:$0xff] %v2981_v7  ;;  %2623 = vmatpush3.bf16.msra.mxu1 %v2620_v61  ;;  %v2756_v51 = vpack.c.bf16 %v1915_v35, %v1914_v34  ;;  %v379_v55 = vmul.f32 %v3191_v31, %v340_v50  ;;  %v356_v56 = vld [vmem:[%s3173_s13 + $0xc0] sm:$0xff]  ;;  %v341_v57 = vld [vmem:[%s3173_s13 + $0x48] sm:$0xff] }
  0x22   : > { %317 = vst [vmem:[#allocation2 + $0x208] sm:$0x3] %v2981_v7  ;;  %318 = vst [vmem:[#allocation2 + $0x210] sm:$0xff] %v2981_v7  ;;  %2751 = vmatpush3.bf16.msra.mxu0 %v2748_v1  ;;  %2625 = vmatprep.subr.bf16.mxu1 %v3255_v9  ;;  %v416_v54 = vadd.f32 %v3196_v32, %v377_v43  ;;  %v1916_v58 = vld [vmem:[%s3814_s1 + $0x290] sm:$0xff]  ;;  %v1917_v59 = vld [vmem:[%s3814_s1 + $0x298] sm:$0xff]  ;;  %v463_v60 = vmax.f32 %v431_v47, 0.0  ;;  %v417_v62 = vadd.f32 %v3196_v32, %v378_v49 }
  0x23   : > { %319 = vst [vmem:[#allocation2 + $0x218] sm:$0x3] %v2981_v7  ;;  %320 = vst [vmem:[#allocation2 + $0x220] sm:$0xff] %v2981_v7  ;;  %2753 = vmatprep.subr.bf16.mxu0 %v2752_v20  ;;  %v418_v1 = vadd.f32 %v3196_v32, %v379_v55  ;;  %v395_v2 = vmul.f32 %v3191_v31, %v356_v56  ;;  %v380_v3 = vmul.f32 %v3191_v31, %v341_v57  ;;  %v521_v10 = vld [vmem:[%s3814_s1 + $0x20] sm:$0xff]  ;;  %v522_v11 = vld [vmem:[%s3814_s1 + $0x28] sm:$0xff] }
  0x24   : > { %321 = vst [vmem:[#allocation2 + $0x228] sm:$0x3] %v2981_v7  ;;  %322 = vst [vmem:[#allocation2 + $0x230] sm:$0xff] %v2981_v7  ;;  %v448_v0 = vmax.f32 %v416_v54, 0.0  ;;  %v449_v8 = vmax.f32 %v417_v62, 0.0  ;;  %v1918_v15 = vld [vmem:[%s3814_s1 + $0x2a0] sm:$0xff]  ;;  %v2636_v22 = vpack.c.bf16 %v522_v11, %v521_v10 }
  0x25   : > { %323 = vst [vmem:[#allocation2 + $0x238] sm:$0x3] %v2981_v7  ;;  %324 = vst [vmem:[#allocation2 + $0x240] sm:$0xff] %v2981_v7  ;;  %2627 = vmatpush3.bf16.msra.mxu1 %v3255_v9  ;;  %v2760_v9 = vpack.c.bf16 %v1917_v59, %v1916_v58  ;;  %v450_v12 = vmax.f32 %v418_v1, 0.0  ;;  %v419_v14 = vadd.f32 %v3196_v32, %v380_v3  ;;  %v1919_v16 = vld [vmem:[%s3814_s1 + $0x2a8] sm:$0xff]  ;;  %v524_v24 = vld [vmem:[%s3814_s1 + $0x38] sm:$0xff] }
  0x26   : > { %325 = vst [vmem:[#allocation2 + $0x248] sm:$0x3] %v2981_v7  ;;  %326 = vst [vmem:[#allocation2 + $0x250] sm:$0xff] %v2981_v7  ;;  %2755 = vmatpush3.bf16.msra.mxu0 %v2752_v20  ;;  %2629 = vmatprep.subr.bf16.mxu1 %v2628_v40  ;;  %v2764_v26 = vpack.c.bf16 %v1919_v16, %v1918_v15  ;;  %v342_v34 = vld [vmem:[%s3173_s13 + $0x50] sm:$0xff]  ;;  %v525_v35 = vld [vmem:[%s3814_s1 + $0x40] sm:$0xff] }
  0x27   : > { %327 = vst [vmem:[#allocation2 + $0x258] sm:$0x3] %v2981_v7  ;;  %328 = vst [vmem:[#allocation2 + $0x260] sm:$0xff] %v2981_v7  ;;  %2757 = vmatprep.subr.bf16.mxu0 %v2756_v51  ;;  %v451_v21 = vmax.f32 %v419_v14, 0.0  ;;  %v358_v44 = vld [vmem:[%s3173_s13 + $0xd0] sm:$0xff]  ;;  %v1923_v47 = vld [vmem:[%s3814_s1 + $0x2c8] sm:$0xff] }
  0x28   : > { %329 = vst [vmem:[#allocation2 + $0x268] sm:$0x3] %v2981_v7  ;;  %476 = vst.msk [vmem:[#allocation2 + $0x11] sm:$0xff] %vm475_vm0, %v442_v48  ;;  %v393_v48 = vmul.f32 %v3191_v31, %v354_v39  ;;  %v381_v39 = vmul.f32 %v3191_v31, %v342_v34  ;;  %v397_v49 = vmul.f32 %v3191_v31, %v358_v44  ;;  %v344_v62 = vld [vmem:[%s3173_s13 + $0x60] sm:$0xff]  ;;  %v1924_v1 = vld [vmem:[%s3814_s1 + $0x2d0] sm:$0xff] }
  0x29   : > { %492 = vst.msk [vmem:[#allocation2 + $0x151] sm:$0xff] %vm475_vm0, %v458_v52  ;;  %477 = vst.msk [vmem:[#allocation2 + $0x21] sm:$0xff] %vm475_vm0, %v443_v53  ;;  %v520_v52 = vld [vmem:[%s3814_s1 + $0x18] sm:$0xff]  ;;  %v447_v53 = vmax.f32 %v415_v42, 0.0  ;;  %v529_v34 = vld [vmem:[%s3814_s1 + $0x60] sm:$0xff] }
  0x2a   : > { %493 = vst.msk [vmem:[#allocation2 + $0x161] sm:$0xff] %vm475_vm0, %v459_v13  ;;  %478 = vst.msk [vmem:[#allocation2 + $0x31] sm:$0xff] %vm475_vm0, %v444_v23  ;;  %v432_v61 = vadd.f32 %v3196_v32, %v393_v48  ;;  %v2632_v5 = vpack.c.bf16 %v520_v52, %v519_v45  ;;  %v434_v13 = vadd.f32 %v3196_v32, %v395_v2  ;;  %v523_v23 = vld [vmem:[%s3814_s1 + $0x30] sm:$0xff]  ;;  %v343_v45 = vld [vmem:[%s3173_s13 + $0x58] sm:$0xff] }
  0x2b   : > { %494 = vst.msk [vmem:[#allocation2 + $0x171] sm:$0xff] %vm475_vm0, %v460_v28  ;;  %479 = vst.msk [vmem:[#allocation2 + $0x41] sm:$0xff] %vm475_vm0, %v445_v29  ;;  %v1921_v28 = vld [vmem:[%s3814_s1 + $0x2b8] sm:$0xff]  ;;  %v357_v29 = vld [vmem:[%s3173_s13 + $0xc8] sm:$0xff]  ;;  %v420_v48 = vadd.f32 %v3196_v32, %v381_v39  ;;  %v382_v50 = vmul.f32 %v3191_v31, %v343_v45 }
  0x2c   : > { %495 = vst.msk [vmem:[#allocation2 + $0x181] sm:$0xff] %vm475_vm0, %v461_v36  ;;  %480 = vst.msk [vmem:[#allocation2 + $0x51] sm:$0xff] %vm475_vm0, %v446_v41  ;;  %v464_v6 = vmax.f32 %v432_v61, 0.0  ;;  %v466_v20 = vmax.f32 %v434_v13, 0.0  ;;  %v396_v33 = vmul.f32 %v3191_v31, %v357_v29  ;;  %v526_v36 = vld [vmem:[%s3814_s1 + $0x48] sm:$0xff]  ;;  %v527_v52 = vld [vmem:[%s3814_s1 + $0x50] sm:$0xff] }
  0x2d   : > { %496 = vst.msk [vmem:[#allocation2 + $0x191] sm:$0xff] %vm475_vm0, %v462_v46  ;;  %481 = vst.msk [vmem:[#allocation2 + $0x61] sm:$0xff] %vm475_vm0, %v447_v53  ;;  %v1922_v46 = vld [vmem:[%s3814_s1 + $0x2c0] sm:$0xff]  ;;  %v528_v53 = vld [vmem:[%s3814_s1 + $0x58] sm:$0xff]  ;;  %v452_v59 = vmax.f32 %v420_v48, 0.0  ;;  %v421_v61 = vadd.f32 %v3196_v32, %v382_v50 }
  0x2e   : > { %497 = vst.msk [vmem:[#allocation2 + $0x1a1] sm:$0xff] %vm475_vm0, %v463_v60  ;;  %482 = vst.msk [vmem:[#allocation2 + $0x71] sm:$0xff] %vm475_vm0, %v448_v0  ;;  %v435_v43 = vadd.f32 %v3196_v32, %v396_v33  ;;  %v436_v60 = vadd.f32 %v3196_v32, %v397_v49  ;;  %v2644_v0 = vpack.c.bf16 %v526_v36, %v525_v35  ;;  %v361_v13 = vld [vmem:[%s3173_s13 + $0xe8] sm:$0xff]  ;;  %v531_v49 = vld [vmem:[%s3814_s1 + $0x70] sm:$0xff] }
  0x2f   : > { %v1046_v27 = vld [vmem:[#allocation2 + $0x11] sm:$0xff]  ;;  %498 = vst.msk [vmem:[#allocation2 + $0x1b1] sm:$0xff] %vm475_vm0, %v464_v6  ;;  %483 = vst.msk [vmem:[#allocation2 + $0x81] sm:$0xff] %vm475_vm0, %v449_v8  ;;  %v2772_v6 = vpack.c.bf16 %v1923_v47, %v1922_v46  ;;  %v453_v10 = vmax.f32 %v421_v61, 0.0  ;;  %v530_v35 = vld [vmem:[%s3814_s1 + $0x68] sm:$0xff] }
  0x30   : > { %2408 = vmatprep.mubr.f32.mxu0 %v1046_v27  ;;  %v3320_v63 = vld [vmem:[#allocation2 + $0x151] sm:$0xff]  ;;  %v1047_v4 = vld [vmem:[#allocation2 + $0x21] sm:$0xff]  ;;  %484 = vst.msk [vmem:[#allocation2 + $0xb1] sm:$0xff] %vm475_vm0, %v450_v12  ;;  %500 = vst.msk [vmem:[#allocation2 + $0x1f1] sm:$0xff] %vm475_vm0, %v466_v20  ;;  %v467_v55 = vmax.f32 %v435_v43, 0.0  ;;  %v2652_v47 = vpack.c.bf16 %v530_v35, %v529_v34 }
  0x31   : > { %2233 = vmatmul.mubr.f32.vlgmr.msra.gmra.mrb[0].mxu1 %v3320_v63  ;;  %v3343_v17 = vld [vmem:[#allocation2 + $0x161] sm:$0xff]  ;;  %2409 = vmatmul.mubr.f32.vlgmr.msra.gmra.mrb[0].mxu0 %v1047_v4  ;;  %v1048_v18 = vld [vmem:[#allocation2 + $0x31] sm:$0xff]  ;;  %485 = vst.msk [vmem:[#allocation2 + $0xc1] sm:$0xff] %vm475_vm0, %v451_v21  ;;  %v383_v4 = vmul.f32 %v3191_v31, %v344_v62  ;;  %486 = vst.msk [vmem:[#allocation2 + $0xd1] sm:$0xff] %vm475_vm0, %v452_v59  ;;  %v2648_v21 = vpack.c.bf16 %v528_v53, %v527_v52 }
  0x32   : > { %2631 = vmatpush3.bf16.msra.mxu1 %v2628_v40  ;;  %v3347_v19 = vld [vmem:[#allocation2 + $0x171] sm:$0xff]  ;;  %2759 = vmatpush3.bf16.msra.mxu0 %v2756_v51  ;;  %v1049_v25 = vld [vmem:[#allocation2 + $0x41] sm:$0xff]  ;;  %v2640_v40 = vpack.c.bf16 %v524_v24, %v523_v23  ;;  %501 = vst.msk [vmem:[#allocation2 + $0x201] sm:$0xff] %vm475_vm0, %v467_v55  ;;  %487 = vst.msk [vmem:[#allocation2 + $0xe1] sm:$0xff] %vm475_vm0, %v453_v10 }
  0x33   : > { %2633 = vmatprep.subr.bf16.mxu1 %v2632_v5  ;;  %2761 = vmatprep.subr.bf16.mxu0 %v2760_v9  ;;  %v1920_v27 = vld [vmem:[%s3814_s1 + $0x2b0] sm:$0xff]  ;;  %v3367_v30 = vld [vmem:[#allocation2 + $0x181] sm:$0xff]  ;;  %v359_v51 = vld [vmem:[%s3173_s13 + $0xd8] sm:$0xff]  ;;  %v422_v15 = vadd.f32 %v3196_v32, %v383_v4 }
  0x34   : > { %2235 = vmatprep.mubr.f32.mxu1 %v3343_v17  ;;  %2411 = vmatprep.mubr.f32.mxu0 %v1048_v18  ;;  %v1050_v37 = vld [vmem:[#allocation2 + $0x51] sm:$0xff]  ;;  %v3380_v41 = vpack.c.bf16 %v1921_v28, %v1920_v27  ;;  %v1051_v42 = vld [vmem:[#allocation2 + $0x61] sm:$0xff]  ;;  %v398_v56 = vmul.f32 %v3191_v31, %v359_v51  ;;  %v400_v18 = vmul.f32 %v3191_v31, %v361_v13 }
  0x35   : > { %2236 = vmatmul.mubr.f32.gmra.mrb[2].mxu1 %v3347_v19  ;;  %2412 = vmatmul.mubr.f32.gmra.mrb[2].mxu0 %v1049_v25  ;;  %v3377_v38 = vld [vmem:[#allocation2 + $0x191] sm:$0xff]  ;;  %v3403_v54 = vld [vmem:[#allocation2 + $0x1a1] sm:$0xff]  ;;  %v454_v28 = vmax.f32 %v422_v15, 0.0 }
  0x36   : > { %2635 = vmatpush3.bf16.msra.mxu1 %v2632_v5  ;;  %2763 = vmatpush3.bf16.msra.mxu0 %v2760_v9  ;;  %v1052_v57 = vld [vmem:[#allocation2 + $0x71] sm:$0xff]  ;;  %v1053_v2 = vld [vmem:[#allocation2 + $0x81] sm:$0xff]  ;;  %v437_v3 = vadd.f32 %v3196_v32, %v398_v56  ;;  %v468_v9 = vmax.f32 %v436_v60, 0.0  ;;  %v439_v33 = vadd.f32 %v3196_v32, %v400_v18 }
  0x37   : > { %2637 = vmatprep.subr.bf16.mxu1 %v2636_v22  ;;  %2765 = vmatprep.subr.bf16.mxu0 %v2764_v26  ;;  %v3406_v58 = vld [vmem:[#allocation2 + $0x1b1] sm:$0xff]  ;;  %v360_v5 = vld [vmem:[%s3173_s13 + $0xe0] sm:$0xff]  ;;  %v345_v12 = vld [vmem:[%s3173_s13 + $0x68] sm:$0xff]  ;;  %488 = vst.msk [vmem:[#allocation2 + $0xf1] sm:$0xff] %vm475_vm0, %v454_v28 }
  0x38   : > { %2238 = vmatprep.mubr.f32.mxu1 %v3367_v30  ;;  %2414 = vmatprep.mubr.f32.mxu0 %v1050_v37  ;;  %v1925_v8 = vld [vmem:[%s3814_s1 + $0x2d8] sm:$0xff]  ;;  %v399_v11 = vmul.f32 %v3191_v31, %v360_v5  ;;  %v469_v14 = vmax.f32 %v437_v3, 0.0  ;;  %v384_v16 = vmul.f32 %v3191_v31, %v345_v12  ;;  %v346_v20 = vld [vmem:[%s3173_s13 + $0x70] sm:$0xff]  ;;  %502 = vst.msk [vmem:[#allocation2 + $0x211] sm:$0xff] %vm475_vm0, %v468_v9  ;;  %v1866_v59 = vld [vmem:[%s3814_s1 + $0x100] sm:$0xff] }
  0x39   : > { %2239 = vmatmul.mubr.f32.gmra.mrb[4].mxu1 %v3377_v38  ;;  %2415 = vmatmul.mubr.f32.gmra.mrb[4].mxu0 %v1051_v42  ;;  %v385_v24 = vmul.f32 %v3191_v31, %v346_v20  ;;  %v362_v25 = vld [vmem:[%s3173_s13 + $0xf0] sm:$0xff]  ;;  %v2776_v27 = vpack.c.bf16 %v1925_v8, %v1924_v1  ;;  %v1927_v42 = vld [vmem:[%s3814_s1 + $0x2e8] sm:$0xff]  ;;  %v532_v50 = vld [vmem:[%s3814_s1 + $0x78] sm:$0xff] }
  0x3a   : > { %2639 = vmatpush3.bf16.msra.mxu1 %v2636_v22  ;;  %2767 = vmatpush3.bf16.msra.mxu0 %v2764_v26  ;;  %v1184_v22 = vld [vmem:[#allocation2 + $0xb1] sm:$0xff]  ;;  %v438_v23 = vadd.f32 %v3196_v32, %v399_v11  ;;  %503 = vst.msk [vmem:[#allocation2 + $0x221] sm:$0xff] %vm475_vm0, %v469_v14  ;;  %v423_v29 = vadd.f32 %v3196_v32, %v384_v16  ;;  %v1867_v60 = vld [vmem:[%s3814_s1 + $0x108] sm:$0xff]  ;;  %v1930_v61 = vld [vmem:[%s3814_s1 + $0x300] sm:$0xff] }
  0x3b   : > { %2641 = vmatprep.subr.bf16.mxu1 %v2640_v40  ;;  %2769 = vmatprep.subr.bf16.mxu0 %v3380_v41  ;;  %v347_v26 = vld [vmem:[%s3173_s13 + $0x78] sm:$0xff]  ;;  %v424_v37 = vadd.f32 %v3196_v32, %v385_v24  ;;  %v401_v39 = vmul.f32 %v3191_v31, %v362_v25  ;;  %v1928_v53 = vld [vmem:[%s3814_s1 + $0x2f0] sm:$0xff]  ;;  %v2656_v56 = vpack.c.bf16 %v532_v50, %v531_v49  ;;  %v1931_v62 = vld [vmem:[%s3814_s1 + $0x308] sm:$0xff] }
  0x3c   : > { %2241 = vmatprep.mubr.f32.mxu1 %v3403_v54  ;;  %2417 = vmatprep.mubr.f32.mxu0 %v1052_v57  ;;  %v470_v36 = vmax.f32 %v438_v23, 0.0  ;;  %v455_v43 = vmax.f32 %v423_v29, 0.0  ;;  %v1929_v55 = vld [vmem:[%s3814_s1 + $0x2f8] sm:$0xff]  ;;  %v2788_v1 = vpack.c.bf16 %v1931_v62, %v1930_v61  ;;  %v1932_v4 = vld [vmem:[%s3814_s1 + $0x310] sm:$0xff]  ;;  %v1185_v8 = vld [vmem:[#allocation2 + $0xc1] sm:$0xff] }
  0x3d   : > { %2242 = vmatmul.mubr.f32.gmra.mrb[6].mxu1 %v3406_v58  ;;  %2418 = vmatmul.mubr.f32.gmra.mrb[6].mxu0 %v1053_v2  ;;  %v456_v44 = vmax.f32 %v424_v37, 0.0  ;;  %v440_v45 = vadd.f32 %v3196_v32, %v401_v39  ;;  %v2784_v57 = vpack.c.bf16 %v1929_v55, %v1928_v53  ;;  %v1868_v2 = vld [vmem:[%s3814_s1 + $0x110] sm:$0xff]  ;;  %v1869_v3 = vld [vmem:[%s3814_s1 + $0x118] sm:$0xff]  ;;  %v1870_v12 = vld [vmem:[%s3814_s1 + $0x120] sm:$0xff] }
  0x3e   : > { %2643 = vmatpush3.bf16.msra.mxu1 %v2640_v40  ;;  %2771 = vmatpush3.bf16.msra.mxu0 %v3380_v41  ;;  %v386_v40 = vmul.f32 %v3191_v31, %v347_v26  ;;  %v1926_v41 = vld [vmem:[%s3814_s1 + $0x2e0] sm:$0xff]  ;;  %504 = vst.msk [vmem:[#allocation2 + $0x231] sm:$0xff] %vm475_vm0, %v470_v36  ;;  %489 = vst.msk [vmem:[#allocation2 + $0x101] sm:$0xff] %vm475_vm0, %v455_v43  ;;  %v1933_v5 = vld [vmem:[%s3814_s1 + $0x318] sm:$0xff]  ;;  %v2664_v9 = vpack.c.bf16 %v1869_v3, %v1868_v2 }
  0x3f   : > { %2645 = vmatprep.subr.bf16.mxu1 %v2644_v0  ;;  %2773 = vmatprep.subr.bf16.mxu0 %v2772_v6  ;;  %v2780_v48 = vpack.c.bf16 %v1927_v42, %v1926_v41  ;;  %490 = vst.msk [vmem:[#allocation2 + $0x111] sm:$0xff] %vm475_vm0, %v456_v44  ;;  %v472_v51 = vmax.f32 %v440_v45, 0.0  ;;  %v363_v10 = vld [vmem:[%s3173_s13 + $0xf8] sm:$0xff]  ;;  %v2792_v11 = vpack.c.bf16 %v1933_v5, %v1932_v4  ;;  %v1871_v13 = vld [vmem:[%s3814_s1 + $0x128] sm:$0xff]  ;;  %v1934_v15 = vld [vmem:[%s3814_s1 + $0x320] sm:$0xff] }
  0x40   : > { %2276 = vmatprep.mubr.f32.mxu1 %v2981_v7  ;;  %2452 = vmatprep.mubr.f32.mxu0 %v1184_v22  ;;  %v471_v7 = vmax.f32 %v439_v33, 0.0  ;;  %v425_v46 = vadd.f32 %v3196_v32, %v386_v40  ;;  %v402_v14 = vmul.f32 %v3191_v31, %v363_v10  ;;  %v1935_v16 = vld [vmem:[%s3814_s1 + $0x328] sm:$0xff]  ;;  %v3520_v18 = vld [vmem:[#allocation2 + $0x200] sm:$0xff]  ;;  %v1186_v20 = vld [vmem:[#allocation2 + $0xd1] sm:$0xff]  ;;  %v2668_v23 = vpack.c.bf16 %v1871_v13, %v1870_v12 }
  0x41   : > { %506 = vst.msk [vmem:[#allocation2 + $0x251] sm:$0xff] %vm475_vm0, %v472_v51  ;;  %v1187_v24 = vld [vmem:[#allocation2 + $0xe1] sm:$0xff]  ;;  %v2796_v25 = vpack.c.bf16 %v1935_v16, %v1934_v15  ;;  %v1872_v26 = vld [vmem:[%s3814_s1 + $0x130] sm:$0xff]  ;;  %v1937_v33 = vld [vmem:[%s3814_s1 + $0x338] sm:$0xff] }
  0x42   : > { %2647 = vmatpush3.bf16.msra.mxu1 %v2644_v0  ;;  %2775 = vmatpush3.bf16.msra.mxu0 %v2772_v6  ;;  %505 = vst.msk [vmem:[#allocation2 + $0x241] sm:$0xff] %vm475_vm0, %v471_v7  ;;  %v457_v52 = vmax.f32 %v425_v46, 0.0  ;;  %v2660_v0 = vpack.c.bf16 %v1867_v60, %v1866_v59  ;;  %v3503_v6 = vld [vmem:[#allocation2 + $0x1f0] sm:$0xff]  ;;  %v441_v22 = vadd.f32 %v3196_v32, %v402_v14  ;;  %v3539_v34 = vld [vmem:[#allocation2 + $0x220] sm:$0xff]  ;;  %v355_v35 = vld [vmem:[%s3173_s13 + $0xb8] sm:$0xff] }
  0x43   : > { %2649 = vmatprep.subr.bf16.mxu1 %v2648_v21  ;;  %2777 = vmatprep.subr.bf16.mxu0 %v2776_v27  ;;  %v1936_v28 = vld [vmem:[%s3814_s1 + $0x330] sm:$0xff]  ;;  %v394_v39 = vmul.f32 %v3191_v31, %v355_v35  ;;  %v1874_v43 = vld [vmem:[%s3814_s1 + $0x140] sm:$0xff]  ;;  %v1875_v7 = vld [vmem:[%s3814_s1 + $0x148] sm:$0xff] }
  0x44   : > { %491 = vst.msk [vmem:[#allocation2 + $0x121] sm:$0xff] %vm475_vm0, %v457_v52  ;;  %v473_v29 = vmax.f32 %v441_v22, 0.0  ;;  %v1188_v36 = vld [vmem:[#allocation2 + $0xf1] sm:$0xff]  ;;  %v2800_v42 = vpack.c.bf16 %v1937_v33, %v1936_v28  ;;  %v1938_v31 = vld [vmem:[%s3814_s1 + $0x340] sm:$0xff]  ;;  %v1939_v45 = vld [vmem:[%s3814_s1 + $0x348] sm:$0xff] }
  0x45   : > { %v3542_v37 = vld [vmem:[#allocation2 + $0x230] sm:$0xff]  ;;  %v1189_v41 = vld [vmem:[#allocation2 + $0x101] sm:$0xff]  ;;  %v433_v44 = vadd.f32 %v3196_v32, %v394_v39  ;;  %v2676_v32 = vpack.c.bf16 %v1875_v7, %v1874_v43  ;;  %v2804_v51 = vpack.c.bf16 %v1939_v45, %v1938_v31  ;;  %v1877_v53 = vld [vmem:[%s3814_s1 + $0x158] sm:$0xff] }
  0x46   : > { %2651 = vmatpush3.bf16.msra.mxu1 %v2648_v21  ;;  %2779 = vmatpush3.bf16.msra.mxu0 %v2776_v27  ;;  %v3522_v21 = vld [vmem:[#allocation2 + $0x210] sm:$0xff]  ;;  %v1873_v27 = vld [vmem:[%s3814_s1 + $0x138] sm:$0xff]  ;;  %507 = vst.msk [vmem:[#allocation2 + $0x261] sm:$0xff] %vm475_vm0, %v473_v29  ;;  %v1878_v61 = vld [vmem:[%s3814_s1 + $0x160] sm:$0xff] }
  0x47   : > { %2653 = vmatprep.subr.bf16.mxu1 %v2652_v47  ;;  %2781 = vmatprep.subr.bf16.mxu0 %v2780_v48  ;;  %v2672_v40 = vpack.c.bf16 %v1873_v27, %v1872_v26  ;;  %v465_v49 = vmax.f32 %v433_v44, 0.0  ;;  %v1876_v52 = vld [vmem:[%s3814_s1 + $0x150] sm:$0xff]  ;;  %v1879_v62 = vld [vmem:[%s3814_s1 + $0x168] sm:$0xff]  ;;  %v1881_v5 = vld [vmem:[%s3814_s1 + $0x178] sm:$0xff] }
  0x48   : > { %v1940_v55 = vld [vmem:[%s3814_s1 + $0x350] sm:$0xff]  ;;  %v2680_v59 = vpack.c.bf16 %v1877_v53, %v1876_v52  ;;  %v2684_v2 = vpack.c.bf16 %v1879_v62, %v1878_v61  ;;  %v1883_v12 = vld [vmem:[%s3814_s1 + $0x188] sm:$0xff]  ;;  %v1946_v13 = vld [vmem:[%s3814_s1 + $0x380] sm:$0xff] }
  0x49   : > { %v3561_v46 = vld [vmem:[#allocation2 + $0x240] sm:$0xff]  ;;  %499 = vst.msk [vmem:[#allocation2 + $0x1c1] sm:$0xff] %vm475_vm0, %v465_v49  ;;  %v1880_v4 = vld [vmem:[%s3814_s1 + $0x170] sm:$0xff]  ;;  %v1947_v14 = vld [vmem:[%s3814_s1 + $0x388] sm:$0xff] }
  0x4a   : > { %2655 = vmatpush3.bf16.msra.mxu1 %v2652_v47  ;;  %2783 = vmatpush3.bf16.msra.mxu0 %v2780_v48  ;;  %v1190_v47 = vld [vmem:[#allocation2 + $0x111] sm:$0xff]  ;;  %v2820_v16 = vpack.c.bf16 %v1947_v14, %v1946_v13  ;;  %v1886_v28 = vld [vmem:[%s3814_s1 + $0x1a0] sm:$0xff]  ;;  %v1887_v29 = vld [vmem:[%s3814_s1 + $0x1a8] sm:$0xff] }
  0x4b   : > { %2657 = vmatprep.subr.bf16.mxu1 %v2656_v56  ;;  %2785 = vmatprep.subr.bf16.mxu0 %v2784_v57  ;;  %v3563_v48 = vld [vmem:[#allocation2 + $0x250] sm:$0xff]  ;;  %v1191_v50 = vld [vmem:[#allocation2 + $0x121] sm:$0xff]  ;;  %v1885_v22 = vld [vmem:[%s3814_s1 + $0x198] sm:$0xff] }
  0x4c   : > { %v1950_v33 = vld [vmem:[%s3814_s1 + $0x3a0] sm:$0xff]  ;;  %v1951_v35 = vld [vmem:[%s3814_s1 + $0x3a8] sm:$0xff]  ;;  %v3647_v39 = vld [vmem:[#allocation2 + $0x211] sm:$0xff] }
  0x4d   : > { %v1889_v43 = vld [vmem:[%s3814_s1 + $0x1b8] sm:$0xff]  ;;  %v3664_v44 = vld [vmem:[#allocation2 + $0x221] sm:$0xff]  ;;  %v1964_v13 = vld [vmem:[%s3814_s1 + $0x410] sm:$0xff] }
  0x4e   : > { %2659 = vmatpush3.bf16.msra.mxu1 %v2656_v56  ;;  %2787 = vmatpush3.bf16.msra.mxu0 %v2784_v57  ;;  %v1941_v56 = vld [vmem:[%s3814_s1 + $0x358] sm:$0xff]  ;;  %v769_v57 = vld [vmem:[#allocation2 + $0x1e1] sm:$0xff] }
  0x4f   : > { %2661 = vmatprep.subr.bf16.mxu1 %v2660_v0  ;;  %2789 = vmatprep.subr.bf16.mxu0 %v2788_v1  ;;  %v2808_v60 = vpack.c.bf16 %v1941_v56, %v1940_v55  ;;  %v1953_v7 = vld [vmem:[%s3814_s1 + $0x3b8] sm:$0xff]  ;;  %v1890_v49 = vld [vmem:[%s3814_s1 + $0x1c0] sm:$0xff]  ;;  %v1892_v56 = vld [vmem:[%s3814_s1 + $0x1d0] sm:$0xff] }
  0x50   : > { %v3667_v31 = vld [vmem:[#allocation2 + $0x231] sm:$0xff]  ;;  %v1330_v53 = vld [vmem:[#allocation2 + $0x260] sm:$0xff] }
  0x51   : > { %2277 = vmatmul.mubr.f32.vlgmr.msra.gmra.mrb[0].mxu1 %v3503_v6  ;;  %2453 = vmatmul.mubr.f32.vlgmr.msra.gmra.mrb[0].mxu0 %v1185_v8  ;;  %v1944_v8 = vld [vmem:[%s3814_s1 + $0x370] sm:$0xff]  ;;  %v1894_v62 = vld [vmem:[%s3814_s1 + $0x1e0] sm:$0xff]  ;;  %v1965_v14 = vld [vmem:[%s3814_s1 + $0x418] sm:$0xff] }
  0x52   : > { %2663 = vmatpush3.bf16.msra.mxu1 %v2660_v0  ;;  %2791 = vmatpush3.bf16.msra.mxu0 %v2788_v1  ;;  %v1942_v0 = vld [vmem:[%s3814_s1 + $0x360] sm:$0xff]  ;;  %v1943_v1 = vld [vmem:[%s3814_s1 + $0x368] sm:$0xff] }
  0x53   : > { %2665 = vmatprep.subr.bf16.mxu1 %v2664_v9  ;;  %2793 = vmatprep.subr.bf16.mxu0 %v2792_v11  ;;  %v2812_v3 = vpack.c.bf16 %v1943_v1, %v1942_v0  ;;  %v1895_v0 = vld [vmem:[%s3814_s1 + $0x1e8] sm:$0xff] }
  0x54   : > { %2279 = vmatprep.mubr.f32.mxu1 %v3520_v18  ;;  %2455 = vmatprep.mubr.f32.mxu0 %v1186_v20  ;;  %v1884_v20 = vld [vmem:[%s3814_s1 + $0x190] sm:$0xff]  ;;  %v1959_v1 = vld [vmem:[%s3814_s1 + $0x3e8] sm:$0xff] }
  0x55   : > { %2280 = vmatmul.mubr.f32.gmra.mrb[2].mxu1 %v3522_v21  ;;  %2456 = vmatmul.mubr.f32.gmra.mrb[2].mxu0 %v1187_v24  ;;  %v1949_v24 = vld [vmem:[%s3814_s1 + $0x398] sm:$0xff]  ;;  %v2696_v26 = vpack.c.bf16 %v1885_v22, %v1884_v20  ;;  %v2856_v20 = vpack.c.bf16 %v1965_v14, %v1964_v13  ;;  %v1966_v22 = vld [vmem:[%s3814_s1 + $0x420] sm:$0xff] }
  0x56   : > { %2667 = vmatpush3.bf16.msra.mxu1 %v2664_v9  ;;  %2795 = vmatpush3.bf16.msra.mxu0 %v2792_v11  ;;  %v2688_v9 = vpack.c.bf16 %v1881_v5, %v1880_v4  ;;  %v1882_v11 = vld [vmem:[%s3814_s1 + $0x180] sm:$0xff]  ;;  %v1896_v4 = vld [vmem:[%s3814_s1 + $0x1f0] sm:$0xff]  ;;  %v1897_v5 = vld [vmem:[%s3814_s1 + $0x1f8] sm:$0xff] }
  0x57   : > { %2669 = vmatprep.subr.bf16.mxu1 %v2668_v23  ;;  %2797 = vmatprep.subr.bf16.mxu0 %v2796_v25  ;;  %v2692_v15 = vpack.c.bf16 %v1883_v12, %v1882_v11  ;;  %v1963_v11 = vld [vmem:[%s3814_s1 + $0x408] sm:$0xff] }
  0x58   : > { %2282 = vmatprep.mubr.f32.mxu1 %v3539_v34  ;;  %2458 = vmatprep.mubr.f32.mxu0 %v1188_v36  ;;  %v3644_v36 = vld [vmem:[#allocation2 + $0x201] sm:$0xff] }
  0x59   : > { %2283 = vmatmul.mubr.f32.gmra.mrb[4].mxu1 %v3542_v37  ;;  %2459 = vmatmul.mubr.f32.gmra.mrb[4].mxu0 %v1189_v41  ;;  %v2828_v41 = vpack.c.bf16 %v1951_v35, %v1950_v33  ;;  %v1970_v35 = vld [vmem:[%s3814_s1 + $0x440] sm:$0xff] }
  0x5a   : > { %2671 = vmatpush3.bf16.msra.mxu1 %v2668_v23  ;;  %2799 = vmatpush3.bf16.msra.mxu0 %v2796_v25  ;;  %v1948_v23 = vld [vmem:[%s3814_s1 + $0x390] sm:$0xff] }
  0x5b   : > { %2673 = vmatprep.subr.bf16.mxu1 %v2672_v40  ;;  %2801 = vmatprep.subr.bf16.mxu0 %v2800_v42  ;;  %v3629_v25 = vld [vmem:[#allocation2 + $0x1f1] sm:$0xff]  ;;  %v2824_v27 = vpack.c.bf16 %v1949_v24, %v1948_v23  ;;  %v1967_v23 = vld [vmem:[%s3814_s1 + $0x428] sm:$0xff]  ;;  %v911_v24 = vld [vmem:[#allocation2 + $0xe0] sm:$0xff] }
  0x5c   : > { %2285 = vmatprep.mubr.f32.mxu1 %v3561_v46  ;;  %2461 = vmatprep.mubr.f32.mxu0 %v1190_v47 }
  0x5d   : > { %2286 = vmatmul.mubr.f32.gmra.mrb[6].mxu1 %v3563_v48  ;;  %2462 = vmatmul.mubr.f32.gmra.mrb[6].mxu0 %v1191_v50  ;;  %v3684_v50 = vld [vmem:[#allocation2 + $0x241] sm:$0xff] }
  0x5e   : > { %2675 = vmatpush3.bf16.msra.mxu1 %v2672_v40  ;;  %2803 = vmatpush3.bf16.msra.mxu0 %v2800_v42  ;;  %v2700_v40 = vpack.c.bf16 %v1887_v29, %v1886_v28  ;;  %v1888_v42 = vld [vmem:[%s3814_s1 + $0x1b0] sm:$0xff]  ;;  %v1969_v29 = vld [vmem:[%s3814_s1 + $0x438] sm:$0xff] }
  0x5f   : > { %2677 = vmatprep.subr.bf16.mxu1 %v2676_v32  ;;  %2805 = vmatprep.subr.bf16.mxu0 %v2804_v51  ;;  %v2704_v45 = vpack.c.bf16 %v1889_v43, %v1888_v42  ;;  %v1968_v28 = vld [vmem:[%s3814_s1 + $0x430] sm:$0xff]  ;;  %v1973_v43 = vld [vmem:[%s3814_s1 + $0x458] sm:$0xff] }
  0x60   : > { %2320 = vmatprep.mubr.f32.mxu1 %v769_v57  ;;  %2496 = vmatprep.mubr.f32.mxu0 %v3503_v6  ;;  %v1945_v6 = vld [vmem:[%s3814_s1 + $0x378] sm:$0xff]  ;;  %v2864_v33 = vpack.c.bf16 %v1969_v29, %v1968_v28  ;;  %v1972_v42 = vld [vmem:[%s3814_s1 + $0x450] sm:$0xff] }
  0x61   : > { %v2816_v10 = vpack.c.bf16 %v1945_v6, %v1944_v8  ;;  %v1957_v57 = vld [vmem:[%s3814_s1 + $0x3d8] sm:$0xff]  ;;  %v1960_v8 = vld [vmem:[%s3814_s1 + $0x3f0] sm:$0xff]  ;;  %v2720_v6 = vpack.c.bf16 %v1897_v5, %v1896_v4 }
  0x62   : > { %2679 = vmatpush3.bf16.msra.mxu1 %v2676_v32  ;;  %2807 = vmatpush3.bf16.msra.mxu0 %v2804_v51  ;;  %v1955_v32 = vld [vmem:[%s3814_s1 + $0x3c8] sm:$0xff]  ;;  %v3687_v51 = vld [vmem:[#allocation2 + $0x251] sm:$0xff] }
  0x63   : > { %2681 = vmatprep.subr.bf16.mxu1 %v2680_v59  ;;  %2809 = vmatprep.subr.bf16.mxu0 %v2808_v60 }
  0x66   : > { %2683 = vmatpush3.bf16.msra.mxu1 %v2680_v59  ;;  %2811 = vmatpush3.bf16.msra.mxu0 %v2808_v60  ;;  %v908_v59 = vld [vmem:[#allocation2 + $0xb0] sm:$0xff] }
  0x67   : > { %2685 = vmatprep.subr.bf16.mxu1 %v2684_v2  ;;  %2813 = vmatprep.subr.bf16.mxu0 %v2812_v3 }
  0x6a   : > { %2687 = vmatpush3.bf16.msra.mxu1 %v2684_v2  ;;  %2815 = vmatpush3.bf16.msra.mxu0 %v2812_v3  ;;  %v2716_v2 = vpack.c.bf16 %v1895_v0, %v1894_v62 }
  0x6b   : > { %2689 = vmatprep.subr.bf16.mxu1 %v2688_v9  ;;  %2817 = vmatprep.subr.bf16.mxu0 %v2816_v10 }
  0x6e   : > { %2691 = vmatpush3.bf16.msra.mxu1 %v2688_v9  ;;  %2819 = vmatpush3.bf16.msra.mxu0 %v2816_v10  ;;  %v1962_v10 = vld [vmem:[%s3814_s1 + $0x400] sm:$0xff] }
  0x6f   : > { %2693 = vmatprep.subr.bf16.mxu1 %v2692_v15  ;;  %2821 = vmatprep.subr.bf16.mxu0 %v2820_v16  ;;  %v2852_v12 = vpack.c.bf16 %v1963_v11, %v1962_v10 }
  0x71   : > { %2321 = vmatmul.mubr.f32.vlgmr.msra.gmra.mrb[0].mxu1 %v3629_v25  ;;  %2497 = vmatmul.mubr.f32.vlgmr.msra.gmra.mrb[0].mxu0 %v3520_v18  ;;  %v1952_v18 = vld [vmem:[%s3814_s1 + $0x3b0] sm:$0xff] }
  0x72   : > { %2695 = vmatpush3.bf16.msra.mxu1 %v2692_v15  ;;  %2823 = vmatpush3.bf16.msra.mxu0 %v2820_v16  ;;  %v2832_v47 = vpack.c.bf16 %v1953_v7, %v1952_v18  ;;  %v909_v15 = vld [vmem:[#allocation2 + $0xc0] sm:$0xff]  ;;  %v910_v16 = vld [vmem:[#allocation2 + $0xd0] sm:$0xff]  ;;  %v1975_v18 = vld [vmem:[%s3814_s1 + $0x468] sm:$0xff] }
  0x73   : > { %2697 = vmatprep.subr.bf16.mxu1 %v2696_v26  ;;  %2825 = vmatprep.subr.bf16.mxu0 %v2824_v27 }
  0x74   : > { %2323 = vmatprep.mubr.f32.mxu1 %v3644_v36  ;;  %2499 = vmatprep.mubr.f32.mxu0 %v3522_v21  ;;  %v1891_v21 = vld [vmem:[%s3814_s1 + $0x1c8] sm:$0xff] }
  0x75   : > { %2324 = vmatmul.mubr.f32.gmra.mrb[2].mxu1 %v3647_v39  ;;  %2500 = vmatmul.mubr.f32.gmra.mrb[2].mxu0 %v3539_v34  ;;  %v1954_v34 = vld [vmem:[%s3814_s1 + $0x3c0] sm:$0xff]  ;;  %v2708_v52 = vpack.c.bf16 %v1891_v21, %v1890_v49 }
  0x76   : > { %2699 = vmatpush3.bf16.msra.mxu1 %v2696_v26  ;;  %2827 = vmatpush3.bf16.msra.mxu0 %v2824_v27  ;;  %v2836_v55 = vpack.c.bf16 %v1955_v32, %v1954_v34  ;;  %v912_v26 = vld [vmem:[#allocation2 + $0xf0] sm:$0xff]  ;;  %v2860_v27 = vpack.c.bf16 %v1967_v23, %v1966_v22 }
  0x77   : > { %2701 = vmatprep.subr.bf16.mxu1 %v2700_v40  ;;  %2829 = vmatprep.subr.bf16.mxu0 %v2828_v41 }
  0x78   : > { %2326 = vmatprep.mubr.f32.mxu1 %v3664_v44  ;;  %2502 = vmatprep.mubr.f32.mxu0 %v3542_v37  ;;  %v1893_v37 = vld [vmem:[%s3814_s1 + $0x1d8] sm:$0xff] }
  0x79   : > { %2327 = vmatmul.mubr.f32.gmra.mrb[4].mxu1 %v3667_v31  ;;  %2503 = vmatmul.mubr.f32.gmra.mrb[4].mxu0 %v3561_v46  ;;  %v1956_v46 = vld [vmem:[%s3814_s1 + $0x3d0] sm:$0xff]  ;;  %v2712_v60 = vpack.c.bf16 %v1893_v37, %v1892_v56 }
  0x7a   : > { %2703 = vmatpush3.bf16.msra.mxu1 %v2700_v40  ;;  %2831 = vmatpush3.bf16.msra.mxu0 %v2828_v41  ;;  %v2840_v61 = vpack.c.bf16 %v1957_v57, %v1956_v46  ;;  %v1971_v40 = vld [vmem:[%s3814_s1 + $0x448] sm:$0xff] }
  0x7b   : > { %2705 = vmatprep.subr.bf16.mxu1 %v2704_v45  ;;  %2833 = vmatprep.subr.bf16.mxu0 %v2832_v47  ;;  %v2868_v41 = vpack.c.bf16 %v1971_v40, %v1970_v35 }
  0x7c   : > { %2329 = vmatprep.mubr.f32.mxu1 %v3684_v50  ;;  %2505 = vmatprep.mubr.f32.mxu0 %v3563_v48  ;;  %v1958_v48 = vld [vmem:[%s3814_s1 + $0x3e0] sm:$0xff] }
  0x7d   : > { %2330 = vmatmul.mubr.f32.gmra.mrb[6].mxu1 %v3687_v51  ;;  %2506 = vmatmul.mubr.f32.gmra.mrb[6].mxu0 %v1330_v53  ;;  %v2844_v3 = vpack.c.bf16 %v1959_v1, %v1958_v48  ;;  %v1979_v1 = vld [vmem:[%s3818_s5] ss:$0 sm:$0xff] }
  0x7e   : > { %2707 = vmatpush3.bf16.msra.mxu1 %v2704_v45  ;;  %2835 = vmatpush3.bf16.msra.mxu0 %v2832_v47  ;;  %v1976_v45 = vld [vmem:[%s3814_s1 + $0x470] sm:$0xff]  ;;  %v1977_v47 = vld [vmem:[%s3814_s1 + $0x478] sm:$0xff] }
  0x7f   : > { %2709 = vmatprep.subr.bf16.mxu1 %v2708_v52  ;;  %2837 = vmatprep.subr.bf16.mxu0 %v2836_v55  ;;  %v2880_v49 = vpack.c.bf16 %v1977_v47, %v1976_v45 }
  0x80   : > { %2364 = vmatprep.mubr.f32.mxu1 %v908_v59  ;;  %2540 = vmatprep.mubr.f32.mxu0 %v3320_v63  ;;  %v1961_v63 = vld [vmem:[%s3814_s1 + $0x3f8] sm:$0xff] }
  0x81   : > { %v2848_v9 = vpack.c.bf16 %v1961_v63, %v1960_v8 }
  0x82   : > { %2711 = vmatpush3.bf16.msra.mxu1 %v2708_v52  ;;  %2839 = vmatpush3.bf16.msra.mxu0 %v2836_v55 }
  0x83   : > { %2713 = vmatprep.subr.bf16.mxu1 %v2712_v60  ;;  %2841 = vmatprep.subr.bf16.mxu0 %v2840_v61 }
  0x86   : > { %2715 = vmatpush3.bf16.msra.mxu1 %v2712_v60  ;;  %2843 = vmatpush3.bf16.msra.mxu0 %v2840_v61 }
  0x87   : > { %2717 = vmatprep.subr.bf16.mxu1 %v2716_v2  ;;  %2845 = vmatprep.subr.bf16.mxu0 %v2844_v3 }
  0x8a   : > { %2719 = vmatpush3.bf16.msra.mxu1 %v2716_v2  ;;  %2847 = vmatpush3.bf16.msra.mxu0 %v2844_v3 }
  0x8b   : > { %2721 = vmatprep.subr.bf16.mxu1 %v2720_v6  ;;  %2849 = vmatprep.subr.bf16.mxu0 %v2848_v9 }
  0x8e   : > { %2723 = vmatpush3.bf16.msra.mxu1 %v2720_v6  ;;  %2851 = vmatpush3.bf16.msra.mxu0 %v2848_v9 }
  0x8f   : > { %2884 = vmatprep.subr.bf16.mxu1 %v2852_v12  ;;  %2853 = vmatprep.subr.bf16.mxu0 %v2852_v12 }
  0x91   : > { %2365 = vmatmul.mubr.f32.vlgmr.msra.gmra.mrb[0].mxu1 %v909_v15  ;;  %2541 = vmatmul.mubr.f32.vlgmr.msra.gmra.mrb[0].mxu0 %v3343_v17  ;;  %v913_v17 = vld [vmem:[#allocation2 + $0x100] sm:$0xff] }
  0x92   : > { %2892 = vmatpush3.bf16.msra.mxu1 %v2852_v12  ;;  %2855 = vmatpush3.bf16.msra.mxu0 %v2852_v12 }
  0x93   : > { %2367 = vmatprep.mubr.f32.mxu1 %v910_v16  ;;  %2543 = vmatprep.mubr.f32.mxu0 %v3347_v19  ;;  %v914_v19 = vld [vmem:[#allocation2 + $0x110] sm:$0xff] }
  0x94   : > { %2857 = vmatprep.subr.bf16.mxu0 %v2856_v20  ;;  %2885 = vmatprep.subr.bf16.mxu1 %v2856_v20 }
  0x95   : > { %2368 = vmatmul.mubr.f32.gmra.mrb[2].mxu1 %v911_v24  ;;  %2544 = vmatmul.mubr.f32.gmra.mrb[2].mxu0 %v3367_v30  ;;  %v915_v30 = vld [vmem:[#allocation2 + $0x120] sm:$0xff] }
  0x96   : > { %2893 = vmatpush3.bf16.msra.mxu1 %v2856_v20  ;;  %2859 = vmatpush3.bf16.msra.mxu0 %v2856_v20 }
  0x97   : > { %2370 = vmatprep.mubr.f32.mxu1 %v912_v26  ;;  %2546 = vmatprep.mubr.f32.mxu0 %v3377_v38  ;;  %v1469_v38 = vld [vmem:[#allocation2 + $0x1c1] sm:$0xff] }
  0x98   : > { %2861 = vmatprep.subr.bf16.mxu0 %v2860_v27  ;;  %2886 = vmatprep.subr.bf16.mxu1 %v2860_v27 }
  0x99   : > { %2371 = vmatmul.mubr.f32.gmra.mrb[4].mxu1 %v913_v17  ;;  %2547 = vmatmul.mubr.f32.gmra.mrb[4].mxu0 %v3403_v54  ;;  %v2872_v54 = vpack.c.bf16 %v1973_v43, %v1972_v42 }
  0x9a   : > { %2894 = vmatpush3.bf16.msra.mxu1 %v2860_v27  ;;  %2863 = vmatpush3.bf16.msra.mxu0 %v2860_v27 }
  0x9b   : > { %2373 = vmatprep.mubr.f32.mxu1 %v914_v19  ;;  %2549 = vmatprep.mubr.f32.mxu0 %v3406_v58  ;;  %v1974_v58 = vld [vmem:[%s3814_s1 + $0x460] sm:$0xff] }
  0x9c   : > { %2865 = vmatprep.subr.bf16.mxu0 %v2864_v33  ;;  %2887 = vmatprep.subr.bf16.mxu1 %v2864_v33  ;;  %v2876_v7 = vpack.c.bf16 %v1975_v18, %v1974_v58 }
  0x9d   : > { %2374 = vmatmul.mubr.f32.gmra.mrb[6].mxu1 %v915_v30  ;;  %2550 = vmatmul.mubr.f32.gmra.mrb[6].mxu0 %v1469_v38 }
  0x9e   : > { %2895 = vmatpush3.bf16.msra.mxu1 %v2864_v33  ;;  %2867 = vmatpush3.bf16.msra.mxu0 %v2864_v33 }
  0x9f   : > { %2888 = vmatprep.subr.bf16.mxu1 %v2868_v41  ;;  %2869 = vmatprep.subr.bf16.mxu0 %v2868_v41 }
  0xa0   : > { %2584 = vmatprep.mubr.f32.mxu0 %v3629_v25  ;;  %2590 = vmatprep.mubr.f32.mxu1 %v3667_v31  ;;  %v1607_v25 = vld [vmem:[#allocation2 + $0x261] sm:$0xff] }
  0xa2   : > { %2896 = vmatpush3.bf16.msra.mxu1 %v2868_v41  ;;  %2871 = vmatpush3.bf16.msra.mxu0 %v2868_v41 }
  0xa3   : > { %2889 = vmatprep.subr.bf16.mxu1 %v2872_v54  ;;  %2873 = vmatprep.subr.bf16.mxu0 %v2872_v54 }
  0xa6   : > { %2897 = vmatpush3.bf16.msra.mxu1 %v2872_v54  ;;  %2875 = vmatpush3.bf16.msra.mxu0 %v2872_v54 }
  0xa7   : > { %2890 = vmatprep.subr.bf16.mxu1 %v2876_v7  ;;  %2877 = vmatprep.subr.bf16.mxu0 %v2876_v7 }
  0xaa   : > { %2898 = vmatpush3.bf16.msra.mxu1 %v2876_v7  ;;  %2879 = vmatpush3.bf16.msra.mxu0 %v2876_v7 }
  0xab   : > { %2891 = vmatprep.subr.bf16.mxu1 %v2880_v49  ;;  %2881 = vmatprep.subr.bf16.mxu0 %v2880_v49 }
  0xae   : > { %2899 = vmatpush3.bf16.msra.mxu1 %v2880_v49  ;;  %2883 = vmatpush3.bf16.msra.mxu0 %v2880_v49 }
  0xb1   : > { %2591 = vmatmul.mubr.f32.vlgmr.msra.gmra.mrb[8].mxu1 %v3684_v50  ;;  %2585 = vmatmul.mubr.f32.vlgmr.msra.gmra.mrb[0].mxu0 %v3644_v36 }
  0xb2   : > { %2593 = vmatprep.mubr.f32.mxu1 %v3687_v51  ;;  %2587 = vmatprep.mubr.f32.mxu0 %v3647_v39 }
  0xb5   : > { %2594 = vmatmul.mubr.f32.gmra.mrb[10].mxu1 %v1607_v25  ;;  %2588 = vmatmul.mubr.f32.gmra.mrb[2].mxu0 %v3664_v44  ;;  %v1978_v44 = vld [vmem:[%s3817_s4] ss:$0 sm:$0xff] }
 0x164   : > { %v2366_v31 = vpop.f32.mrb[0].mxu1 }
 0x165   : > { %v999_v21 = vpop.f32.mrb[1].mxu1 }
 0x168   : > { %v2369_v34 = vpop.f32.mrb[2].mxu1 }
 0x169   : > { %v1009_v32 = vpop.f32.mrb[3].mxu1 }
 0x16c   : > { %v2372_v52 = vpop.f32.mrb[4].mxu1  ;;  %v2548_v53 = vpop.f32.mrb[4].mxu0 }
 0x16d   : > { %v1019_v55 = vpop.f32.mrb[5].mxu1  ;;  %v2904_v56 = vadd.f32 %v2548_v53, %v2372_v52  ;;  %v1573_v37 = vpop.f32.mrb[5].mxu0 }
 0x16e   : > { %v2906_v50 = vadd.f32 %v1573_v37, %v1019_v55 }
 0x170   : > { %v2375_v36 = vpop.f32.mrb[6].mxu1  ;;  %v2551_v46 = vpop.f32.mrb[6].mxu0 }
 0x171   : > { %v1029_v51 = vpop.f32.mrb[7].mxu1  ;;  %v2908_v57 = vadd.f32 %v2551_v46, %v2375_v36  ;;  %v1583_v59 = vpop.f32.mrb[7].mxu0 }
 0x172   : > { %v2910_v39 = vadd.f32 %v1583_v59, %v1029_v51 }
 0x184   : > { %v2592_v60 = vpop.f32.mrb[8].mxu1  ;;  %v2586_v61 = vpop.f32.mrb[0].mxu0 }
 0x185   : > { %v2905_v62 = vadd.f32 %v2904_v56, %v2592_v60  ;;  %v1711_v0 = vpop.f32.mrb[9].mxu1  ;;  %v2900_v48 = vadd.f32 %v2586_v61, %v2366_v31  ;;  %v1691_v2 = vpop.f32.mrb[1].mxu0 }
 0x186   : > { %v2907_v3 = vadd.f32 %v2906_v50, %v1711_v0  ;;  %v2901_v5 = vadd.f32 %v1691_v2, %v999_v21 }
 0x187   : > { %v1750_v4 = vmul.f32 %v2905_v62, %v1978_v44  ;;  %v1746_v8 = vmul.f32 %v2900_v48, %v1978_v44 }
 0x188   : > { %v1749_v63 = vmul.f32 %v2907_v3, %v1978_v44  ;;  %v2595_v6 = vpop.f32.mrb[10].mxu1  ;;  %v1745_v10 = vmul.f32 %v2901_v5, %v1978_v44  ;;  %v2589_v11 = vpop.f32.mrb[2].mxu0 }
 0x189   : > { %v1765_v9 = vadd.f32 %v1979_v1, %v1750_v4  ;;  %v2909_v12 = vadd.f32 %v2908_v57, %v2595_v6  ;;  %v1721_v13 = vpop.f32.mrb[11].mxu1  ;;  %v1761_v14 = vadd.f32 %v1979_v1, %v1746_v8  ;;  %v2902_v16 = vadd.f32 %v2589_v11, %v2369_v34  ;;  %v1701_v20 = vpop.f32.mrb[3].mxu0 }
 0x18a   : > { %v1764_v15 = vadd.f32 %v1979_v1, %v1749_v63  ;;  %v2911_v22 = vadd.f32 %v2910_v39, %v1721_v13  ;;  %v1760_v24 = vadd.f32 %v1979_v1, %v1745_v10  ;;  %v2903_v27 = vadd.f32 %v1701_v20, %v1009_v32 }
 0x18b   : > { %v1773_v23 = vmax.f32 %v1765_v9, 0.0  ;;  %v1752_v26 = vmul.f32 %v2909_v12, %v1978_v44  ;;  %v1769_v28 = vmax.f32 %v1761_v14, 0.0  ;;  %v1748_v17 = vmul.f32 %v2902_v16, %v1978_v44 }
 0x18c   : > { %v1772_v29 = vmax.f32 %v1764_v15, 0.0  ;;  %v1751_v19 = vmul.f32 %v2911_v22, %v1978_v44  ;;  %v1768_v33 = vmax.f32 %v1760_v24, 0.0  ;;  %v1747_v40 = vmul.f32 %v2903_v27, %v1978_v44 }
 0x18d   : > { %1781 = vst [vmem:[%s3800_s24 + $0x28] sm:$0xff] %v1773_v23  ;;  %v1767_v35 = vadd.f32 %v1979_v1, %v1752_v26  ;;  %1777 = vst [vmem:[%s3800_s24 + $0x8] sm:$0xff] %v1769_v28  ;;  %v1763_v30 = vadd.f32 %v1979_v1, %v1748_v17 }
 0x18e   : > { %1780 = vst [vmem:[%s3800_s24 + $0x20] sm:$0xff] %v1772_v29  ;;  %v1766_v38 = vadd.f32 %v1979_v1, %v1751_v19  ;;  %1776 = vst [vmem:[%s3800_s24] sm:$0xff] %v1768_v33  ;;  %v1762_v42 = vadd.f32 %v1979_v1, %v1747_v40 }
 0x18f   : > { %v1775_v41 = vmax.f32 %v1767_v35, 0.0  ;;  %v1771_v43 = vmax.f32 %v1763_v30, 0.0 }
 0x190   : > { %v1774_v54 = vmax.f32 %v1766_v38, 0.0  ;;  %v1770_v58 = vmax.f32 %v1762_v42, 0.0 }
 0x191   : > { %1783 = vst [vmem:[%s3800_s24 + $0x38] sm:$0xff] %v1775_v41  ;;  %1779 = vst [vmem:[%s3800_s24 + $0x18] sm:$0xff] %v1771_v43 }
 0x192   : > { %1782 = vst [vmem:[%s3800_s24 + $0x30] sm:$0xff] %v1774_v54  ;;  %1778 = vst [vmem:[%s3800_s24 + $0x10] sm:$0xff] %v1770_v58 }
 0x193 PF: > { %s16_s21 = sadd.s32 1, %s2979_s21  }
 0x194   : > { %p13_p4 = scmp.ge.s32.totalorder %s16_s21, 4  }
 0x196   :  { %15 = sbr.rel (!%p13_p4) target bundleno = 1 (0x1), region = 88 }

</bundles_post_ra>
